<compile_context>
chip_gen: v7x
topology: tpu7x:2x2x1
jax: 0.10.0
libtpu: 0.0.40
codegen_flags: <defaults>
</compile_context>

<pallas_src>
import math
import functools

import jax
import jax.numpy as jnp
from jax.experimental import pallas as pl
from jax.experimental.pallas import tpu as pltpu


# --------------------------------------------------------------------------
# Static tiling plan
# --------------------------------------------------------------------------
def _round_up(x, m):
    return (x + m - 1) // m * m


def _tile_plan(n):
    """(conv samples per grid step, head rows per grid step, padded N)."""
    n8 = _round_up(max(n, 1), 8)
    conv_bs = min(32, n8)                               # multiple of 8, <= 32
    head_tile = min(256, _round_up(n8, conv_bs))        # multiple of conv_bs
    n_pad = _round_up(max(n, 1), head_tile)             # multiple of both tiles
    return conv_bs, head_tile, n_pad


# --------------------------------------------------------------------------
# Kernel 1: fused conv tower, Bs samples packed along lanes per grid step
# --------------------------------------------------------------------------
def _conv_tower_kernel(ce_ref, co_ref, w1_ref, b1_ref, w2_ref, b2_ref, o_ref, *, bs):
    """conv1(k5,s2,p1)+ReLU -> conv2(k3,s2,p1)+ReLU for `bs` lane-packed samples.

    ce_ref/co_ref: (Cin*5, bs*128) im2col patches for even/odd conv1 outputs
                   (contraction on sublanes, sample*position on lanes)
    w1_ref: (32, Cin*5)     b1_ref: (32, 1)
    w2_ref: (32, 96)        columns = [left tap cin0..31 | center | right]
    b2_ref: (32, 1)
    o_ref : (bs, 32, 128)   conv2 output, per-sample NCL layout, bf16
    """
    w1 = w1_ref[...]
    b1 = b1_ref[...]

    # conv1 as two lane-dense matmuls (even / odd output positions).
    a1_e = jnp.maximum(
        jnp.dot(w1, ce_ref[...], preferred_element_type=jnp.float32) + b1, 0.0)
    a1_o = jnp.maximum(
        jnp.dot(w1, co_ref[...], preferred_element_type=jnp.float32) + b1, 0.0)

    # Each sample's odd lane 127 is the non-existent conv1 position 255 -> zero.
    # (Also required so the cross-sample roll below only injects zeros.)
    lane = jax.lax.broadcasted_iota(jnp.int32, a1_o.shape, 1)
    a1_o = jnp.where(lane % 128 < 127, a1_o, 0.0)

    # conv2 taps for output position l (stride 2, pad 1):
    #   left  : a1[2l-1] -> odd set rolled right by one lane (pad / prev dummy = 0)
    #   center: a1[2l]   -> even set
    #   right : a1[2l+1] -> odd set
    a1_left = pltpu.roll(a1_o, shift=1, axis=1)

    # Fused conv2: one (32,96) x (96, bs*128) matmul over the stacked taps.
    a1_stack = jnp.concatenate([a1_left, a1_e, a1_o], axis=0)            # (96, bs*128)
    a2 = jnp.dot(w2_ref[...], a1_stack, preferred_element_type=jnp.float32) + b2_ref[...]
    a2 = jnp.maximum(a2, 0.0).astype(o_ref.dtype)                        # (32, bs*128)

    # Scatter lanes back to per-sample (32,128) NCL slabs (same total vst count
    # as one lane-dense store; keeps the channel-major flatten free downstream).
    for s in range(bs):
        o_ref[s] = a2[:, s * 128:(s + 1) * 128]


def conv_tower(cols_e, cols_o, w1, b1, w2, b2, *, n_pad, bs):
    kin = cols_e.shape[0]
    const2 = lambda i: (0, 0)
    return pl.pallas_call(
        functools.partial(_conv_tower_kernel, bs=bs),
        out_shape=jax.ShapeDtypeStruct((n_pad, 32, 128), jnp.bfloat16),
        grid=(n_pad // bs,),
        in_specs=[
            pl.BlockSpec((kin, bs * 128), lambda i: (0, i)),
            pl.BlockSpec((kin, bs * 128), lambda i: (0, i)),
            pl.BlockSpec((32, kin), const2),
            pl.BlockSpec((32, 1), const2),
            pl.BlockSpec((32, 96), const2),
            pl.BlockSpec((32, 1), const2),
        ],
        out_specs=pl.BlockSpec((bs, 32, 128), lambda i: (i, 0, 0)),
        compiler_params=pltpu.CompilerParams(
            dimension_semantics=("parallel",),
            vmem_limit_bytes=32 * 1024 * 1024),
    )(cols_e, cols_o, w1, b1, w2, b2)


# --------------------------------------------------------------------------
# Kernel 2: fused head with an N-tiled "parallel" grid
# --------------------------------------------------------------------------
_HEAD_WEIGHT_KEYS = ("w_fc1", "b_fc1", "w_fc2_h", "w_fc2_gs", "b_fc2",
                     "w_fc3", "b_fc3", "w_a1_h", "w_a1_x", "b_a1",
                     "w_a2_h", "w_a2_gs", "b_a2", "w_mu", "b_mu", "logstd")


def _head_kernel(a_ref, gs_ref, x_ref, n_ref,
                 wfc1_ref, bfc1_ref, wfc2h_ref, wfc2gs_ref, bfc2_ref,
                 wfc3_ref, bfc3_ref, wa1h_ref, wa1x_ref, ba1_ref,
                 wa2h_ref, wa2gs_ref, ba2_ref, wmu_ref, bmu_ref, logstd_ref,
                 act_ref, logp_ref, mean_ref):
    f32 = jnp.float32
    gs = gs_ref[...]                                     # (T, 4) = cat(goal, speed)

    # fc1: dominant matmul -- bf16 x bf16 inputs, f32 accumulate + epilogue.
    h1 = jnp.dot(a_ref[...], wfc1_ref[...], preferred_element_type=f32) + bfc1_ref[...]
    h1 = jnp.maximum(h1, 0.0)                            # (T, 256)

    # fc2 on cat(h1, goal, speed): goal/speed folded into one K=4 operand.
    h2 = (jnp.dot(h1, wfc2h_ref[...], preferred_element_type=f32)
          + jnp.dot(gs, wfc2gs_ref[...], preferred_element_type=f32)
          + bfc2_ref[...])
    h2 = jnp.maximum(h2, 0.0)                            # (T, 128)

    # fc3
    h3 = jnp.maximum(
        jnp.dot(h2, wfc3_ref[...], preferred_element_type=f32) + bfc3_ref[...], 0.0)

    # act_fc1 on cat(h3, x)
    h4 = (jnp.dot(h3, wa1h_ref[...], preferred_element_type=f32)
          + jnp.dot(x_ref[...], wa1x_ref[...], preferred_element_type=f32)
          + ba1_ref[...])
    h4 = jnp.maximum(h4, 0.0)                            # (T, 64)

    # act_fc2 on cat(h4, goal, speed); tanh(relu(.))
    h5 = (jnp.dot(h4, wa2h_ref[...], preferred_element_type=f32)
          + jnp.dot(gs, wa2gs_ref[...], preferred_element_type=f32)
          + ba2_ref[...])
    h5 = jnp.tanh(jnp.maximum(h5, 0.0))                  # (T, 128)

    # mu head, sampling, log-density.  (action - mean)/std == noise, so the
    # density collapses to -0.5*noise^2 - 0.5*log(2*pi) - log_std.
    mean = jnp.dot(h5, wmu_ref[...], preferred_element_type=f32) + bmu_ref[...]
    log_std = logstd_ref[...]                            # (1, ctr_as)
    noise = n_ref[...]
    action = mean + jnp.exp(log_std) * noise
    ld = -0.5 * noise * noise - (0.5 * math.log(2.0 * math.pi)) - log_std

    # Narrow (<128 lane) outputs -> masked stores; accepted (tiny arrays).
    act_ref[...] = action
    mean_ref[...] = mean
    logp_ref[...] = jnp.sum(ld, axis=-1, keepdims=True)


def head(a2_flat, gs, xc, noise, p, *, tile):
    n_pad, kdim = a2_flat.shape
    ctr_as = p["w_mu"].shape[1]
    row = lambda i: (i, 0)
    const = lambda i: (0, 0)
    in_specs = [
        pl.BlockSpec((tile, kdim), row),
        pl.BlockSpec((tile, gs.shape[1]), row),
        pl.BlockSpec((tile, xc.shape[1]), row),
        pl.BlockSpec((tile, noise.shape[1]), row),
    ] + [pl.BlockSpec(p[k].shape, const) for k in _HEAD_WEIGHT_KEYS]
    return pl.pallas_call(
        _head_kernel,
        out_shape=(jax.ShapeDtypeStruct((n_pad, ctr_as), jnp.float32),   # action
                   jax.ShapeDtypeStruct((n_pad, 1), jnp.float32),        # logprob
                   jax.ShapeDtypeStruct((n_pad, ctr_as), jnp.float32)),  # mean
        grid=(n_pad // tile,),
        in_specs=in_specs,
        out_specs=(pl.BlockSpec((tile, ctr_as), row),
                   pl.BlockSpec((tile, 1), row),
                   pl.BlockSpec((tile, ctr_as), row)),
        compiler_params=pltpu.CompilerParams(
            dimension_semantics=("parallel",),
            vmem_limit_bytes=32 * 1024 * 1024),
    )(a2_flat, gs, xc, noise, *(p[k] for k in _HEAD_WEIGHT_KEYS))


# --------------------------------------------------------------------------
# XLA glue: conv1 im2col (k=5, s=2, p=1, 512 -> 255), even/odd output split,
# lane-packed layout (Cin*5, N*128) with contraction on sublanes.
# --------------------------------------------------------------------------
def _im2col_conv1(y_flat):
    n, c, l = y_flat.shape
    assert l == 512
    yp = jnp.pad(y_flat, ((0, 0), (0, 0), (1, 1)))                      # (N, C, 514)
    # even outputs l=2j, j=0..127 : padded taps 4j+k
    e = jnp.stack(
        [jnp.transpose(yp[:, :, k::4][:, :, :128], (1, 0, 2)) for k in range(5)],
        axis=1)                                                          # (C, 5, N, 128)
    # odd outputs  l=2j+1, j=0..126: padded taps 4j+2+k ; dummy j=127 kept zero
    o = jnp.stack(
        [jnp.transpose(yp[:, :, (k + 2)::4][:, :, :127], (1, 0, 2)) for k in range(5)],
        axis=1)                                                          # (C, 5, N, 127)
    o = jnp.pad(o, ((0, 0), (0, 0), (0, 0), (0, 1)))                     # (C, 5, N, 128)
    return e.reshape(c * 5, n * 128), o.reshape(c * 5, n * 128)


# --------------------------------------------------------------------------
# ControlActor forward
# --------------------------------------------------------------------------
def control_actor_forward(params, x, goal, speed, y, key, *, frames, n_agent):
    if goal.ndim < 3:
        goal = goal[None]
    if speed.ndim < 3:
        speed = speed[None]

    y_flat = y.reshape(-1, frames, 512)
    n = y_flat.shape[0]
    b = n // n_agent
    conv_bs, head_tile, n_pad = _tile_plan(n)
    pad = n_pad - n

    if pad:
        y_flat = jnp.pad(y_flat, ((0, pad), (0, 0), (0, 0)))
    cols_e, cols_o = _im2col_conv1(y_flat)
    a2 = conv_tower(cols_e, cols_o, params["w1"], params["b1"],
                    params["w2"], params["b2"], n_pad=n_pad, bs=conv_bs)
    a2_flat = a2.reshape(n_pad, 32 * 128)          # free: per-sample NCL flatten (bf16)

    ctr_as = params["w_mu"].shape[1]
    # TODO(synk): torch.normal replaced by jax.random.normal (different RNG stream).
    noise = jax.random.normal(key, (n, ctr_as), jnp.float32)
    gs = jnp.concatenate([goal.reshape(n, -1), speed.reshape(n, -1)], axis=-1)
    xc = x.reshape(n, -1)
    if pad:
        noise = jnp.pad(noise, ((0, pad), (0, 0)))
        gs = jnp.pad(gs, ((0, pad), (0, 0)))
        xc = jnp.pad(xc, ((0, pad), (0, 0)))

    action, logprob, mean = head(a2_flat, gs, xc, noise, params, tile=head_tile)
    return (action[:n].reshape(b, n_agent, ctr_as),
            logprob[:n].reshape(b, n_agent, 1),
            mean[:n].reshape(b, n_agent, ctr_as))


# --------------------------------------------------------------------------
# Deterministic parameter init (PyTorch-default-style uniform), stored in
# kernel-ready layouts.
# --------------------------------------------------------------------------
def init_params(key, frames, msg_as, ctr_as):
    keys = iter(jax.random.split(key, 32))

    def lin(fan_in, fan_out):
        bound = 1.0 / math.sqrt(fan_in)
        w = jax.random.uniform(next(keys), (fan_in, fan_out), jnp.float32, -bound, bound)
        b = jax.random.uniform(next(keys), (fan_out,), jnp.float32, -bound, bound)
        return w, b

    def conv(cin, cout, k):
        bound = 1.0 / math.sqrt(cin * k)
        w = jax.random.uniform(next(keys), (cout, cin, k), jnp.float32, -bound, bound)
        b = jax.random.uniform(next(keys), (cout,), jnp.float32, -bound, bound)
        return w, b

    cv1_w, cv1_b = conv(frames, 32, 5)          # act_obs_cv1
    cv2_w, cv2_b = conv(32, 32, 3)              # act_obs_cv2
    fc1_w, fc1_b = lin(128 * 32, 256)           # act_obs_fc1
    fc2_w, fc2_b = lin(256 + 2 + 2, 128)        # act_obs_fc2
    fc3_w, fc3_b = lin(128, 4 * msg_as)         # act_obs_fc3
    a1_w, a1_b = lin(8 * msg_as, 64)            # act_fc1
    a2_w, a2_b = lin(64 + 2 + 2, 128)           # act_fc2
    mu_w, mu_b = lin(128, ctr_as)               # mu
    mu_w = mu_w * 0.1                           # self.mu.weight.data.mul_(0.1)

    p = {}
    p["w1"] = cv1_w.reshape(32, frames * 5)                     # index cin*5 + k
    p["b1"] = cv1_b.reshape(32, 1)
    p["w2"] = jnp.transpose(cv2_w, (0, 2, 1)).reshape(32, 96)   # cols = [k0|k1|k2] x cin
    p["b2"] = cv2_b.reshape(32, 1)
    p["w_fc1"] = fc1_w.astype(jnp.bfloat16)                     # (4096, 256) bf16
    p["b_fc1"] = fc1_b.reshape(1, -1)
    p["w_fc2_h"] = fc2_w[:256]
    p["w_fc2_gs"] = fc2_w[256:260]                              # rows for cat(goal, speed)
    p["b_fc2"] = fc2_b.reshape(1, -1)
    p["w_fc3"] = fc3_w
    p["b_fc3"] = fc3_b.reshape(1, -1)
    p["w_a1_h"] = a1_w[:4 * msg_as]
    p["w_a1_x"] = a1_w[4 * msg_as:]
    p["b_a1"] = a1_b.reshape(1, -1)
    p["w_a2_h"] = a2_w[:64]
    p["w_a2_gs"] = a2_w[64:68]
    p["b_a2"] = a2_b.reshape(1, -1)
    p["w_mu"] = mu_w
    p["b_mu"] = mu_b.reshape(1, -1)
    p["logstd"] = jnp.zeros((1, ctr_as), jnp.float32)
    return p


# --------------------------------------------------------------------------
# Pure-JAX f32 reference of the PyTorch forward (for a loose correctness check)
# --------------------------------------------------------------------------
def _reference_forward(params, x, goal, speed, y, noise, *, frames, n_agent):
    if goal.ndim < 3:
        goal = goal[None]
    if speed.ndim < 3:
        speed = speed[None]
    yf = y.reshape(-1, frames, 512).astype(jnp.float32)
    n = yf.shape[0]
    b = n // n_agent

    w1 = params["w1"].reshape(32, frames, 5)
    w2 = jnp.transpose(params["w2"].reshape(32, 3, 32), (0, 2, 1))
    dn = ("NCH", "OIH", "NCH")
    a = jax.lax.conv_general_dilated(yf, w1, (2,), [(1, 1)], dimension_numbers=dn)
    a = jax.nn.relu(a + params["b1"].reshape(1, 32, 1))
    a = jax.lax.conv_general_dilated(a, w2, (2,), [(1, 1)], dimension_numbers=dn)
    a = jax.nn.relu(a + params["b2"].reshape(1, 32, 1))
    a = a.reshape(n, -1)

    gs = jnp.concatenate([goal.reshape(n, -1), speed.reshape(n, -1)], axis=-1)
    h1 = jax.nn.relu(a @ params["w_fc1"].astype(jnp.float32) + params["b_fc1"])
    h2 = jax.nn.relu(h1 @ params["w_fc2_h"] + gs @ params["w_fc2_gs"] + params["b_fc2"])
    h3 = jax.nn.relu(h2 @ params["w_fc3"] + params["b_fc3"])
    h4 = jax.nn.relu(h3 @ params["w_a1_h"] + x.reshape(n, -1) @ params["w_a1_x"]
                     + params["b_a1"])
    h5 = jnp.tanh(jax.nn.relu(h4 @ params["w_a2_h"] + gs @ params["w_a2_gs"]
                              + params["b_a2"]))
    mean = h5 @ params["w_mu"] + params["b_mu"]
    log_std = params["logstd"]
    std = jnp.exp(log_std)
    action = mean + std * noise
    diff = action - mean
    logp = jnp.sum(-(diff * diff) / (2.0 * std * std)
                   - 0.5 * math.log(2.0 * math.pi) - log_std, axis=-1, keepdims=True)
    ctr = params["w_mu"].shape[1]
    return (action.reshape(b, n_agent, ctr),
            logp.reshape(b, n_agent, 1),
            mean.reshape(b, n_agent, ctr))


# --------------------------------------------------------------------------
if __name__ == "__main__":
    msg_action_space = 2
    ctr_action_space = 2
    frames = 3
    n_agent = 4
    batch = 2

    root = jax.random.PRNGKey(0)
    kp, kx, kg, ks, ky, kn = jax.random.split(root, 6)

    params = init_params(kp, frames, msg_action_space, ctr_action_space)

    x = jax.random.normal(kx, (batch, n_agent, 4 * msg_action_space), jnp.float32)
    goal = jax.random.normal(kg, (batch, n_agent, 2), jnp.float32)
    speed = jax.random.normal(ks, (batch, n_agent, 2), jnp.float32)
    y = jax.random.normal(ky, (batch, n_agent, frames, 512), jnp.float32)

    fwd = jax.jit(functools.partial(control_actor_forward,
                                    frames=frames, n_agent=n_agent))
    action, logprob, mean = fwd(params, x, goal, speed, y, kn)
    jax.block_until_ready((action, logprob, mean))

    assert action.shape == (batch, n_agent, ctr_action_space)
    assert logprob.shape == (batch, n_agent, 1)
    assert mean.shape == (batch, n_agent, ctr_action_space)

    # Reference check (same noise draw as inside the wrapper).
    noise = jax.random.normal(kn, (batch * n_agent, ctr_action_space), jnp.float32)
    r_action, r_logp, r_mean = _reference_forward(
        params, x, goal, speed, y, noise, frames=frames, n_agent=n_agent)

    for got, ref in ((action, r_action), (logprob, r_logp), (mean, r_mean)):
        assert bool(jnp.isfinite(got).all())
        # fc1 runs bf16 x bf16 with f32 accumulation -> loose tolerance vs f32 ref.
        assert bool(jnp.allclose(got, ref, atol=7.5e-2, rtol=7.5e-2)), (
            float(jnp.max(jnp.abs(got - ref))))

    print("KERNEL_OK")
</pallas_src>

<mosaic_0001>
module attributes {stable_mosaic.version = 11 : i64} {
  func.func @_conv_tower_kernel(%arg0: i32, %arg1: memref<15x1024xf32, #tpu.memory_space<vmem>>, %arg2: memref<15x1024xf32, #tpu.memory_space<vmem>>, %arg3: memref<32x15xf32, #tpu.memory_space<vmem>>, %arg4: memref<32x1xf32, #tpu.memory_space<vmem>>, %arg5: memref<32x96xf32, #tpu.memory_space<vmem>>, %arg6: memref<32x1xf32, #tpu.memory_space<vmem>>, %arg7: memref<8x32x128xbf16, #tpu.memory_space<vmem>>) attributes {dimension_semantics = [#tpu.dimension_semantics<parallel>], iteration_bounds = array<i64: 1>, scalar_prefetch = 0 : i64, scratch_operands = 0 : i64, tpu.core_type = #tpu.core_type<tc>, window_params = [{transform_indices = @transform_0, window_bounds = array<i64: 15, 1024>}, {transform_indices = @transform_1, window_bounds = array<i64: 15, 1024>}, {pipeline_mode = #tpu.pipeline_mode<synchronous>, transform_indices = @transform_2, window_bounds = array<i64: 32, 15>}, {pipeline_mode = #tpu.pipeline_mode<synchronous>, transform_indices = @transform_3, window_bounds = array<i64: 32, 1>}, {pipeline_mode = #tpu.pipeline_mode<synchronous>, transform_indices = @transform_4, window_bounds = array<i64: 32, 96>}, {pipeline_mode = #tpu.pipeline_mode<synchronous>, transform_indices = @transform_5, window_bounds = array<i64: 32, 1>}, {transform_indices = @transform_6, window_bounds = array<i64: 8, 32, 128>}]} {
    %c0 = arith.constant 0 : index
    %c0_0 = arith.constant 0 : index
    %0 = vector.load %arg3[%c0, %c0_0] : memref<32x15xf32, #tpu.memory_space<vmem>>, vector<32x15xf32>
    %c0_1 = arith.constant 0 : index
    %c0_2 = arith.constant 0 : index
    %1 = vector.load %arg4[%c0_1, %c0_2] : memref<32x1xf32, #tpu.memory_space<vmem>>, vector<32x1xf32>
    %c0_3 = arith.constant 0 : index
    %c0_4 = arith.constant 0 : index
    %2 = vector.load %arg1[%c0_3, %c0_4] : memref<15x1024xf32, #tpu.memory_space<vmem>>, vector<15x1024xf32>
    %cst = arith.constant dense<0.000000e+00> : vector<32x1024xf32>
    %3 = tpu.matmul %0, %2, %cst {dimension_numbers = #tpu.dot_dimension_numbers<[1], [0], [0], [1], [0, 0, 1, 1], [], []>} : vector<32x15xf32>, vector<15x1024xf32>, vector<32x1024xf32> -> vector<32x1024xf32>
    %4 = vector.broadcast %1 : vector<32x1xf32> to vector<32x1024xf32>
    %5 = arith.addf %3, %4 : vector<32x1024xf32>
    %cst_5 = arith.constant 0.000000e+00 : f32
    %6 = vector.broadcast %cst_5 : f32 to vector<32x1024xf32>
    %7 = arith.maximumf %5, %6 : vector<32x1024xf32>
    %c0_6 = arith.constant 0 : index
    %c0_7 = arith.constant 0 : index
    %8 = vector.load %arg2[%c0_6, %c0_7] : memref<15x1024xf32, #tpu.memory_space<vmem>>, vector<15x1024xf32>
    %cst_8 = arith.constant dense<0.000000e+00> : vector<32x1024xf32>
    %9 = tpu.matmul %0, %8, %cst_8 {dimension_numbers = #tpu.dot_dimension_numbers<[1], [0], [0], [1], [0, 0, 1, 1], [], []>} : vector<32x15xf32>, vector<15x1024xf32>, vector<32x1024xf32> -> vector<32x1024xf32>
    %10 = vector.broadcast %1 : vector<32x1xf32> to vector<32x1024xf32>
    %11 = arith.addf %9, %10 : vector<32x1024xf32>
    %cst_9 = arith.constant 0.000000e+00 : f32
    %12 = vector.broadcast %cst_9 : f32 to vector<32x1024xf32>
    %13 = arith.maximumf %11, %12 : vector<32x1024xf32>
    %14 = tpu.iota {dimensions = array<i32: 1>} : vector<32x1024xi32>
    %c128_i32 = arith.constant 128 : i32
    %c0_i32 = arith.constant 0 : i32
    %15 = arith.cmpi eq, %c128_i32, %c0_i32 : i32
    %c1_i32 = arith.constant 1 : i32
    %16 = arith.select %15, %c1_i32, %c128_i32 : i32
    %17 = vector.broadcast %16 : i32 to vector<32x1024xi32>
    %18 = arith.remsi %14, %17 : vector<32x1024xi32>
    %c0_i32_10 = arith.constant 0 : i32
    %19 = vector.broadcast %c0_i32_10 : i32 to vector<32x1024xi32>
    %20 = arith.cmpi ne, %18, %19 : vector<32x1024xi32>
    %c0_i32_11 = arith.constant 0 : i32
    %21 = vector.broadcast %c0_i32_11 : i32 to vector<32x1024xi32>
    %22 = arith.cmpi slt, %18, %21 : vector<32x1024xi32>
    %c0_i32_12 = arith.constant 0 : i32
    %23 = arith.cmpi slt, %16, %c0_i32_12 : i32
    %24 = vector.broadcast %23 : i1 to vector<32x1024xi1>
    %25 = vector.broadcast %24 : vector<32x1024xi1> to vector<32x1024xi1>
    %26 = arith.xori %22, %25 : vector<32x1024xi1>
    %27 = arith.andi %26, %20 : vector<32x1024xi1>
    %28 = vector.broadcast %16 : i32 to vector<32x1024xi32>
    %29 = arith.addi %18, %28 : vector<32x1024xi32>
    %30 = arith.select %27, %29, %18 : vector<32x1024xi1>, vector<32x1024xi32>
    %c127_i32 = arith.constant 127 : i32
    %31 = vector.broadcast %c127_i32 : i32 to vector<32x1024xi32>
    %32 = arith.cmpi slt, %30, %31 : vector<32x1024xi32>
    %cst_13 = arith.constant 0.000000e+00 : f32
    %33 = vector.broadcast %cst_13 : f32 to vector<32x1024xf32>
    %34 = arith.select %32, %13, %33 : vector<32x1024xi1>, vector<32x1024xf32>
    %c1_i32_14 = arith.constant 1 : i32
    %35 = tpu.dynamic_rotate %34 by %c1_i32_14 dim 1 : vector<32x1024xf32>, i32 -> vector<32x1024xf32>
    %36 = tpu.concatenate %35, %7, %34 in 0 : vector<32x1024xf32>, vector<32x1024xf32>, vector<32x1024xf32> -> vector<96x1024xf32>
    %c0_15 = arith.constant 0 : index
    %c0_16 = arith.constant 0 : index
    %37 = vector.load %arg5[%c0_15, %c0_16] : memref<32x96xf32, #tpu.memory_space<vmem>>, vector<32x96xf32>
    %cst_17 = arith.constant dense<0.000000e+00> : vector<32x1024xf32>
    %38 = tpu.matmul %37, %36, %cst_17 {dimension_numbers = #tpu.dot_dimension_numbers<[1], [0], [0], [1], [0, 0, 1, 1], [], []>} : vector<32x96xf32>, vector<96x1024xf32>, vector<32x1024xf32> -> vector<32x1024xf32>
    %c0_18 = arith.constant 0 : index
    %c0_19 = arith.constant 0 : index
    %39 = vector.load %arg6[%c0_18, %c0_19] : memref<32x1xf32, #tpu.memory_space<vmem>>, vector<32x1xf32>
    %40 = vector.broadcast %39 : vector<32x1xf32> to vector<32x1024xf32>
    %41 = arith.addf %38, %40 : vector<32x1024xf32>
    %cst_20 = arith.constant 0.000000e+00 : f32
    %42 = vector.broadcast %cst_20 : f32 to vector<32x1024xf32>
    %43 = arith.maximumf %41, %42 : vector<32x1024xf32>
    %44 = arith.truncf %43 : vector<32x1024xf32> to vector<32x1024xbf16>
    %45 = vector.extract_strided_slice %44 {offsets = [0, 0], sizes = [32, 128], strides = [1, 1]} : vector<32x1024xbf16> to vector<32x128xbf16>
    %c0_21 = arith.constant 0 : index
    %c0_22 = arith.constant 0 : index
    %c0_23 = arith.constant 0 : index
    %46 = vector.load %arg7[%c0_21, %c0_22, %c0_23] : memref<8x32x128xbf16, #tpu.memory_space<vmem>>, vector<1x32x128xbf16>
    %47 = vector.shape_cast %46 : vector<1x32x128xbf16> to vector<32x128xbf16>
    %48 = vector.shape_cast %45 : vector<32x128xbf16> to vector<1x32x128xbf16>
    tpu.vector_store %arg7[%c0_21, %c0_22, %c0_23], %48 {strides = array<i32>} : memref<8x32x128xbf16, #tpu.memory_space<vmem>>, vector<1x32x128xbf16>,
    %49 = vector.extract_strided_slice %44 {offsets = [0, 128], sizes = [32, 128], strides = [1, 1]} : vector<32x1024xbf16> to vector<32x128xbf16>
    %c1 = arith.constant 1 : index
    %c0_24 = arith.constant 0 : index
    %c0_25 = arith.constant 0 : index
    %50 = vector.load %arg7[%c1, %c0_24, %c0_25] : memref<8x32x128xbf16, #tpu.memory_space<vmem>>, vector<1x32x128xbf16>
    %51 = vector.shape_cast %50 : vector<1x32x128xbf16> to vector<32x128xbf16>
    %52 = vector.shape_cast %49 : vector<32x128xbf16> to vector<1x32x128xbf16>
    tpu.vector_store %arg7[%c1, %c0_24, %c0_25], %52 {strides = array<i32>} : memref<8x32x128xbf16, #tpu.memory_space<vmem>>, vector<1x32x128xbf16>,
    %53 = vector.extract_strided_slice %44 {offsets = [0, 256], sizes = [32, 128], strides = [1, 1]} : vector<32x1024xbf16> to vector<32x128xbf16>
    %c2 = arith.constant 2 : index
    %c0_26 = arith.constant 0 : index
    %c0_27 = arith.constant 0 : index
    %54 = vector.load %arg7[%c2, %c0_26, %c0_27] : memref<8x32x128xbf16, #tpu.memory_space<vmem>>, vector<1x32x128xbf16>
    %55 = vector.shape_cast %54 : vector<1x32x128xbf16> to vector<32x128xbf16>
    %56 = vector.shape_cast %53 : vector<32x128xbf16> to vector<1x32x128xbf16>
    tpu.vector_store %arg7[%c2, %c0_26, %c0_27], %56 {strides = array<i32>} : memref<8x32x128xbf16, #tpu.memory_space<vmem>>, vector<1x32x128xbf16>,
    %57 = vector.extract_strided_slice %44 {offsets = [0, 384], sizes = [32, 128], strides = [1, 1]} : vector<32x1024xbf16> to vector<32x128xbf16>
    %c3 = arith.constant 3 : index
    %c0_28 = arith.constant 0 : index
    %c0_29 = arith.constant 0 : index
    %58 = vector.load %arg7[%c3, %c0_28, %c0_29] : memref<8x32x128xbf16, #tpu.memory_space<vmem>>, vector<1x32x128xbf16>
    %59 = vector.shape_cast %58 : vector<1x32x128xbf16> to vector<32x128xbf16>
    %60 = vector.shape_cast %57 : vector<32x128xbf16> to vector<1x32x128xbf16>
    tpu.vector_store %arg7[%c3, %c0_28, %c0_29], %60 {strides = array<i32>} : memref<8x32x128xbf16, #tpu.memory_space<vmem>>, vector<1x32x128xbf16>,
    %61 = vector.extract_strided_slice %44 {offsets = [0, 512], sizes = [32, 128], strides = [1, 1]} : vector<32x1024xbf16> to vector<32x128xbf16>
    %c4 = arith.constant 4 : index
    %c0_30 = arith.constant 0 : index
    %c0_31 = arith.constant 0 : index
    %62 = vector.load %arg7[%c4, %c0_30, %c0_31] : memref<8x32x128xbf16, #tpu.memory_space<vmem>>, vector<1x32x128xbf16>
    %63 = vector.shape_cast %62 : vector<1x32x128xbf16> to vector<32x128xbf16>
    %64 = vector.shape_cast %61 : vector<32x128xbf16> to vector<1x32x128xbf16>
    tpu.vector_store %arg7[%c4, %c0_30, %c0_31], %64 {strides = array<i32>} : memref<8x32x128xbf16, #tpu.memory_space<vmem>>, vector<1x32x128xbf16>,
    %65 = vector.extract_strided_slice %44 {offsets = [0, 640], sizes = [32, 128], strides = [1, 1]} : vector<32x1024xbf16> to vector<32x128xbf16>
    %c5 = arith.constant 5 : index
    %c0_32 = arith.constant 0 : index
    %c0_33 = arith.constant 0 : index
    %66 = vector.load %arg7[%c5, %c0_32, %c0_33] : memref<8x32x128xbf16, #tpu.memory_space<vmem>>, vector<1x32x128xbf16>
    %67 = vector.shape_cast %66 : vector<1x32x128xbf16> to vector<32x128xbf16>
    %68 = vector.shape_cast %65 : vector<32x128xbf16> to vector<1x32x128xbf16>
    tpu.vector_store %arg7[%c5, %c0_32, %c0_33], %68 {strides = array<i32>} : memref<8x32x128xbf16, #tpu.memory_space<vmem>>, vector<1x32x128xbf16>,
    %69 = vector.extract_strided_slice %44 {offsets = [0, 768], sizes = [32, 128], strides = [1, 1]} : vector<32x1024xbf16> to vector<32x128xbf16>
    %c6 = arith.constant 6 : index
    %c0_34 = arith.constant 0 : index
    %c0_35 = arith.constant 0 : index
    %70 = vector.load %arg7[%c6, %c0_34, %c0_35] : memref<8x32x128xbf16, #tpu.memory_space<vmem>>, vector<1x32x128xbf16>
    %71 = vector.shape_cast %70 : vector<1x32x128xbf16> to vector<32x128xbf16>
    %72 = vector.shape_cast %69 : vector<32x128xbf16> to vector<1x32x128xbf16>
    tpu.vector_store %arg7[%c6, %c0_34, %c0_35], %72 {strides = array<i32>} : memref<8x32x128xbf16, #tpu.memory_space<vmem>>, vector<1x32x128xbf16>,
    %73 = vector.extract_strided_slice %44 {offsets = [0, 896], sizes = [32, 128], strides = [1, 1]} : vector<32x1024xbf16> to vector<32x128xbf16>
    %c7 = arith.constant 7 : index
    %c0_36 = arith.constant 0 : index
    %c0_37 = arith.constant 0 : index
    %74 = vector.load %arg7[%c7, %c0_36, %c0_37] : memref<8x32x128xbf16, #tpu.memory_space<vmem>>, vector<1x32x128xbf16>
    %75 = vector.shape_cast %74 : vector<1x32x128xbf16> to vector<32x128xbf16>
    %76 = vector.shape_cast %73 : vector<32x128xbf16> to vector<1x32x128xbf16>
    tpu.vector_store %arg7[%c7, %c0_36, %c0_37], %76 {strides = array<i32>} : memref<8x32x128xbf16, #tpu.memory_space<vmem>>, vector<1x32x128xbf16>,
    return
  }
  func.func @transform_0(%arg0: i32) -> (i32, i32) {
    %c0_i32 = arith.constant 0 : i32
    %c0_i32_0 = arith.constant 0 : i32
    return %c0_i32, %arg0 : i32, i32
  }
  func.func @transform_1(%arg0: i32) -> (i32, i32) {
    %c0_i32 = arith.constant 0 : i32
    %c0_i32_0 = arith.constant 0 : i32
    return %c0_i32, %arg0 : i32, i32
  }
  func.func @transform_2(%arg0: i32) -> (i32, i32) {
    %c0_i32 = arith.constant 0 : i32
    %c0_i32_0 = arith.constant 0 : i32
    %c0_i32_1 = arith.constant 0 : i32
    return %c0_i32, %c0_i32_0 : i32, i32
  }
  func.func @transform_3(%arg0: i32) -> (i32, i32) {
    %c0_i32 = arith.constant 0 : i32
    %c0_i32_0 = arith.constant 0 : i32
    %c0_i32_1 = arith.constant 0 : i32
    return %c0_i32, %c0_i32_0 : i32, i32
  }
  func.func @transform_4(%arg0: i32) -> (i32, i32) {
    %c0_i32 = arith.constant 0 : i32
    %c0_i32_0 = arith.constant 0 : i32
    %c0_i32_1 = arith.constant 0 : i32
    return %c0_i32, %c0_i32_0 : i32, i32
  }
  func.func @transform_5(%arg0: i32) -> (i32, i32) {
    %c0_i32 = arith.constant 0 : i32
    %c0_i32_0 = arith.constant 0 : i32
    %c0_i32_1 = arith.constant 0 : i32
    return %c0_i32, %c0_i32_0 : i32, i32
  }
  func.func @transform_6(%arg0: i32) -> (i32, i32, i32) {
    %c0_i32 = arith.constant 0 : i32
    %c0_i32_0 = arith.constant 0 : i32
    %c0_i32_1 = arith.constant 0 : i32
    return %arg0, %c0_i32, %c0_i32_0 : i32, i32, i32
  }
}

module attributes {stable_mosaic.version = 11 : i64} {
  func.func @_head_kernel(%arg0: i32, %arg1: memref<8x4096xbf16, #tpu.memory_space<vmem>>, %arg2: memref<8x4xf32, #tpu.memory_space<vmem>>, %arg3: memref<8x8xf32, #tpu.memory_space<vmem>>, %arg4: memref<8x2xf32, #tpu.memory_space<vmem>>, %arg5: memref<4096x256xbf16, #tpu.memory_space<vmem>>, %arg6: memref<1x256xf32, #tpu.memory_space<vmem>>, %arg7: memref<256x128xf32, #tpu.memory_space<vmem>>, %arg8: memref<4x128xf32, #tpu.memory_space<vmem>>, %arg9: memref<1x128xf32, #tpu.memory_space<vmem>>, %arg10: memref<128x8xf32, #tpu.memory_space<vmem>>, %arg11: memref<1x8xf32, #tpu.memory_space<vmem>>, %arg12: memref<8x64xf32, #tpu.memory_space<vmem>>, %arg13: memref<8x64xf32, #tpu.memory_space<vmem>>, %arg14: memref<1x64xf32, #tpu.memory_space<vmem>>, %arg15: memref<64x128xf32, #tpu.memory_space<vmem>>, %arg16: memref<4x128xf32, #tpu.memory_space<vmem>>, %arg17: memref<1x128xf32, #tpu.memory_space<vmem>>, %arg18: memref<128x2xf32, #tpu.memory_space<vmem>>, %arg19: memref<1x2xf32, #tpu.memory_space<vmem>>, %arg20: memref<1x2xf32, #tpu.memory_space<vmem>>, %arg21: memref<8x2xf32, #tpu.memory_space<vmem>>, %arg22: memref<8x1xf32, #tpu.memory_space<vmem>>, %arg23: memref<8x2xf32, #tpu.memory_space<vmem>>) attributes {dimension_semantics = [#tpu.dimension_semantics<parallel>], iteration_bounds = array<i64: 1>, scalar_prefetch = 0 : i64, scratch_operands = 0 : i64, tpu.core_type = #tpu.core_type<tc>, window_params = [{transform_indices = @transform_0, window_bounds = array<i64: 8, 4096>}, {transform_indices = @transform_1, window_bounds = array<i64: 8, 4>}, {transform_indices = @transform_2, window_bounds = array<i64: 8, 8>}, {transform_indices = @transform_3, window_bounds = array<i64: 8, 2>}, {pipeline_mode = #tpu.pipeline_mode<synchronous>, transform_indices = @transform_4, window_bounds = array<i64: 4096, 256>}, {pipeline_mode = #tpu.pipeline_mode<synchronous>, transform_indices = @transform_5, window_bounds = array<i64: 1, 256>}, {pipeline_mode = #tpu.pipeline_mode<synchronous>, transform_indices = @transform_6, window_bounds = array<i64: 256, 128>}, {pipeline_mode = #tpu.pipeline_mode<synchronous>, transform_indices = @transform_7, window_bounds = array<i64: 4, 128>}, {pipeline_mode = #tpu.pipeline_mode<synchronous>, transform_indices = @transform_8, window_bounds = array<i64: 1, 128>}, {pipeline_mode = #tpu.pipeline_mode<synchronous>, transform_indices = @transform_9, window_bounds = array<i64: 128, 8>}, {pipeline_mode = #tpu.pipeline_mode<synchronous>, transform_indices = @transform_10, window_bounds = array<i64: 1, 8>}, {pipeline_mode = #tpu.pipeline_mode<synchronous>, transform_indices = @transform_11, window_bounds = array<i64: 8, 64>}, {pipeline_mode = #tpu.pipeline_mode<synchronous>, transform_indices = @transform_12, window_bounds = array<i64: 8, 64>}, {pipeline_mode = #tpu.pipeline_mode<synchronous>, transform_indices = @transform_13, window_bounds = array<i64: 1, 64>}, {pipeline_mode = #tpu.pipeline_mode<synchronous>, transform_indices = @transform_14, window_bounds = array<i64: 64, 128>}, {pipeline_mode = #tpu.pipeline_mode<synchronous>, transform_indices = @transform_15, window_bounds = array<i64: 4, 128>}, {pipeline_mode = #tpu.pipeline_mode<synchronous>, transform_indices = @transform_16, window_bounds = array<i64: 1, 128>}, {pipeline_mode = #tpu.pipeline_mode<synchronous>, transform_indices = @transform_17, window_bounds = array<i64: 128, 2>}, {pipeline_mode = #tpu.pipeline_mode<synchronous>, transform_indices = @transform_18, window_bounds = array<i64: 1, 2>}, {pipeline_mode = #tpu.pipeline_mode<synchronous>, transform_indices = @transform_19, window_bounds = array<i64: 1, 2>}, {transform_indices = @transform_20, window_bounds = array<i64: 8, 2>}, {transform_indices = @transform_21, window_bounds = array<i64: 8, 1>}, {transform_indices = @transform_22, window_bounds = array<i64: 8, 2>}]} {
    %c0 = arith.constant 0 : index
    %c0_0 = arith.constant 0 : index
    %0 = vector.load %arg2[%c0, %c0_0] : memref<8x4xf32, #tpu.memory_space<vmem>>, vector<8x4xf32>
    %c0_1 = arith.constant 0 : index
    %c0_2 = arith.constant 0 : index
    %1 = vector.load %arg1[%c0_1, %c0_2] : memref<8x4096xbf16, #tpu.memory_space<vmem>>, vector<8x4096xbf16>
    %c0_3 = arith.constant 0 : index
    %c0_4 = arith.constant 0 : index
    %2 = vector.load %arg5[%c0_3, %c0_4] : memref<4096x256xbf16, #tpu.memory_space<vmem>>, vector<4096x256xbf16>
    %cst = arith.constant dense<0.000000e+00> : vector<8x256xf32>
    %3 = tpu.matmul %1, %2, %cst {dimension_numbers = #tpu.dot_dimension_numbers<[1], [0], [0], [1], [0, 0, 1, 1], [], []>} : vector<8x4096xbf16>, vector<4096x256xbf16>, vector<8x256xf32> -> vector<8x256xf32>
    %c0_5 = arith.constant 0 : index
    %c0_6 = arith.constant 0 : index
    %4 = vector.load %arg6[%c0_5, %c0_6] : memref<1x256xf32, #tpu.memory_space<vmem>>, vector<1x256xf32>
    %5 = vector.broadcast %4 : vector<1x256xf32> to vector<8x256xf32>
    %6 = arith.addf %3, %5 : vector<8x256xf32>
    %cst_7 = arith.constant 0.000000e+00 : f32
    %7 = vector.broadcast %cst_7 : f32 to vector<8x256xf32>
    %8 = arith.maximumf %6, %7 : vector<8x256xf32>
    %c0_8 = arith.constant 0 : index
    %c0_9 = arith.constant 0 : index
    %9 = vector.load %arg7[%c0_8, %c0_9] : memref<256x128xf32, #tpu.memory_space<vmem>>, vector<256x128xf32>
    %cst_10 = arith.constant dense<0.000000e+00> : vector<8x128xf32>
    %10 = tpu.matmul %8, %9, %cst_10 {dimension_numbers = #tpu.dot_dimension_numbers<[1], [0], [0], [1], [0, 0, 1, 1], [], []>} : vector<8x256xf32>, vector<256x128xf32>, vector<8x128xf32> -> vector<8x128xf32>
    %c0_11 = arith.constant 0 : index
    %c0_12 = arith.constant 0 : index
    %11 = vector.load %arg8[%c0_11, %c0_12] : memref<4x128xf32, #tpu.memory_space<vmem>>, vector<4x128xf32>
    %cst_13 = arith.constant dense<0.000000e+00> : vector<8x128xf32>
    %12 = tpu.matmul %0, %11, %cst_13 {dimension_numbers = #tpu.dot_dimension_numbers<[1], [0], [0], [1], [0, 0, 1, 1], [], []>} : vector<8x4xf32>, vector<4x128xf32>, vector<8x128xf32> -> vector<8x128xf32>
    %13 = arith.addf %10, %12 : vector<8x128xf32>
    %c0_14 = arith.constant 0 : index
    %c0_15 = arith.constant 0 : index
    %14 = vector.load %arg9[%c0_14, %c0_15] : memref<1x128xf32, #tpu.memory_space<vmem>>, vector<1x128xf32>
    %15 = vector.broadcast %14 : vector<1x128xf32> to vector<8x128xf32>
    %16 = arith.addf %13, %15 : vector<8x128xf32>
    %cst_16 = arith.constant 0.000000e+00 : f32
    %17 = vector.broadcast %cst_16 : f32 to vector<8x128xf32>
    %18 = arith.maximumf %16, %17 : vector<8x128xf32>
    %c0_17 = arith.constant 0 : index
    %c0_18 = arith.constant 0 : index
    %19 = vector.load %arg10[%c0_17, %c0_18] : memref<128x8xf32, #tpu.memory_space<vmem>>, vector<128x8xf32>
    %cst_19 = arith.constant dense<0.000000e+00> : vector<8x8xf32>
    %20 = tpu.matmul %18, %19, %cst_19 {dimension_numbers = #tpu.dot_dimension_numbers<[1], [0], [0], [1], [0, 0, 1, 1], [], []>} : vector<8x128xf32>, vector<128x8xf32>, vector<8x8xf32> -> vector<8x8xf32>
    %c0_20 = arith.constant 0 : index
    %c0_21 = arith.constant 0 : index
    %21 = vector.load %arg11[%c0_20, %c0_21] : memref<1x8xf32, #tpu.memory_space<vmem>>, vector<1x8xf32>
    %22 = vector.broadcast %21 : vector<1x8xf32> to vector<8x8xf32>
    %23 = arith.addf %20, %22 : vector<8x8xf32>
    %cst_22 = arith.constant 0.000000e+00 : f32
    %24 = vector.broadcast %cst_22 : f32 to vector<8x8xf32>
    %25 = arith.maximumf %23, %24 : vector<8x8xf32>
    %c0_23 = arith.constant 0 : index
    %c0_24 = arith.constant 0 : index
    %26 = vector.load %arg12[%c0_23, %c0_24] : memref<8x64xf32, #tpu.memory_space<vmem>>, vector<8x64xf32>
    %cst_25 = arith.constant dense<0.000000e+00> : vector<8x64xf32>
    %27 = tpu.matmul %25, %26, %cst_25 {dimension_numbers = #tpu.dot_dimension_numbers<[1], [0], [0], [1], [0, 0, 1, 1], [], []>} : vector<8x8xf32>, vector<8x64xf32>, vector<8x64xf32> -> vector<8x64xf32>
    %c0_26 = arith.constant 0 : index
    %c0_27 = arith.constant 0 : index
    %28 = vector.load %arg3[%c0_26, %c0_27] : memref<8x8xf32, #tpu.memory_space<vmem>>, vector<8x8xf32>
    %c0_28 = arith.constant 0 : index
    %c0_29 = arith.constant 0 : index
    %29 = vector.load %arg13[%c0_28, %c0_29] : memref<8x64xf32, #tpu.memory_space<vmem>>, vector<8x64xf32>
    %cst_30 = arith.constant dense<0.000000e+00> : vector<8x64xf32>
    %30 = tpu.matmul %28, %29, %cst_30 {dimension_numbers = #tpu.dot_dimension_numbers<[1], [0], [0], [1], [0, 0, 1, 1], [], []>} : vector<8x8xf32>, vector<8x64xf32>, vector<8x64xf32> -> vector<8x64xf32>
    %31 = arith.addf %27, %30 : vector<8x64xf32>
    %c0_31 = arith.constant 0 : index
    %c0_32 = arith.constant 0 : index
    %32 = vector.load %arg14[%c0_31, %c0_32] : memref<1x64xf32, #tpu.memory_space<vmem>>, vector<1x64xf32>
    %33 = vector.broadcast %32 : vector<1x64xf32> to vector<8x64xf32>
    %34 = arith.addf %31, %33 : vector<8x64xf32>
    %cst_33 = arith.constant 0.000000e+00 : f32
    %35 = vector.broadcast %cst_33 : f32 to vector<8x64xf32>
    %36 = arith.maximumf %34, %35 : vector<8x64xf32>
    %c0_34 = arith.constant 0 : index
    %c0_35 = arith.constant 0 : index
    %37 = vector.load %arg15[%c0_34, %c0_35] : memref<64x128xf32, #tpu.memory_space<vmem>>, vector<64x128xf32>
    %cst_36 = arith.constant dense<0.000000e+00> : vector<8x128xf32>
    %38 = tpu.matmul %36, %37, %cst_36 {dimension_numbers = #tpu.dot_dimension_numbers<[1], [0], [0], [1], [0, 0, 1, 1], [], []>} : vector<8x64xf32>, vector<64x128xf32>, vector<8x128xf32> -> vector<8x128xf32>
    %c0_37 = arith.constant 0 : index
    %c0_38 = arith.constant 0 : index
    %39 = vector.load %arg16[%c0_37, %c0_38] : memref<4x128xf32, #tpu.memory_space<vmem>>, vector<4x128xf32>
    %cst_39 = arith.constant dense<0.000000e+00> : vector<8x128xf32>
    %40 = tpu.matmul %0, %39, %cst_39 {dimension_numbers = #tpu.dot_dimension_numbers<[1], [0], [0], [1], [0, 0, 1, 1], [], []>} : vector<8x4xf32>, vector<4x128xf32>, vector<8x128xf32> -> vector<8x128xf32>
    %41 = arith.addf %38, %40 : vector<8x128xf32>
    %c0_40 = arith.constant 0 : index
    %c0_41 = arith.constant 0 : index
    %42 = vector.load %arg17[%c0_40, %c0_41] : memref<1x128xf32, #tpu.memory_space<vmem>>, vector<1x128xf32>
    %43 = vector.broadcast %42 : vector<1x128xf32> to vector<8x128xf32>
    %44 = arith.addf %41, %43 : vector<8x128xf32>
    %cst_42 = arith.constant 0.000000e+00 : f32
    %45 = vector.broadcast %cst_42 : f32 to vector<8x128xf32>
    %46 = arith.maximumf %44, %45 : vector<8x128xf32>
    %47 = math.tanh %46 : vector<8x128xf32>
    %c0_43 = arith.constant 0 : index
    %c0_44 = arith.constant 0 : index
    %48 = vector.load %arg18[%c0_43, %c0_44] : memref<128x2xf32, #tpu.memory_space<vmem>>, vector<128x2xf32>
    %cst_45 = arith.constant dense<0.000000e+00> : vector<8x2xf32>
    %49 = tpu.matmul %47, %48, %cst_45 {dimension_numbers = #tpu.dot_dimension_numbers<[1], [0], [0], [1], [0, 0, 1, 1], [], []>} : vector<8x128xf32>, vector<128x2xf32>, vector<8x2xf32> -> vector<8x2xf32>
    %c0_46 = arith.constant 0 : index
    %c0_47 = arith.constant 0 : index
    %50 = vector.load %arg19[%c0_46, %c0_47] : memref<1x2xf32, #tpu.memory_space<vmem>>, vector<1x2xf32>
    %51 = vector.broadcast %50 : vector<1x2xf32> to vector<8x2xf32>
    %52 = arith.addf %49, %51 : vector<8x2xf32>
    %c0_48 = arith.constant 0 : index
    %c0_49 = arith.constant 0 : index
    %53 = vector.load %arg20[%c0_48, %c0_49] : memref<1x2xf32, #tpu.memory_space<vmem>>, vector<1x2xf32>
    %c0_50 = arith.constant 0 : index
    %c0_51 = arith.constant 0 : index
    %54 = vector.load %arg4[%c0_50, %c0_51] : memref<8x2xf32, #tpu.memory_space<vmem>>, vector<8x2xf32>
    %55 = math.exp %53 : vector<1x2xf32>
    %56 = vector.broadcast %55 : vector<1x2xf32> to vector<8x2xf32>
    %57 = arith.mulf %56, %54 : vector<8x2xf32>
    %58 = arith.addf %52, %57 : vector<8x2xf32>
    %cst_52 = arith.constant -5.000000e-01 : f32
    %59 = vector.broadcast %cst_52 : f32 to vector<8x2xf32>
    %60 = arith.mulf %59, %54 : vector<8x2xf32>
    %61 = arith.mulf %60, %54 : vector<8x2xf32>
    %cst_53 = arith.constant 0.918938517 : f32
    %62 = vector.broadcast %cst_53 : f32 to vector<8x2xf32>
    %63 = arith.subf %61, %62 : vector<8x2xf32>
    %64 = vector.broadcast %53 : vector<1x2xf32> to vector<8x2xf32>
    %65 = arith.subf %63, %64 : vector<8x2xf32>
    %c0_54 = arith.constant 0 : index
    %c0_55 = arith.constant 0 : index
    %66 = vector.load %arg21[%c0_54, %c0_55] : memref<8x2xf32, #tpu.memory_space<vmem>>, vector<8x2xf32>
    tpu.vector_store %arg21[%c0_54, %c0_55], %58 {strides = array<i32>} : memref<8x2xf32, #tpu.memory_space<vmem>>, vector<8x2xf32>,
    %c0_56 = arith.constant 0 : index
    %c0_57 = arith.constant 0 : index
    %67 = vector.load %arg23[%c0_56, %c0_57] : memref<8x2xf32, #tpu.memory_space<vmem>>, vector<8x2xf32>
    tpu.vector_store %arg23[%c0_56, %c0_57], %52 {strides = array<i32>} : memref<8x2xf32, #tpu.memory_space<vmem>>, vector<8x2xf32>,
    %cst_58 = arith.constant dense<0.000000e+00> : vector<8xf32>
    %68 = vector.multi_reduction <add>, %65, %cst_58 [1] : vector<8x2xf32> to vector<8xf32>
    %69 = vector.shape_cast %68 : vector<8xf32> to vector<8x1xf32>
    %c0_59 = arith.constant 0 : index
    %c0_60 = arith.constant 0 : index
    %70 = vector.load %arg22[%c0_59, %c0_60] : memref<8x1xf32, #tpu.memory_space<vmem>>, vector<8x1xf32>
    tpu.vector_store %arg22[%c0_59, %c0_60], %69 {strides = array<i32>} : memref<8x1xf32, #tpu.memory_space<vmem>>, vector<8x1xf32>,
    return
  }
  func.func @transform_0(%arg0: i32) -> (i32, i32) {
    %c0_i32 = arith.constant 0 : i32
    %c0_i32_0 = arith.constant 0 : i32
    return %arg0, %c0_i32 : i32, i32
  }
  func.func @transform_1(%arg0: i32) -> (i32, i32) {
    %c0_i32 = arith.constant 0 : i32
    %c0_i32_0 = arith.constant 0 : i32
    return %arg0, %c0_i32 : i32, i32
  }
  func.func @transform_2(%arg0: i32) -> (i32, i32) {
    %c0_i32 = arith.constant 0 : i32
    %c0_i32_0 = arith.constant 0 : i32
    return %arg0, %c0_i32 : i32, i32
  }
  func.func @transform_3(%arg0: i32) -> (i32, i32) {
    %c0_i32 = arith.constant 0 : i32
    %c0_i32_0 = arith.constant 0 : i32
    return %arg0, %c0_i32 : i32, i32
  }
  func.func @transform_4(%arg0: i32) -> (i32, i32) {
    %c0_i32 = arith.constant 0 : i32
    %c0_i32_0 = arith.constant 0 : i32
    %c0_i32_1 = arith.constant 0 : i32
    return %c0_i32, %c0_i32_0 : i32, i32
  }
  func.func @transform_5(%arg0: i32) -> (i32, i32) {
    %c0_i32 = arith.constant 0 : i32
    %c0_i32_0 = arith.constant 0 : i32
    %c0_i32_1 = arith.constant 0 : i32
    return %c0_i32, %c0_i32_0 : i32, i32
  }
  func.func @transform_6(%arg0: i32) -> (i32, i32) {
    %c0_i32 = arith.constant 0 : i32
    %c0_i32_0 = arith.constant 0 : i32
    %c0_i32_1 = arith.constant 0 : i32
    return %c0_i32, %c0_i32_0 : i32, i32
  }
  func.func @transform_7(%arg0: i32) -> (i32, i32) {
    %c0_i32 = arith.constant 0 : i32
    %c0_i32_0 = arith.constant 0 : i32
    %c0_i32_1 = arith.constant 0 : i32
    return %c0_i32, %c0_i32_0 : i32, i32
  }
  func.func @transform_8(%arg0: i32) -> (i32, i32) {
    %c0_i32 = arith.constant 0 : i32
    %c0_i32_0 = arith.constant 0 : i32
    %c0_i32_1 = arith.constant 0 : i32
    return %c0_i32, %c0_i32_0 : i32, i32
  }
  func.func @transform_9(%arg0: i32) -> (i32, i32) {
    %c0_i32 = arith.constant 0 : i32
    %c0_i32_0 = arith.constant 0 : i32
    %c0_i32_1 = arith.constant 0 : i32
    return %c0_i32, %c0_i32_0 : i32, i32
  }
  func.func @transform_10(%arg0: i32) -> (i32, i32) {
    %c0_i32 = arith.constant 0 : i32
    %c0_i32_0 = arith.constant 0 : i32
    %c0_i32_1 = arith.constant 0 : i32
    return %c0_i32, %c0_i32_0 : i32, i32
  }
  func.func @transform_11(%arg0: i32) -> (i32, i32) {
    %c0_i32 = arith.constant 0 : i32
    %c0_i32_0 = arith.constant 0 : i32
    %c0_i32_1 = arith.constant 0 : i32
    return %c0_i32, %c0_i32_0 : i32, i32
  }
  func.func @transform_12(%arg0: i32) -> (i32, i32) {
    %c0_i32 = arith.constant 0 : i32
    %c0_i32_0 = arith.constant 0 : i32
    %c0_i32_1 = arith.constant 0 : i32
    return %c0_i32, %c0_i32_0 : i32, i32
  }
  func.func @transform_13(%arg0: i32) -> (i32, i32) {
    %c0_i32 = arith.constant 0 : i32
    %c0_i32_0 = arith.constant 0 : i32
    %c0_i32_1 = arith.constant 0 : i32
    return %c0_i32, %c0_i32_0 : i32, i32
  }
  func.func @transform_14(%arg0: i32) -> (i32, i32) {
    %c0_i32 = arith.constant 0 : i32
    %c0_i32_0 = arith.constant 0 : i32
    %c0_i32_1 = arith.constant 0 : i32
    return %c0_i32, %c0_i32_0 : i32, i32
  }
  func.func @transform_15(%arg0: i32) -> (i32, i32) {
    %c0_i32 = arith.constant 0 : i32
    %c0_i32_0 = arith.constant 0 : i32
    %c0_i32_1 = arith.constant 0 : i32
    return %c0_i32, %c0_i32_0 : i32, i32
  }
  func.func @transform_16(%arg0: i32) -> (i32, i32) {
    %c0_i32 = arith.constant 0 : i32
    %c0_i32_0 = arith.constant 0 : i32
    %c0_i32_1 = arith.constant 0 : i32
    return %c0_i32, %c0_i32_0 : i32, i32
  }
  func.func @transform_17(%arg0: i32) -> (i32, i32) {
    %c0_i32 = arith.constant 0 : i32
    %c0_i32_0 = arith.constant 0 : i32
    %c0_i32_1 = arith.constant 0 : i32
    return %c0_i32, %c0_i32_0 : i32, i32
  }
  func.func @transform_18(%arg0: i32) -> (i32, i32) {
    %c0_i32 = arith.constant 0 : i32
    %c0_i32_0 = arith.constant 0 : i32
    %c0_i32_1 = arith.constant 0 : i32
    return %c0_i32, %c0_i32_0 : i32, i32
  }
  func.func @transform_19(%arg0: i32) -> (i32, i32) {
    %c0_i32 = arith.constant 0 : i32
    %c0_i32_0 = arith.constant 0 : i32
    %c0_i32_1 = arith.constant 0 : i32
    return %c0_i32, %c0_i32_0 : i32, i32
  }
  func.func @transform_20(%arg0: i32) -> (i32, i32) {
    %c0_i32 = arith.constant 0 : i32
    %c0_i32_0 = arith.constant 0 : i32
    return %arg0, %c0_i32 : i32, i32
  }
  func.func @transform_21(%arg0: i32) -> (i32, i32) {
    %c0_i32 = arith.constant 0 : i32
    %c0_i32_0 = arith.constant 0 : i32
    return %arg0, %c0_i32 : i32, i32
  }
  func.func @transform_22(%arg0: i32) -> (i32, i32) {
    %c0_i32 = arith.constant 0 : i32
    %c0_i32_0 = arith.constant 0 : i32
    return %arg0, %c0_i32 : i32, i32
  }
}

</mosaic_0001>

<bundles_post_ra>
// kernel: control_actor_forward.2
= control target key start
LH: loop header
LB: loop body
LE: loop exit
PB: predicated region body
PF: predicated region fallthrough
CT: control target
= control target key end

     0   :  { %11 = vsyncpa [#allocation3], 0  ;;  %s2334_s21 = smov [#allocation2]   ;;  %s3263_s0 = inlined_call_operand.vmem [shape: f32[15,1024], index: 0, kind: input, shape index: {}]   ;;  %s3264_s1 = inlined_call_operand.vmem [shape: f32[15,1024], index: 1, kind: input, shape index: {}]   ;;  %s3265_s2 = inlined_call_operand.vmem [shape: f32[32,15], index: 2, kind: input, shape index: {}]   ;;  %s3266_s3 = inlined_call_operand.vmem [shape: f32[32,1], index: 3, kind: input, shape index: {}]   ;;  %s3267_s4 = inlined_call_operand.hbm [shape: f32[32,96], index: 4, kind: input, shape index: {}]   ;;  %s3268_s5 = inlined_call_operand.vmem [shape: f32[32,1], index: 5, kind: input, shape index: {}]   ;;  %s3269_s6 = inlined_call_operand.vmem [shape: bf16[8,32,128], index: 6, kind: output, shape index: {}]  }
   0x1   :  { %s25_s22 = sshll.u32 %s2334_s21, 4  ;;  %s2310_s25 = scalar_lea.hbm %s3267_s4, 512  ;;  %s26_s22 = int_to_ptr.vmem [resolvable:$true] %s25_s22 }
   0x2   :  { %p2311_p0 = scmp.ne.s32.totalorder %s3267_s4, %s2310_s25  ;;  %p2314_p1 = scmp.lt.u32.totalorder %s2310_s25, %s3267_s4 }
   0x4   :  { %p2316_p2 = pnand %p2314_p1, %p2311_p0 }
   0x6   :  { %2319 = shalt.err (!%p2316_p2)
}
   0x7   :  { %s2320_s30 = scalar_lea.vmem %s26_s22, 512  ;;  %p2325_p4 = scmp.lt.s32.totalorder %s26_s22, %s26_s22 }
   0x8   :  { %p2321_p3 = scmp.ne.s32.totalorder %s26_s22, %s2320_s30  ;;  %p2326_p5 = scmp.lt.s32.totalorder %s2320_s30, %s2320_s30 }
   0xa   :  { %p2327_p6 = por %p2326_p5, %p2325_p4 }
   0xc   :  { %p2328_p7 = pnand %p2327_p6, %p2321_p3 }
   0xe   :  { %2331 = shalt.err (!%p2328_p7)
}
   0xf   :  { %s2335_s7 = smov 128   ;;  %s2336_s8 = smov 8  }
  0x10   :  { %31 = dma.hbm_to_vmem [thread:$0]  %s3267_s4, 512, %s26_s22, [#allocation3], %s2335_s7, %s2335_s7, %s2336_s8  }
  0x11   :  { %2332 = dma.done.wait [#allocation3], 512  }
  0x12   :  { %2333 = vsyncadd [#allocation3], 4294966784  ;;  %v3270_v0 = vmov 0.0   ;;  %v2338_v1 = vmov 0   ;;  %vm94_vm0 = vcmask 1046528   ;;  %vm2339_vm1 = vmmov 1  }
  0x13   :  { %183 = vmatprep.mubr.f32.mxu0 %v3270_v0  ;;  %272 = vmatprep.mubr.f32.mxu1 %v3270_v0  ;;  %vm2390_vm2 = vmpackc.low %vm94_vm0, %vm2339_vm1  ;;  %v46_v3 = vld [vmem:[%s3263_s0 + $0x8] sm:$0xff]  ;;  %v48_v5 = vld [vmem:[%s3263_s0 + $0x18] sm:$0xff]  ;;  %vm81_vm3 = vcmask 121856   ;;  %vm1205_vm1 = vcmask 785408  }
  0x14   :  { %2228 = vset.pattern.permute.xlu0 %v2338_v1  ;;  %2229 = vset.pattern.permute.xlu1 %v2338_v1  ;;  %v54_v4 = vld [vmem:[%s3263_s0 + $0x48] sm:$0x7f]  ;;  %v56_v7 = vld [vmem:[%s3263_s0 + $0x58] sm:$0x7f]  ;;  %v45_v8 = vld [vmem:[%s3263_s0] sm:$0xff] }
  0x15   :  { %v2061_v6 = vpack.c.bf16 %v54_v4, %v46_v3  ;;  %v53_v9 = vld [vmem:[%s3263_s0 + $0x40] sm:$0x7f]  ;;  %v2067_v10 = vpack.c.bf16 %v56_v7, %v48_v5  ;;  %v47_v12 = vld [vmem:[%s3263_s0 + $0x10] sm:$0xff]  ;;  %v52_v15 = vld [vmem:[%s3263_s0 + $0x38] sm:$0xff] }
  0x16   :  { %v2064_v11 = vpack.c.bf16 %v53_v9, %v45_v8  ;;  %v55_v13 = vld [vmem:[%s3263_s0 + $0x50] sm:$0x7f]  ;;  %v60_v16 = vld [vmem:[%s3263_s0 + $0x78] sm:$0x7f]  ;;  %v2436_v18 = vld [vmem:[%s3265_s2] sm:$0xff] }
  0x17   :  { %2063 = vmatprep.subr.msk.bf16.mxu0 %vm2390_vm2, %v2061_v6  ;;  %v2070_v14 = vpack.c.bf16 %v55_v13, %v47_v12  ;;  %v51_v17 = vld [vmem:[%s3263_s0 + $0x30] sm:$0xff]  ;;  %2069 = vmatprep.subr.msk.bf16.mxu1 %vm2390_vm2, %v2067_v10  ;;  %v2079_v19 = vpack.c.bf16 %v60_v16, %v52_v15  ;;  %v50_v21 = vld [vmem:[%s3263_s0 + $0x28] sm:$0xff]  ;;  %v49_v25 = vld [vmem:[%s3263_s0 + $0x20] sm:$0xff] }
  0x18   :  { %2066 = vmatpush1.bf16.msk.msra.mxu0 %vm2390_vm2, %v2064_v11  ;;  %v59_v20 = vld [vmem:[%s3263_s0 + $0x70] sm:$0x7f]  ;;  %v58_v23 = vld [vmem:[%s3263_s0 + $0x68] sm:$0x7f]  ;;  %v57_v26 = vld [vmem:[%s3263_s0 + $0x60] sm:$0x7f] }
  0x19   :  { %2072 = vmatpush1.bf16.msk.msra.mxu1 %vm2390_vm2, %v2070_v14  ;;  %v2082_v22 = vpack.c.bf16 %v59_v20, %v51_v17  ;;  %v2073_v24 = vpack.c.bf16 %v58_v23, %v50_v21  ;;  %v510_v27 = vld [vmem:[%s3264_s1 + $0x18] sm:$0xff]  ;;  %v2471_v29 = vld [vmem:[%s3265_s2 + $0x8] sm:$0xff]  ;;  %v2076_v33 = vpack.c.bf16 %v57_v26, %v49_v25  ;;  %v2494_v35 = vld [vmem:[%s3265_s2 + $0x10] sm:$0xff] }
  0x1a   :  { %2081 = vmatprep.subr.msk.bf16.mxu1 %vm2390_vm2, %v2079_v19  ;;  %v518_v28 = vld [vmem:[%s3264_s1 + $0x58] sm:$0x7f]  ;;  %v508_v31 = vld [vmem:[%s3264_s1 + $0x8] sm:$0xff]  ;;  %v41_v36 = vld [vmem:[%s3266_s3] sm:$0xff] }
  0x1b   :  { %1780 = vmatmul.mubr.msk.f32.vlgmr.msra.gmra.mrb[0].mxu0 %vm81_vm3, %v2436_v18  ;;  %v2091_v30 = vpack.c.bf16 %v518_v28, %v510_v27  ;;  %v516_v32 = vld [vmem:[%s3264_s1 + $0x48] sm:$0x7f]  ;;  %2075 = vmatprep.subr.msk.bf16.mxu0 %vm2390_vm2, %v2073_v24  ;;  %v43_v37 = vld [vmem:[%s3266_s3 + $0x10] sm:$0xff]  ;;  %v2518_v39 = vld [vmem:[%s3265_s2 + $0x18] sm:$0xff] }
  0x1c   :  { %1786 = vmatmul.mubr.msk.f32.vlgmr.msra.gmra.mrb[0].mxu1 %vm81_vm3, %v2436_v18  ;;  %189 = vmatprep.mubr.f32.mxu0 %v3270_v0  ;;  %v2085_v34 = vpack.c.bf16 %v516_v32, %v508_v31  ;;  %v42_v38 = vld [vmem:[%s3266_s3 + $0x8] sm:$0xff]  ;;  %v44_v40 = vld [vmem:[%s3266_s3 + $0x18] sm:$0xff]  ;;  %v509_v41 = vld [vmem:[%s3264_s1 + $0x10] sm:$0xff] }
  0x1d   :  { %2084 = vmatpush1.bf16.msk.msra.mxu1 %vm2390_vm2, %v2082_v22  ;;  %278 = vmatprep.mubr.f32.mxu1 %v3270_v0  ;;  %v517_v42 = vld [vmem:[%s3264_s1 + $0x50] sm:$0x7f]  ;;  %v507_v43 = vld [vmem:[%s3264_s1] sm:$0xff]  ;;  %v514_v45 = vld [vmem:[%s3264_s1 + $0x38] sm:$0xff] }
  0x1e   :  { %2093 = vmatprep.subr.msk.bf16.mxu1 %vm2390_vm2, %v2091_v30  ;;  %2078 = vmatpush1.bf16.msk.msra.mxu0 %vm2390_vm2, %v2076_v33  ;;  %v515_v44 = vld [vmem:[%s3264_s1 + $0x40] sm:$0x7f]  ;;  %v522_v46 = vld [vmem:[%s3264_s1 + $0x78] sm:$0x7f]  ;;  %v512_v47 = vld [vmem:[%s3264_s1 + $0x28] sm:$0xff]  ;;  %v2094_v49 = vpack.c.bf16 %v517_v42, %v509_v41 }
  0x1f   :  { %1781 = vmatmul.mubr.msk.f32.gmra.mrb[2].mxu0 %vm81_vm3, %v2471_v29  ;;  %2087 = vmatprep.subr.msk.bf16.mxu0 %vm2390_vm2, %v2085_v34  ;;  %v520_v48 = vld [vmem:[%s3264_s1 + $0x68] sm:$0x7f]  ;;  %v2088_v50 = vpack.c.bf16 %v515_v44, %v507_v43  ;;  %v2103_v51 = vpack.c.bf16 %v522_v46, %v514_v45  ;;  %v513_v53 = vld [vmem:[%s3264_s1 + $0x30] sm:$0xff]  ;;  %v511_v55 = vld [vmem:[%s3264_s1 + $0x20] sm:$0xff] }
  0x20   :  { %1787 = vmatmul.mubr.msk.f32.gmra.mrb[2].mxu1 %vm81_vm3, %v2471_v29  ;;  %195 = vmatprep.mubr.f32.mxu0 %v3270_v0  ;;  %v2097_v52 = vpack.c.bf16 %v520_v48, %v512_v47  ;;  %v521_v54 = vld [vmem:[%s3264_s1 + $0x70] sm:$0x7f]  ;;  %v519_v56 = vld [vmem:[%s3264_s1 + $0x60] sm:$0x7f]  ;;  %v935_v47 = vlaneseq  ;;  %s2340_s1 = smov 1  }
  0x21   :  { %284 = vmatprep.mubr.f32.mxu1 %v3270_v0  ;;  %63 = vperm.xlu0 %2228, %v41_v36   ;;  %v2106_v57 = vpack.c.bf16 %v521_v54, %v513_v53  ;;  %v2100_v58 = vpack.c.bf16 %v519_v56, %v511_v55 }
  0x22   :  { %73 = vperm.xlu1 %2229, %v43_v37  }
  0x23   :  { %1782 = vmatmul.mubr.msk.f32.gmra.mrb[4].mxu0 %vm81_vm3, %v2494_v35 }
  0x24   :  { %1788 = vmatmul.mubr.msk.f32.gmra.mrb[4].mxu1 %vm81_vm3, %v2494_v35  ;;  %201 = vmatprep.mubr.f32.mxu0 %v3270_v0 }
  0x25   :  { %290 = vmatprep.mubr.f32.mxu1 %v3270_v0  ;;  %68 = vperm.xlu0 %2228, %v42_v38  }
  0x26   :  { %78 = vperm.xlu1 %2229, %v44_v40  }
  0x27   :  { %1783 = vmatmul.mubr.msk.f32.gmra.mrb[6].mxu0 %vm81_vm3, %v2518_v39 }
  0x28   :  { %1789 = vmatmul.mubr.msk.f32.gmra.mrb[6].mxu1 %vm81_vm3, %v2518_v39  ;;  %361 = vmatprep.mubr.f32.mxu0 %v3270_v0 }
  0x29   :  { %450 = vmatprep.mubr.f32.mxu1 %v3270_v0 }
  0x2b   :  { %1792 = vmatmul.mubr.msk.f32.vlgmr.msra.gmra.mrb[8].mxu0 %vm81_vm3, %v2436_v18 }
  0x2c   :  { %1798 = vmatmul.mubr.msk.f32.vlgmr.msra.gmra.mrb[8].mxu1 %vm81_vm3, %v2436_v18  ;;  %367 = vmatprep.mubr.f32.mxu0 %v3270_v0 }
  0x2d   :  { %2096 = vmatpush1.bf16.msk.msra.mxu1 %vm2390_vm2, %v2094_v49  ;;  %456 = vmatprep.mubr.f32.mxu1 %v3270_v0 }
  0x2e   :  { %2090 = vmatpush1.bf16.msk.msra.mxu0 %vm2390_vm2, %v2088_v50  ;;  %2105 = vmatprep.subr.msk.bf16.mxu1 %vm2390_vm2, %v2103_v51 }
  0x2f   :  { %1793 = vmatmul.mubr.msk.f32.gmra.mrb[10].mxu0 %vm81_vm3, %v2471_v29  ;;  %2099 = vmatprep.subr.msk.bf16.mxu0 %vm2390_vm2, %v2097_v52 }
  0x30   :  { %1799 = vmatmul.mubr.msk.f32.gmra.mrb[10].mxu1 %vm81_vm3, %v2471_v29  ;;  %373 = vmatprep.mubr.f32.mxu0 %v3270_v0 }
  0x31   :  { %462 = vmatprep.mubr.f32.mxu1 %v3270_v0 }
  0x33   :  { %1794 = vmatmul.mubr.msk.f32.gmra.mrb[12].mxu0 %vm81_vm3, %v2494_v35 }
  0x34   :  { %1800 = vmatmul.mubr.msk.f32.gmra.mrb[12].mxu1 %vm81_vm3, %v2494_v35  ;;  %379 = vmatprep.mubr.f32.mxu0 %v3270_v0 }
  0x35   :  { %468 = vmatprep.mubr.f32.mxu1 %v3270_v0 }
  0x37   :  { %1795 = vmatmul.mubr.msk.f32.gmra.mrb[14].mxu0 %vm81_vm3, %v2518_v39 }
  0x38   :  { %1801 = vmatmul.mubr.msk.f32.gmra.mrb[14].mxu1 %vm81_vm3, %v2518_v39  ;;  %611 = vmatprep.mubr.f32.mxu0 %v3270_v0 }
  0x39   :  { %700 = vmatprep.mubr.f32.mxu1 %v3270_v0 }
  0x3b   :  { %1804 = vmatmul.mubr.msk.f32.vlgmr.msra.gmra.mrb[16].mxu0 %vm81_vm3, %v2436_v18 }
  0x3c   :  { %1810 = vmatmul.mubr.msk.f32.vlgmr.msra.gmra.mrb[16].mxu1 %vm81_vm3, %v2436_v18  ;;  %617 = vmatprep.mubr.f32.mxu0 %v3270_v0 }
  0x3d   :  { %2108 = vmatpush1.bf16.msk.msra.mxu1 %vm2390_vm2, %v2106_v57  ;;  %706 = vmatprep.mubr.f32.mxu1 %v3270_v0 }
  0x3e   :  { %2102 = vmatpush1.bf16.msk.msra.mxu0 %vm2390_vm2, %v2100_v58 }
  0x3f   :  { %1805 = vmatmul.mubr.msk.f32.gmra.mrb[18].mxu0 %vm81_vm3, %v2471_v29 }
  0x40   :  { %1811 = vmatmul.mubr.msk.f32.gmra.mrb[18].mxu1 %vm81_vm3, %v2471_v29  ;;  %623 = vmatprep.mubr.f32.mxu0 %v3270_v0 }
  0x41   :  { %712 = vmatprep.mubr.f32.mxu1 %v3270_v0 }
  0x43   :  { %1806 = vmatmul.mubr.msk.f32.gmra.mrb[20].mxu0 %vm81_vm3, %v2494_v35 }
  0x44   :  { %1812 = vmatmul.mubr.msk.f32.gmra.mrb[20].mxu1 %vm81_vm3, %v2494_v35  ;;  %629 = vmatprep.mubr.f32.mxu0 %v3270_v0 }
  0x45   :  { %718 = vmatprep.mubr.f32.mxu1 %v3270_v0 }
  0x47   :  { %1807 = vmatmul.mubr.msk.f32.gmra.mrb[22].mxu0 %vm81_vm3, %v2518_v39 }
  0x48   :  { %1813 = vmatmul.mubr.msk.f32.gmra.mrb[22].mxu1 %vm81_vm3, %v2518_v39  ;;  %789 = vmatprep.mubr.f32.mxu0 %v3270_v0 }
  0x49   :  { %878 = vmatprep.mubr.f32.mxu1 %v3270_v0 }
  0x4b   :  { %1816 = vmatmul.mubr.msk.f32.vlgmr.msra.gmra.mrb[24].mxu0 %vm81_vm3, %v2436_v18 }
  0x4c   :  { %1822 = vmatmul.mubr.msk.f32.vlgmr.msra.gmra.mrb[24].mxu1 %vm81_vm3, %v2436_v18  ;;  %795 = vmatprep.mubr.f32.mxu0 %v3270_v0 }
  0x4d   :  { %884 = vmatprep.mubr.f32.mxu1 %v3270_v0 }
  0x4f   :  { %1817 = vmatmul.mubr.msk.f32.gmra.mrb[26].mxu0 %vm81_vm3, %v2471_v29 }
  0x50   :  { %1823 = vmatmul.mubr.msk.f32.gmra.mrb[26].mxu1 %vm81_vm3, %v2471_v29  ;;  %801 = vmatprep.mubr.f32.mxu0 %v3270_v0 }
  0x51   :  { %890 = vmatprep.mubr.f32.mxu1 %v3270_v0 }
  0x53   :  { %1818 = vmatmul.mubr.msk.f32.gmra.mrb[28].mxu0 %vm81_vm3, %v2494_v35 }
  0x54   :  { %1824 = vmatmul.mubr.msk.f32.gmra.mrb[28].mxu1 %vm81_vm3, %v2494_v35  ;;  %807 = vmatprep.mubr.f32.mxu0 %v3270_v0 }
  0x55   :  { %896 = vmatprep.mubr.f32.mxu1 %v3270_v0 }
  0x57   :  { %1819 = vmatmul.mubr.msk.f32.gmra.mrb[30].mxu0 %vm81_vm3, %v2518_v39 }
  0x58   :  { %1825 = vmatmul.mubr.msk.f32.gmra.mrb[30].mxu1 %vm81_vm3, %v2518_v39  ;;  %1282 = vmatprep.mubr.f32.mxu0 %v3270_v0 }
  0x59   :  { %1371 = vmatprep.mubr.f32.mxu1 %v3270_v0 }
  0xa0   :  { %v2650_v59 = vpop.permute.xlu0 %63 }
  0xa1   :  { %v2657_v6 = vpop.permute.xlu1 %73 }
  0xa4   :  { %v2654_v3 = vpop.permute.xlu0 %68 }
  0xa5   :  { %v2674_v33 = vpop.permute.xlu1 %78 }
  0xee   :  { %v185_v60 = vpop.f32.mrb[0].mxu0 }
  0xef   :  { %v274_v61 = vpop.f32.mrb[0].mxu1  ;;  %v186_v62 = vadd.f32 %v185_v60, %v2650_v59  ;;  %v187_v63 = vpop.f32.mrb[1].mxu0 }
  0xf0   :  { %v276_v1 = vpop.f32.mrb[1].mxu1  ;;  %v188_v2 = vadd.f32 %v187_v63, %v2650_v59  ;;  %v275_v4 = vadd.f32 %v274_v61, %v2650_v59 }
  0xf1   :  { %v277_v7 = vadd.f32 %v276_v1, %v2650_v59  ;;  %v475_v9 = vmax.f32 %v186_v62, 0.0  ;;  %v2692_v1 = vand.u32 127, %v935_v47 }
  0xf2   :  { %v191_v5 = vpop.f32.mrb[2].mxu0  ;;  %v476_v14 = vmax.f32 %v188_v2, 0.0  ;;  %v477_v18 = vmax.f32 %v275_v4, 0.0 }
  0xf3   :  { %v280_v8 = vpop.f32.mrb[2].mxu1  ;;  %v192_v10 = vadd.f32 %v191_v5, %v2654_v3  ;;  %v193_v11 = vpop.f32.mrb[3].mxu0  ;;  %v478_v22 = vmax.f32 %v277_v7, 0.0  ;;  %vm1040_vm6 = vcmp.lt.s32.totalorder %v2692_v1, 127  ;;  %vm1144_vm12 = vcmp.lt.s32.totalorder %v2692_v1, 1 }
  0xf4   :  { %v281_v12 = vadd.f32 %v280_v8, %v2654_v3  ;;  %v282_v13 = vpop.f32.mrb[3].mxu1  ;;  %v194_v15 = vadd.f32 %v193_v11, %v2654_v3  ;;  %vm3031_vm0 = vmpackc.low %vm1040_vm6, %vm1040_vm6 }
  0xf5   :  { %v283_v16 = vadd.f32 %v282_v13, %v2654_v3  ;;  %v483_v17 = vmax.f32 %v192_v10, 0.0 }
  0xf6   :  { %v485_v19 = vmax.f32 %v281_v12, 0.0  ;;  %v484_v20 = vmax.f32 %v194_v15, 0.0  ;;  %v197_v21 = vpop.f32.mrb[4].mxu0 }
  0xf7   :  { %v486_v23 = vmax.f32 %v283_v16, 0.0  ;;  %v2664_v24 = vpack.c.bf16 %v483_v17, %v475_v9  ;;  %v286_v25 = vpop.f32.mrb[4].mxu1  ;;  %v198_v26 = vadd.f32 %v197_v21, %v2657_v6  ;;  %v199_v27 = vpop.f32.mrb[5].mxu0  ;;  %v938_v17 = vadd.s32 256, %v2692_v1 }
  0xf8   :  { %v2667_v28 = vpack.c.bf16 %v485_v19, %v477_v18  ;;  %v2669_v29 = vpack.c.bf16 %v484_v20, %v476_v14  ;;  %v288_v30 = vpop.f32.mrb[5].mxu1  ;;  %v200_v31 = vadd.f32 %v199_v27, %v2657_v6  ;;  %v287_v34 = vadd.f32 %v286_v25, %v2657_v6 }
  0xf9   :  { %v2672_v32 = vpack.c.bf16 %v486_v23, %v478_v22  ;;  %v289_v36 = vadd.f32 %v288_v30, %v2657_v6  ;;  %v491_v38 = vmax.f32 %v198_v26, 0.0  ;;  %v939_v18 = vadd.s32 384, %v2692_v1 }
  0xfa   :  { %v203_v35 = vpop.f32.mrb[6].mxu0  ;;  %v492_v43 = vmax.f32 %v200_v31, 0.0  ;;  %v493_v48 = vmax.f32 %v287_v34, 0.0  ;;  %v937_v23 = vadd.s32 128, %v2692_v1 }
  0xfb   :  { %v292_v37 = vpop.f32.mrb[6].mxu1  ;;  %v204_v39 = vadd.f32 %v203_v35, %v2674_v33  ;;  %v205_v40 = vpop.f32.mrb[7].mxu0  ;;  %v494_v52 = vmax.f32 %v289_v36, 0.0 }
  0xfc   :  { %v293_v41 = vadd.f32 %v292_v37, %v2674_v33  ;;  %v294_v42 = vpop.f32.mrb[7].mxu1  ;;  %v206_v44 = vadd.f32 %v205_v40, %v2674_v33 }
  0xfd   :  { %v295_v45 = vadd.f32 %v294_v42, %v2674_v33  ;;  %v499_v46 = vmax.f32 %v204_v39, 0.0  ;;  %v962_v42 = vand.u32 127, %v938_v17 }
  0xfe   :  { %v501_v49 = vmax.f32 %v293_v41, 0.0  ;;  %v500_v50 = vmax.f32 %v206_v44, 0.0  ;;  %v363_v51 = vpop.f32.mrb[8].mxu0 }
  0xff   :  { %v502_v53 = vmax.f32 %v295_v45, 0.0  ;;  %v2682_v54 = vpack.c.bf16 %v499_v46, %v491_v38  ;;  %v452_v55 = vpop.f32.mrb[8].mxu1  ;;  %v364_v56 = vadd.f32 %v363_v51, %v2650_v59  ;;  %v365_v57 = vpop.f32.mrb[9].mxu0  ;;  %vm2740_vm4 = vcmp.lt.s32.totalorder %v962_v42, 127 }
 0x100   :  { %v2685_v58 = vpack.c.bf16 %v501_v49, %v493_v48  ;;  %v2687_v60 = vpack.c.bf16 %v500_v50, %v492_v43  ;;  %v454_v61 = vpop.f32.mrb[9].mxu1  ;;  %v366_v62 = vadd.f32 %v365_v57, %v2650_v59  ;;  %v453_v2 = vadd.f32 %v452_v55, %v2650_v59  ;;  %vm2157_vm15 = vmpackc.low %vm2740_vm4, %vm2740_vm4 }
 0x101   :  { %v2690_v63 = vpack.c.bf16 %v502_v53, %v494_v52  ;;  %v455_v5 = vadd.f32 %v454_v61, %v2650_v59  ;;  %v479_v8 = vmax.f32 %v364_v56, 0.0  ;;  %v969_v43 = vand.u32 127, %v939_v18 }
 0x102   :  { %v369_v4 = vpop.f32.mrb[10].mxu0  ;;  %v480_v13 = vmax.f32 %v366_v62, 0.0  ;;  %v481_v19 = vmax.f32 %v453_v2, 0.0  ;;  %v955_v49 = vand.u32 127, %v937_v23  ;;  %v940_v55 = vadd.s32 512, %v2692_v1 }
 0x103   :  { %v458_v7 = vpop.f32.mrb[10].mxu1  ;;  %v370_v9 = vadd.f32 %v369_v4, %v2654_v3  ;;  %v371_v10 = vpop.f32.mrb[11].mxu0  ;;  %v482_v25 = vmax.f32 %v455_v5, 0.0  ;;  %v2721_v61 = vadd.s32 768, %v2692_v1  ;;  %v2724_v62 = vadd.s32 640, %v2692_v1 }
 0x104   :  { %v459_v11 = vadd.f32 %v458_v7, %v2654_v3  ;;  %v460_v12 = vpop.f32.mrb[11].mxu1  ;;  %v372_v14 = vadd.f32 %v371_v10, %v2654_v3  ;;  %vm2745_vm5 = vcmp.lt.s32.totalorder %v969_v43, 127  ;;  %vm2750_vm7 = vcmp.lt.s32.totalorder %v955_v49, 127 }
 0x105   :  { %v461_v15 = vadd.f32 %v460_v12, %v2654_v3  ;;  %v487_v16 = vmax.f32 %v370_v9, 0.0  ;;  %v990_v42 = vand.u32 127, %v2721_v61  ;;  %vm2154_vm13 = vmpackc.low %vm2745_vm5, %vm2745_vm5 }
 0x106   :  { %v489_v20 = vmax.f32 %v459_v11, 0.0  ;;  %v488_v21 = vmax.f32 %v372_v14, 0.0  ;;  %v375_v22 = vpop.f32.mrb[12].mxu0  ;;  %vm2126_vm14 = vmpackc.low %vm2750_vm7, %vm2750_vm7 }
 0x107   :  { %v490_v26 = vmax.f32 %v461_v15, 0.0  ;;  %v2703_v27 = vpack.c.bf16 %v487_v16, %v479_v8  ;;  %v464_v30 = vpop.f32.mrb[12].mxu1  ;;  %v376_v31 = vadd.f32 %v375_v22, %v2657_v6  ;;  %v377_v34 = vpop.f32.mrb[13].mxu0  ;;  %v2727_v8 = vadd.s32 896, %v2692_v1  ;;  %v1180_v1 = vld [vmem:[#allocation2 + $0x18] sm:$0xff] }
 0x108   :  { %v2706_v35 = vpack.c.bf16 %v489_v20, %v481_v19  ;;  %v2708_v36 = vpack.c.bf16 %v488_v21, %v480_v13  ;;  %v466_v37 = vpop.f32.mrb[13].mxu1  ;;  %v378_v38 = vadd.f32 %v377_v34, %v2657_v6  ;;  %v465_v40 = vadd.f32 %v464_v30, %v2657_v6 }
 0x109   :  { %v2711_v39 = vpack.c.bf16 %v490_v26, %v482_v25  ;;  %v467_v44 = vadd.f32 %v466_v37, %v2657_v6  ;;  %v495_v46 = vmax.f32 %v376_v31, 0.0  ;;  %vm2822_vm11 = vcmp.lt.s32.totalorder %v990_v42, 127 }
 0x10a   :  { %v381_v41 = vpop.f32.mrb[14].mxu0  ;;  %v496_v52 = vmax.f32 %v378_v38, 0.0  ;;  %v497_v2 = vmax.f32 %v465_v40, 0.0 }
 0x10b   :  { %v470_v45 = vpop.f32.mrb[14].mxu1  ;;  %v382_v47 = vadd.f32 %v381_v41, %v2674_v33  ;;  %v383_v48 = vpop.f32.mrb[15].mxu0  ;;  %v498_v9 = vmax.f32 %v467_v44, 0.0  ;;  %v976_v41 = vand.u32 127, %v940_v55 }
 0x10c   :  { %v471_v50 = vadd.f32 %v470_v45, %v2674_v33  ;;  %v472_v51 = vpop.f32.mrb[15].mxu1  ;;  %v384_v53 = vadd.f32 %v383_v48, %v2674_v33 }
 0x10d   :  { %v473_v56 = vadd.f32 %v472_v51, %v2674_v33  ;;  %v503_v57 = vmax.f32 %v382_v47, 0.0  ;;  %v997_v47 = vand.u32 127, %v2727_v8  ;;  %vm2780_vm8 = vcmp.lt.s32.totalorder %v976_v41, 127 }
 0x10e   :  { %v505_v4 = vmax.f32 %v471_v50, 0.0  ;;  %v504_v5 = vmax.f32 %v384_v53, 0.0  ;;  %v613_v7 = vpop.f32.mrb[16].mxu0 }
 0x10f   :  { %v506_v10 = vmax.f32 %v473_v56, 0.0  ;;  %v2729_v11 = vpack.c.bf16 %v503_v57, %v495_v46  ;;  %v702_v12 = vpop.f32.mrb[16].mxu1  ;;  %v614_v13 = vadd.f32 %v613_v7, %v2650_v59  ;;  %v615_v14 = vpop.f32.mrb[17].mxu0  ;;  %v983_v46 = vand.u32 127, %v2724_v62 }
 0x110   :  { %v2732_v15 = vpack.c.bf16 %v505_v4, %v497_v2  ;;  %v2734_v16 = vpack.c.bf16 %v504_v5, %v496_v52  ;;  %v703_v17 = vadd.f32 %v702_v12, %v2650_v59  ;;  %v704_v18 = vpop.f32.mrb[17].mxu1  ;;  %v616_v19 = vadd.f32 %v615_v14, %v2650_v59 }
 0x111   :  { %v2738_v20 = vpack.c.bf16 %v506_v10, %v498_v9  ;;  %v705_v22 = vadd.f32 %v704_v18, %v2650_v59  ;;  %v903_v23 = vmax.f32 %v614_v13, 0.0  ;;  %vm2794_vm9 = vcmp.lt.s32.totalorder %v983_v46, 127 }
 0x112   :  { %v905_v25 = vmax.f32 %v703_v17, 0.0  ;;  %v904_v30 = vmax.f32 %v616_v19, 0.0  ;;  %v619_v31 = vpop.f32.mrb[18].mxu0  ;;  %vm2798_vm10 = vcmp.lt.s32.totalorder %v997_v47, 127  ;;  %vm2182_vm3 = vmpackc.low %vm2794_vm9, %vm2794_vm9 }
 0x113   :  { %v620_v37 = vadd.f32 %v619_v31, %v2654_v3  ;;  %v708_v38 = vpop.f32.mrb[18].mxu1  ;;  %v621_v40 = vpop.f32.mrb[19].mxu0  ;;  %v906_v48 = vmax.f32 %v705_v22, 0.0  ;;  %v1048_v49 = vsel %vm1040_vm6, %v903_v23, 0.0  ;;  %vm2210_vm2 = vmpackc.low %vm2798_vm10, %vm2798_vm10 }
 0x114   :  { %v709_v43 = vadd.f32 %v708_v38, %v2654_v3  ;;  %v622_v44 = vadd.f32 %v621_v40, %v2654_v3  ;;  %v710_v45 = vpop.f32.mrb[19].mxu1  ;;  %v1050_v52 = vsel %vm2740_vm4, %v905_v25, 0.0  ;;  %v1049_v53 = vsel %vm2750_vm7, %v904_v30, 0.0 }
 0x115   :  { %v911_v50 = vmax.f32 %v620_v37, 0.0  ;;  %v711_v51 = vadd.f32 %v710_v45, %v2654_v3  ;;  %v1051_v18 = vsel %vm2745_vm5, %v906_v48, 0.0 }
 0x116   :  { %v913_v55 = vmax.f32 %v709_v43, 0.0  ;;  %v912_v56 = vmax.f32 %v622_v44, 0.0  ;;  %v625_v57 = vpop.f32.mrb[20].mxu0 }
 0x117   :  { %v1056_v62 = vsel %vm1040_vm6, %v911_v50, 0.0  ;;  %v2769_v2 = vpack.c.bf16 %v911_v50, %v903_v23  ;;  %v914_v4 = vmax.f32 %v711_v51, 0.0  ;;  %v714_v5 = vpop.f32.mrb[20].mxu1  ;;  %v626_v7 = vadd.f32 %v625_v57, %v2657_v6  ;;  %v627_v8 = vpop.f32.mrb[21].mxu0 }
 0x118   :  { %v1058_v9 = vsel %vm2740_vm4, %v913_v55, 0.0  ;;  %v2774_v10 = vpack.c.bf16 %v913_v55, %v905_v25  ;;  %v1057_v12 = vsel %vm2750_vm7, %v912_v56, 0.0  ;;  %v2778_v13 = vpack.c.bf16 %v912_v56, %v904_v30  ;;  %v716_v14 = vpop.f32.mrb[21].mxu1 }
 0x119   :  { %v2786_v19 = vpack.c.bf16 %v914_v4, %v906_v48  ;;  %v715_v22 = vadd.f32 %v714_v5, %v2657_v6  ;;  %v717_v23 = vadd.f32 %v716_v14, %v2657_v6  ;;  %v919_v25 = vmax.f32 %v626_v7, 0.0 }
 0x11a   :  { %v628_v31 = vadd.f32 %v627_v8, %v2657_v6  ;;  %v2230_v37 = vpack.i.bf16 %v1056_v62, %v1048_v49  ;;  %v631_v30 = vpop.f32.mrb[22].mxu0  ;;  %v2240_v38 = vpack.i.bf16 %v1057_v12, %v1049_v53  ;;  %v1059_v40 = vsel %vm2745_vm5, %v914_v4, 0.0 }
 0x11b   :  { %v921_v41 = vmax.f32 %v715_v22, 0.0  ;;  %v720_v43 = vpop.f32.mrb[22].mxu1  ;;  %v632_v44 = vadd.f32 %v631_v30, %v2674_v33  ;;  %v633_v45 = vpop.f32.mrb[23].mxu0  ;;  %v2235_v48 = vpack.i.bf16 %v1058_v9, %v1050_v52  ;;  %v922_v49 = vmax.f32 %v717_v23, 0.0 }
 0x11c   :  { %v920_v55 = vmax.f32 %v628_v31, 0.0  ;;  %v721_v53 = vadd.f32 %v720_v43, %v2674_v33  ;;  %2231 = vrot.lane.b32.xlu0 %v2230_v37, %s2340_s1  ;;  %v722_v56 = vpop.f32.mrb[23].mxu1  ;;  %2241 = vrot.lane.b32.xlu1 %v2240_v38, %s2340_s1  ;;  %v634_v52 = vadd.f32 %v633_v45, %v2674_v33  ;;  %v1064_v47 = vsel %vm1040_vm6, %v919_v25, 0.0 }
 0x11d   :  { %v2808_v46 = vsel %vm2740_vm4, %v921_v41, 0.0  ;;  %v927_v57 = vmax.f32 %v632_v44, 0.0  ;;  %v723_v62 = vadd.f32 %v722_v56, %v2674_v33  ;;  %v2245_v9 = vpack.i.bf16 %v1059_v40, %v1051_v18 }
 0x11e   :  { %v1065_v4 = vsel %vm2750_vm7, %v920_v55, 0.0  ;;  %v929_v5 = vmax.f32 %v721_v53, 0.0  ;;  %v928_v7 = vmax.f32 %v634_v52, 0.0  ;;  %v791_v8 = vpop.f32.mrb[24].mxu0 }
 0x11f   :  { %v1072_v12 = vsel %vm1040_vm6, %v927_v57, 0.0  ;;  %v2817_v14 = vpack.c.bf16 %v927_v57, %v919_v25  ;;  %v930_v22 = vmax.f32 %v723_v62, 0.0  ;;  %v792_v23 = vadd.f32 %v791_v8, %v2650_v59  ;;  %v880_v31 = vpop.f32.mrb[24].mxu1  ;;  %v793_v30 = vpop.f32.mrb[25].mxu0 }
 0x120   :  { %v1074_v38 = vsel %vm2740_vm4, %v929_v5, 0.0  ;;  %v2828_v18 = vpack.c.bf16 %v929_v5, %v921_v41  ;;  %v1073_v25 = vsel %vm2750_vm7, %v928_v7, 0.0  ;;  %v2832_v40 = vpack.c.bf16 %v928_v7, %v920_v55  ;;  %2236 = vrot.lane.b32.xlu0 %v2235_v48, %s2340_s1  ;;  %v882_v43 = vpop.f32.mrb[25].mxu1  ;;  %2246 = vrot.lane.b32.xlu1 %v2245_v9, %s2340_s1  ;;  %vm2213_vm4 = vmpackc.low %vm2822_vm11, %vm2822_vm11 }
 0x121   :  { %v2838_v61 = vsel %vm2745_vm5, %v930_v22, 0.0  ;;  %v2840_v42 = vpack.c.bf16 %v930_v22, %v922_v49  ;;  %v907_v44 = vmax.f32 %v792_v23, 0.0  ;;  %v881_v41 = vadd.f32 %v880_v31, %v2650_v59 }
 0x122   :  { %v794_v45 = vadd.f32 %v793_v30, %v2650_v59  ;;  %v883_v53 = vadd.f32 %v882_v43, %v2650_v59  ;;  %v797_v55 = vpop.f32.mrb[26].mxu0  ;;  %v2250_v56 = vpack.i.bf16 %v1072_v12, %v1064_v47  ;;  %v2260_v52 = vpack.i.bf16 %v1073_v25, %v1065_v4 }
 0x123   :  { %v2847_v48 = vsel %vm2745_vm5, %v922_v49, 0.0  ;;  %v2851_v57 = vsel %vm2780_vm8, %v907_v44, 0.0  ;;  %v798_v62 = vadd.f32 %v797_v55, %v2654_v3  ;;  %v886_v5 = vpop.f32.mrb[26].mxu1  ;;  %v799_v7 = vpop.f32.mrb[27].mxu0  ;;  %v2255_v8 = vpack.i.bf16 %v1074_v38, %v2808_v46  ;;  %vm2185_vm5 = vmpackc.low %vm2780_vm8, %vm2780_vm8 }
 0x124   :  { %v908_v9 = vmax.f32 %v794_v45, 0.0  ;;  %v910_v22 = vmax.f32 %v883_v53, 0.0  ;;  %v887_v59 = vadd.f32 %v886_v5, %v2654_v3  ;;  %v800_v47 = vadd.f32 %v799_v7, %v2654_v3  ;;  %v888_v4 = vpop.f32.mrb[27].mxu1  ;;  %2251 = vrot.lane.b32.xlu1 %v2250_v56, %s2340_s1  ;;  %2261 = vrot.lane.b32.xlu0 %v2260_v52, %s2340_s1 }
 0x125   :  { %v909_v49 = vmax.f32 %v881_v41, 0.0  ;;  %v915_v12 = vmax.f32 %v798_v62, 0.0  ;;  %v889_v23 = vadd.f32 %v888_v4, %v2654_v3  ;;  %v2270_v31 = vpack.i.bf16 %v2838_v61, %v2847_v48 }
 0x126   :  { %v2864_v46 = vsel %vm2794_vm9, %v908_v9, 0.0  ;;  %v1055_v30 = vsel %vm2798_vm10, %v910_v22, 0.0  ;;  %v917_v38 = vmax.f32 %v887_v59, 0.0  ;;  %v916_v25 = vmax.f32 %v800_v47, 0.0  ;;  %v803_v43 = vpop.f32.mrb[28].mxu0 }
 0x127   :  { %v1060_v45 = vsel %vm2780_vm8, %v915_v12, 0.0  ;;  %v2870_v41 = vpack.c.bf16 %v915_v12, %v907_v44  ;;  %v918_v53 = vmax.f32 %v889_v23, 0.0  ;;  %v804_v3 = vadd.f32 %v803_v43, %v2657_v6  ;;  %v892_v55 = vpop.f32.mrb[28].mxu1  ;;  %v805_v61 = vpop.f32.mrb[29].mxu0 }
 0x128   :  { %v1062_v56 = vsel %vm2822_vm11, %v917_v38, 0.0  ;;  %v2875_v52 = vpack.c.bf16 %v917_v38, %v909_v49  ;;  %v1061_v48 = vsel %vm2794_vm9, %v916_v25, 0.0  ;;  %v2879_v62 = vpack.c.bf16 %v916_v25, %v908_v9  ;;  %v894_v5 = vpop.f32.mrb[29].mxu1  ;;  %2256 = vrot.lane.b32.xlu1 %v2255_v8, %s2340_s1 }
 0x129   :  { %v1063_v44 = vsel %vm2798_vm10, %v918_v53, 0.0  ;;  %v2884_v7 = vpack.c.bf16 %v918_v53, %v910_v22  ;;  %v923_v59 = vmax.f32 %v804_v3, 0.0  ;;  %v893_v47 = vadd.f32 %v892_v55, %v2657_v6 }
 0x12a   :  { %v806_v4 = vadd.f32 %v805_v61, %v2657_v6  ;;  %v895_v12 = vadd.f32 %v894_v5, %v2657_v6  ;;  %v809_v23 = vpop.f32.mrb[30].mxu0  ;;  %v2265_v38 = vpack.i.bf16 %v1063_v44, %v1055_v30  ;;  %v2280_v9 = vpack.i.bf16 %v1060_v45, %v2851_v57 }
 0x12b   :  { %v1054_v25 = vsel %vm2822_vm11, %v909_v49, 0.0  ;;  %v925_v8 = vmax.f32 %v893_v47, 0.0  ;;  %v810_v43 = vadd.f32 %v809_v23, %v2674_v33  ;;  %v898_v0 = vpop.f32.mrb[30].mxu1  ;;  %v811_v22 = vpop.f32.mrb[31].mxu0  ;;  %v2285_v53 = vpack.i.bf16 %v1061_v48, %v2864_v46 }
 0x12c   :  { %v924_v3 = vmax.f32 %v806_v4, 0.0  ;;  %v926_v55 = vmax.f32 %v895_v12, 0.0  ;;  %v899_v61 = vadd.f32 %v898_v0, %v2674_v33  ;;  %v812_v6 = vadd.f32 %v811_v22, %v2674_v33  ;;  %v900_v5 = vpop.f32.mrb[31].mxu1  ;;  %2266 = vrot.lane.b32.xlu0 %v2265_v38, %s2340_s1 }
 0x12d   :  { %v1068_v57 = vsel %vm2780_vm8, %v923_v59, 0.0  ;;  %v931_v49 = vmax.f32 %v810_v43, 0.0  ;;  %v901_v30 = vadd.f32 %v900_v5, %v2674_v33  ;;  %v2290_v45 = vpack.i.bf16 %v1062_v56, %v1054_v25 }
 0x12e   :  { %v1070_v44 = vsel %vm2822_vm11, %v925_v8, 0.0  ;;  %v1069_v46 = vsel %vm2794_vm9, %v924_v3, 0.0  ;;  %v933_v48 = vmax.f32 %v899_v61, 0.0  ;;  %v932_v0 = vmax.f32 %v812_v6, 0.0 }
 0x12f   :  { %v1071_v47 = vsel %vm2798_vm10, %v926_v55, 0.0  ;;  %v1076_v4 = vsel %vm2780_vm8, %v931_v49, 0.0  ;;  %v2908_v12 = vpack.c.bf16 %v931_v49, %v923_v59  ;;  %v934_v23 = vmax.f32 %v901_v30, 0.0 }
 0x130   :  { %v1078_v33 = vsel %vm2822_vm11, %v933_v48, 0.0  ;;  %v2912_v56 = vpack.c.bf16 %v933_v48, %v925_v8  ;;  %v1077_v38 = vsel %vm2794_vm9, %v932_v0, 0.0  ;;  %v2916_v25 = vpack.c.bf16 %v932_v0, %v924_v3  ;;  %2271 = vrot.lane.b32.xlu0 %v2270_v31, %s2340_s1  ;;  %v1181_v31 = vld [vmem:[%s3268_s5] sm:$0xff]  ;;  %v1182_v8 = vld [vmem:[%s3268_s5 + $0x8] sm:$0xff] }
 0x131   :  { %v1079_v43 = vsel %vm2798_vm10, %v934_v23, 0.0  ;;  %v2921_v22 = vpack.c.bf16 %v934_v23, %v926_v55  ;;  %v2295_v59 = vpack.i.bf16 %v1076_v4, %v1068_v57  ;;  %v2300_v61 = vpack.i.bf16 %v1077_v38, %v1069_v46 }
 0x132   :  { %v2275_v6 = vpack.i.bf16 %v1079_v43, %v1071_v47  ;;  %v2305_v5 = vpack.i.bf16 %v1078_v33, %v1070_v44 }
 0x134   :  { %2276 = vrot.lane.b32.xlu1 %v2275_v6, %s2340_s1  ;;  %2281 = vrot.lane.b32.xlu0 %v2280_v9, %s2340_s1  ;;  %v1183_v9 = vld [vmem:[%s3268_s5 + $0x10] sm:$0xff] }
 0x138   :  { %2286 = vrot.lane.b32.xlu1 %v2285_v53, %s2340_s1  ;;  %2291 = vrot.lane.b32.xlu0 %v2290_v45, %s2340_s1  ;;  %v1184_v53 = vld [vmem:[%s3268_s5 + $0x18] sm:$0xff] }
 0x13c   :  { %2296 = vrot.lane.b32.xlu1 %v2295_v59, %s2340_s1  ;;  %2301 = vrot.lane.b32.xlu0 %v2300_v61, %s2340_s1 }
 0x140   :  { %2306 = vrot.lane.b32.xlu1 %v2305_v5, %s2340_s1  ;;  %1187 = vperm.xlu0 %2228, %v1181_v31  }
 0x144   :  { %1192 = vperm.xlu1 %2229, %v1182_v8   ;;  %1197 = vperm.xlu0 %2228, %v1183_v9  }
 0x148   :  { %1202 = vperm.xlu1 %2229, %v1184_v53  }
 0x18e   :  { %v2232_v3 = vpop.permute.xlu0 %2231  ;;  %v2242_v55 = vpop.permute.xlu1 %2241 }
 0x18f   :  { %v2234_v57 = vunpack.i.h.bf16 %v2232_v3  ;;  %v2233_v49 = vunpack.i.l.bf16 %v2232_v3  ;;  %v2244_v30 = vunpack.i.h.bf16 %v2242_v55  ;;  %v2243_v45 = vunpack.i.l.bf16 %v2242_v55 }
 0x191   :  { %v1169_v44 = vsel %vm1144_vm12, %v2233_v49, %v2243_v45  ;;  %v1170_v46 = vsel %vm1144_vm12, %v2234_v57, %v2244_v30 }
 0x192   :  { %v2237_v48 = vpop.permute.xlu0 %2236  ;;  %v2947_v0 = vpop.permute.xlu1 %2246  ;;  %v2109_v47 = vpack.c.bf16 %v1170_v46, %v1169_v44 }
 0x193   :  { %v2239_v4 = vunpack.i.h.bf16 %v2237_v48  ;;  %v2238_v23 = vunpack.i.l.bf16 %v2237_v48  ;;  %v2249_v33 = vunpack.i.h.bf16 %v2947_v0  ;;  %v3272_v38 = vunpack.i.l.bf16 %v2947_v0 }
 0x194   :  { %2110 = vmatprep.subr.bf16.mxu0 %v2109_v47 }
 0x195   :  { %v1166_v43 = vsel %vm1144_vm12, %v2244_v30, %v2239_v4  ;;  %v1165_v59 = vsel %vm1144_vm12, %v2243_v45, %v2238_v23  ;;  %v1161_v61 = vsel %vm1144_vm12, %v2238_v23, %v3272_v38  ;;  %v1162_v6 = vsel %vm1144_vm12, %v2239_v4, %v2249_v33 }
 0x196   :  { %v2137_v5 = vpack.c.bf16 %v1162_v6, %v1161_v61  ;;  %v2139_v31 = vpack.c.bf16 %v1166_v43, %v1165_v59  ;;  %v2252_v8 = vpop.permute.xlu1 %2251  ;;  %v2262_v9 = vpop.permute.xlu0 %2261 }
 0x197   :  { %v2254_v53 = vunpack.i.h.bf16 %v2252_v8  ;;  %v2253_v3 = vunpack.i.l.bf16 %v2252_v8  ;;  %v2264_v55 = vunpack.i.h.bf16 %v2262_v9  ;;  %v2263_v30 = vunpack.i.l.bf16 %v2262_v9 }
 0x198   :  { %2138 = vmatprep.subr.bf16.mxu1 %v2137_v5 }
 0x199   :  { %2140 = vmatpush1.bf16.msra.mxu1 %v2139_v31  ;;  %v1171_v38 = vsel %vm1144_vm12, %v2253_v3, %v2263_v30  ;;  %v1172_v4 = vsel %vm1144_vm12, %v2254_v53, %v2264_v55 }
 0x19a   :  { %v2257_v45 = vpop.permute.xlu1 %2256  ;;  %v2113_v8 = vpack.c.bf16 %v1172_v4, %v1171_v38 }
 0x19b   :  { %v2259_v47 = vunpack.i.h.bf16 %v2257_v45  ;;  %v2258_v23 = vunpack.i.l.bf16 %v2257_v45 }
 0x19d   :  { %v1167_v9 = vsel %vm1144_vm12, %v2263_v30, %v2258_v23  ;;  %v1168_v45 = vsel %vm1144_vm12, %v2264_v55, %v2259_v47 }
 0x19e   :  { %v2267_v44 = vpop.permute.xlu0 %2266  ;;  %v2143_v4 = vpack.c.bf16 %v1168_v45, %v1167_v9 }
 0x19f   :  { %v2269_v46 = vunpack.i.h.bf16 %v2267_v44  ;;  %v2268_v48 = vunpack.i.l.bf16 %v2267_v44 }
 0x1a1   :  { %v1173_v43 = vsel %vm1144_vm12, %v2268_v48, %v2233_v49  ;;  %v1174_v59 = vsel %vm1144_vm12, %v2269_v46, %v2234_v57 }
 0x1a2   :  { %v2111_v61 = vpack.c.bf16 %v1174_v59, %v1173_v43  ;;  %v2971_v6 = vpop.permute.xlu0 %2271 }
 0x1a3   :  { %v2274_v5 = vunpack.i.h.bf16 %v2971_v6  ;;  %v2273_v31 = vunpack.i.l.bf16 %v2971_v6 }
 0x1a4   :  { %2112 = vmatpush1.bf16.msra.mxu0 %v2111_v61 }
 0x1a5   :  { %2114 = vmatprep.subr.bf16.mxu0 %v2113_v8  ;;  %v1163_v57 = vsel %vm1144_vm12, %v2258_v23, %v2273_v31  ;;  %v1164_v49 = vsel %vm1144_vm12, %v2259_v47, %v2274_v5 }
 0x1a6   :  { %v2277_v44 = vpop.permute.xlu1 %2276  ;;  %v2141_v38 = vpack.c.bf16 %v1164_v49, %v1163_v57  ;;  %v2282_v59 = vpop.permute.xlu0 %2281 }
 0x1a7   :  { %v2279_v43 = vunpack.i.h.bf16 %v2277_v44  ;;  %v2278_v30 = vunpack.i.l.bf16 %v2277_v44  ;;  %v2283_v45 = vunpack.i.l.bf16 %v2282_v59 }
 0x1a8   :  { %2142 = vmatprep.subr.bf16.mxu1 %v2141_v38 }
 0x1a9   :  { %v1175_v55 = vsel %vm1144_vm12, %v2278_v30, %v2253_v3  ;;  %v1176_v61 = vsel %vm1144_vm12, %v2279_v43, %v2254_v53  ;;  %2144 = vmatpush1.bf16.msra.mxu1 %v2143_v4 }
 0x1aa   :  { %v2115_v23 = vpack.c.bf16 %v1176_v61, %v1175_v55  ;;  %v2287_v8 = vpop.permute.xlu1 %2286  ;;  %2146 = vmatprep.subr.bf16.mxu1 %v2672_v32  ;;  %v2292_v47 = vpop.permute.xlu0 %2291 }
 0x1ab   :  { %v2294_v53 = vunpack.i.h.bf16 %v2292_v47  ;;  %v2293_v3 = vunpack.i.l.bf16 %v2292_v47  ;;  %v3292_v47 = vmov 0.0  }
 0x1ac   :  { %2116 = vmatpush1.bf16.msra.mxu0 %v2115_v23  ;;  %v1178_v23 = vld [vmem:[#allocation2 + $0x8] sm:$0xff] }
 0x1ad   :  { %2118 = vmatprep.subr.bf16.mxu0 %v2669_v29  ;;  %2148 = vmatpush1.bf16.msra.mxu1 %v2667_v28  ;;  %v2289_v28 = vunpack.i.h.bf16 %v2287_v8 }
 0x1ae   :  { %v2994_v9 = vpop.permute.xlu1 %2296  ;;  %2150 = vmatprep.subr.bf16.mxu1 %v2690_v63  ;;  %v2302_v32 = vpop.permute.xlu0 %2301  ;;  %v1145_v63 = vsel %vm1144_vm12, %v2293_v3, %v2268_v48 }
 0x1af   :  { %v1150_v57 = vsel %vm1144_vm12, %v2289_v28, %v2294_v53  ;;  %v2298_v49 = vunpack.i.l.bf16 %v2994_v9  ;;  %v2304_v48 = vunpack.i.h.bf16 %v2302_v32  ;;  %v2303_v44 = vunpack.i.l.bf16 %v2302_v32 }
 0x1b0   :  { %2120 = vmatpush1.bf16.msra.mxu0 %v2664_v24  ;;  %v2288_v24 = vunpack.i.l.bf16 %v2287_v8 }
 0x1b1   :  { %2122 = vmatprep.subr.bf16.mxu0 %v2687_v60  ;;  %2152 = vmatpush1.bf16.msra.mxu1 %v2685_v58  ;;  %v1155_v61 = vsel %vm1144_vm12, %v2298_v49, %v2303_v44 }
 0x1b2   :  { %v2307_v29 = vpop.permute.xlu1 %2306  ;;  %2155 = vmatprep.subr.msk.bf16.mxu1 %vm2154_vm13, %v2786_v19  ;;  %v2284_v19 = vunpack.i.h.bf16 %v2282_v59  ;;  %v1153_v4 = vsel %vm1144_vm12, %v2283_v45, %v2288_v24 }
 0x1b3   :  { %v2309_v58 = vunpack.i.h.bf16 %v2307_v29  ;;  %v2308_v60 = vunpack.i.l.bf16 %v2307_v29 }
 0x1b4   :  { %2124 = vmatpush1.bf16.msra.mxu0 %v2682_v54  ;;  %v1154_v26 = vsel %vm1144_vm12, %v2284_v19, %v2289_v28  ;;  %v1158_v34 = vsel %vm1144_vm12, %v2249_v33, %v2284_v19  ;;  %v1179_v28 = vld [vmem:[#allocation2 + $0x10] sm:$0xff] }
 0x1b5   :  { %2127 = vmatprep.subr.msk.bf16.mxu0 %vm2126_vm14, %v2778_v13  ;;  %2158 = vmatpush1.bf16.msk.msra.mxu1 %vm2157_vm15, %v2774_v10  ;;  %v1146_v13 = vsel %vm1144_vm12, %v2294_v53, %v2269_v46  ;;  %v2299_v10 = vunpack.i.h.bf16 %v2994_v9  ;;  %v1149_v46 = vsel %vm1144_vm12, %v2288_v24, %v2293_v3  ;;  %v1148_v59 = vsel %vm1144_vm12, %v2309_v58, %v2279_v43 }
 0x1b6   :  { %2161 = vmatprep.subr.msk.bf16.mxu1 %vm2154_vm13, %v2840_v42  ;;  %v2193_v38 = vpack.c.bf16 %v1146_v13, %v1145_v63  ;;  %v1147_v42 = vsel %vm1144_vm12, %v2308_v60, %v2278_v30  ;;  %v2165_v55 = vpack.c.bf16 %v1154_v26, %v1153_v4  ;;  %v1151_v43 = vsel %vm1144_vm12, %v2303_v44, %v2308_v60 }
 0x1b7   :  { %v1156_v30 = vsel %vm1144_vm12, %v2299_v10, %v2304_v48  ;;  %v1152_v33 = vsel %vm1144_vm12, %v2304_v48, %v2309_v58  ;;  %v1159_v9 = vsel %vm1144_vm12, %v2273_v31, %v2298_v49 }
 0x1b8   :  { %2130 = vmatpush1.bf16.msk.msra.mxu0 %vm3031_vm0, %v2769_v2  ;;  %v3070_v2 = vld [vmem:[#allocation2] sm:$0xff]  ;;  %v2199_v53 = vpack.c.bf16 %v1152_v33, %v1151_v43  ;;  %v2169_v3 = vpack.c.bf16 %v1156_v30, %v1155_v61 }
 0x1b9   :  { %2133 = vmatprep.subr.msk.bf16.mxu0 %vm2126_vm14, %v2832_v40  ;;  %2164 = vmatpush1.bf16.msk.msra.mxu1 %vm2157_vm15, %v2828_v18  ;;  %v3291_v40 = vunpack.i.l.bf16 %v2947_v0  ;;  %v2195_v18 = vpack.c.bf16 %v1150_v57, %v1149_v46  ;;  %v2197_v0 = vpack.c.bf16 %v1148_v59, %v1147_v42 }
 0x1ba   :  { %2194 = vmatprep.subr.bf16.mxu1 %v2193_v38 }
 0x1bb   :  { %v1157_v21 = vsel %vm1144_vm12, %v3291_v40, %v2283_v45 }
 0x1bc   :  { %2136 = vmatpush1.bf16.msk.msra.mxu0 %vm3031_vm0, %v2817_v14  ;;  %1846 = vmatmul.mubr.msk.f32.vlgmr.msra.gmra.mrb[32].mxu1 %vm1205_vm1, %v3070_v2  ;;  %v2167_v8 = vpack.c.bf16 %v1158_v34, %v1157_v21  ;;  %v1160_v14 = vsel %vm1144_vm12, %v2274_v5, %v2299_v10 }
 0x1bd   :  { %2166 = vmatprep.subr.bf16.mxu0 %v2165_v55  ;;  %2196 = vmatpush1.bf16.msra.mxu1 %v2195_v18  ;;  %v2171_v29 = vpack.c.bf16 %v1160_v14, %v1159_v9 }
 0x1be   :  { %2198 = vmatprep.subr.bf16.mxu1 %v2197_v0  ;;  %1377 = vmatprep.mubr.f32.mxu1 %v3292_v47 }
 0x1bf   :  { %1834 = vmatmul.mubr.msk.f32.vlgmr.msra.gmra.mrb[32].mxu0 %vm1205_vm1, %v3070_v2 }
 0x1c0   :  { %1847 = vmatmul.mubr.msk.f32.gmra.mrb[34].mxu1 %vm1205_vm1, %v1178_v23  ;;  %2168 = vmatpush1.bf16.msra.mxu0 %v2167_v8 }
 0x1c1   :  { %2170 = vmatprep.subr.bf16.mxu0 %v2169_v3  ;;  %2200 = vmatpush1.bf16.msra.mxu1 %v2199_v53 }
 0x1c2   :  { %1288 = vmatprep.mubr.f32.mxu0 %v3292_v47  ;;  %2202 = vmatprep.subr.bf16.mxu1 %v2711_v39 }
 0x1c3   :  { %1835 = vmatmul.mubr.msk.f32.gmra.mrb[34].mxu0 %vm1205_vm1, %v1178_v23  ;;  %1383 = vmatprep.mubr.f32.mxu1 %v3292_v47  ;;  %v3177_v39 = vpop.permute.xlu1 %1192 }
 0x1c4   :  { %1848 = vmatmul.mubr.msk.f32.gmra.mrb[36].mxu1 %vm1205_vm1, %v1179_v28  ;;  %2172 = vmatpush1.bf16.msra.mxu0 %v2171_v29 }
 0x1c5   :  { %2174 = vmatprep.subr.bf16.mxu0 %v2708_v36  ;;  %2204 = vmatpush1.bf16.msra.mxu1 %v2706_v35  ;;  %v3175_v36 = vpop.permute.xlu0 %1187 }
 0x1c6   :  { %1294 = vmatprep.mubr.f32.mxu0 %v3292_v47  ;;  %2206 = vmatprep.subr.bf16.mxu1 %v2738_v20 }
 0x1c7   :  { %1836 = vmatmul.mubr.msk.f32.gmra.mrb[36].mxu0 %vm1205_vm1, %v1179_v28  ;;  %1389 = vmatprep.mubr.f32.mxu1 %v3292_v47  ;;  %v3189_v13 = vpop.permute.xlu1 %1202 }
 0x1c8   :  { %1849 = vmatmul.mubr.msk.f32.gmra.mrb[38].mxu1 %vm1205_vm1, %v1180_v1  ;;  %2176 = vmatpush1.bf16.msra.mxu0 %v2703_v27 }
 0x1c9   :  { %2178 = vmatprep.subr.bf16.mxu0 %v2734_v16  ;;  %2208 = vmatpush1.bf16.msra.mxu1 %v2732_v15  ;;  %v3187_v58 = vpop.permute.xlu0 %1197 }
 0x1ca   :  { %1300 = vmatprep.mubr.f32.mxu0 %v3292_v47  ;;  %2211 = vmatprep.subr.msk.bf16.mxu1 %vm2210_vm2, %v2884_v7 }
 0x1cb   :  { %1837 = vmatmul.mubr.msk.f32.gmra.mrb[38].mxu0 %vm1205_vm1, %v1180_v1  ;;  %1549 = vmatprep.mubr.f32.mxu1 %v3292_v47 }
 0x1cc   :  { %2180 = vmatpush1.bf16.msra.mxu0 %v2729_v11  ;;  %1460 = vmatprep.mubr.f32.mxu0 %v3292_v47 }
 0x1cd   :  { %2183 = vmatprep.subr.msk.bf16.mxu0 %vm2182_vm3, %v2879_v62  ;;  %2214 = vmatpush1.bf16.msk.msra.mxu1 %vm2213_vm4, %v2875_v52 }
 0x1ce   :  { %2217 = vmatprep.subr.msk.bf16.mxu1 %vm2210_vm2, %v2921_v22 }
 0x1d0   :  { %2186 = vmatpush1.bf16.msk.msra.mxu0 %vm2185_vm5, %v2870_v41 }
 0x1d1   :  { %2189 = vmatprep.subr.msk.bf16.mxu0 %vm2182_vm3, %v2916_v25  ;;  %2220 = vmatpush1.bf16.msk.msra.mxu1 %vm2213_vm4, %v2912_v56 }
 0x1d4   :  { %2192 = vmatpush1.bf16.msk.msra.mxu0 %vm2185_vm5, %v2908_v12  ;;  %1870 = vmatmul.mubr.msk.f32.vlgmr.msra.gmra.mrb[40].mxu1 %vm1205_vm1, %v3070_v2 }
 0x1d5   :  { %1555 = vmatprep.mubr.f32.mxu1 %v3292_v47 }
 0x1d7   :  { %1858 = vmatmul.mubr.msk.f32.vlgmr.msra.gmra.mrb[40].mxu0 %vm1205_vm1, %v3070_v2 }
 0x1d8   :  { %1871 = vmatmul.mubr.msk.f32.gmra.mrb[42].mxu1 %vm1205_vm1, %v1178_v23  ;;  %1466 = vmatprep.mubr.f32.mxu0 %v3292_v47 }
 0x1d9   :  { %1561 = vmatprep.mubr.f32.mxu1 %v3292_v47 }
 0x1db   :  { %1859 = vmatmul.mubr.msk.f32.gmra.mrb[42].mxu0 %vm1205_vm1, %v1178_v23 }
 0x1dc   :  { %1872 = vmatmul.mubr.msk.f32.gmra.mrb[44].mxu1 %vm1205_vm1, %v1179_v28  ;;  %1472 = vmatprep.mubr.f32.mxu0 %v3292_v47 }
 0x1dd   :  { %1567 = vmatprep.mubr.f32.mxu1 %v3292_v47 }
 0x1df   :  { %1860 = vmatmul.mubr.msk.f32.gmra.mrb[44].mxu0 %vm1205_vm1, %v1179_v28 }
 0x1e0   :  { %1873 = vmatmul.mubr.msk.f32.gmra.mrb[46].mxu1 %vm1205_vm1, %v1180_v1  ;;  %1478 = vmatprep.mubr.f32.mxu0 %v3292_v47 }
 0x1e3   :  { %1861 = vmatmul.mubr.msk.f32.gmra.mrb[46].mxu0 %vm1205_vm1, %v1180_v1 }
 0x28f   :  { %v1373_v27 = vpop.f32.mrb[32].mxu1 }
 0x290   :  { %v1375_v35 = vpop.f32.mrb[33].mxu1  ;;  %v1374_v11 = vadd.f32 %v1373_v27, %v3175_v36 }
 0x291   :  { %v1376_v16 = vadd.f32 %v1375_v35, %v3175_v36 }
 0x292   :  { %v1284_v15 = vpop.f32.mrb[32].mxu0  ;;  %v1576_v52 = vmax.f32 %v1374_v11, 0.0 }
 0x293   :  { %v1286_v20 = vpop.f32.mrb[33].mxu0  ;;  %v1379_v17 = vpop.f32.mrb[34].mxu1  ;;  %v1285_v37 = vadd.f32 %v1284_v15, %v3175_v36  ;;  %v1577_v56 = vmax.f32 %v1376_v16, 0.0 }
 0x294   :  { %v1380_v50 = vadd.f32 %v1379_v17, %v3177_v39  ;;  %v1381_v51 = vpop.f32.mrb[35].mxu1  ;;  %v1287_v62 = vadd.f32 %v1286_v20, %v3175_v36 }
 0x295   :  { %v1382_v41 = vadd.f32 %v1381_v51, %v3177_v39  ;;  %v1574_v60 = vmax.f32 %v1285_v37, 0.0 }
 0x296   :  { %v1584_v7 = vmax.f32 %v1380_v50, 0.0  ;;  %v1290_v12 = vpop.f32.mrb[34].mxu0  ;;  %v1575_v19 = vmax.f32 %v1287_v62, 0.0 }
 0x297   :  { %v1585_v25 = vmax.f32 %v1382_v41, 0.0  ;;  %v1291_v22 = vadd.f32 %v1290_v12, %v3177_v39  ;;  %v1292_v6 = vpop.f32.mrb[35].mxu0  ;;  %v1385_v5 = vpop.f32.mrb[36].mxu1 }
 0x298   :  { %v1989_v31 = vpack.c.bf16 %v1584_v7, %v1576_v52  ;;  %v1293_v24 = vadd.f32 %v1292_v6, %v3177_v39  ;;  %v1387_v32 = vpop.f32.mrb[37].mxu1  ;;  %v1386_v57 = vadd.f32 %v1385_v5, %v3187_v58 }
 0x299   :  { %v1999_v54 = vpack.c.bf16 %v1585_v25, %v1577_v56  ;;  %v1582_v63 = vmax.f32 %v1291_v22, 0.0  ;;  %v1388_v48 = vadd.f32 %v1387_v32, %v3187_v58 }
 0x29a   :  { %2049 = vst [vmem:[%s3269_s6 + $0x20] sm:$0xff] %v1989_v31   ;;  %v1583_v45 = vmax.f32 %v1293_v24, 0.0  ;;  %v1296_v10 = vpop.f32.mrb[36].mxu0  ;;  %v1592_v59 = vmax.f32 %v1386_v57, 0.0 }
 0x29b   :  { %2051 = vst [vmem:[%s3269_s6 + $0x30] sm:$0xff] %v1999_v54   ;;  %v1969_v49 = vpack.c.bf16 %v1582_v63, %v1574_v60  ;;  %v1298_v44 = vpop.f32.mrb[37].mxu0  ;;  %v1391_v46 = vpop.f32.mrb[38].mxu1  ;;  %v1297_v2 = vadd.f32 %v1296_v10, %v3187_v58  ;;  %v1593_v18 = vmax.f32 %v1388_v48, 0.0 }
 0x29c   :  { %v1979_v38 = vpack.c.bf16 %v1583_v45, %v1575_v19  ;;  %v1392_v4 = vadd.f32 %v1391_v46, %v3189_v13  ;;  %v1393_v26 = vpop.f32.mrb[39].mxu1  ;;  %v1299_v34 = vadd.f32 %v1298_v44, %v3187_v58 }
 0x29d   :  { %1970 = vst [vmem:[%s3269_s6] sm:$0xff] %v1969_v49   ;;  %v1394_v42 = vadd.f32 %v1393_v26, %v3189_v13  ;;  %v1590_v0 = vmax.f32 %v1297_v2, 0.0 }
 0x29e   :  { %2047 = vst [vmem:[%s3269_s6 + $0x10] sm:$0xff] %v1979_v38   ;;  %v1600_v40 = vmax.f32 %v1392_v4, 0.0  ;;  %v1302_v21 = vpop.f32.mrb[38].mxu0  ;;  %v1591_v47 = vmax.f32 %v1299_v34, 0.0 }
 0x29f   :  { %v1601_v55 = vmax.f32 %v1394_v42, 0.0  ;;  %v1303_v61 = vadd.f32 %v1302_v21, %v3189_v13  ;;  %v1304_v30 = vpop.f32.mrb[39].mxu0 }
 0x2a0   :  { %v1994_v43 = vpack.c.bf16 %v1600_v40, %v1592_v59  ;;  %v1305_v33 = vadd.f32 %v1304_v30, %v3189_v13 }
 0x2a1   :  { %v2004_v23 = vpack.c.bf16 %v1601_v55, %v1593_v18  ;;  %v1598_v8 = vmax.f32 %v1303_v61, 0.0 }
 0x2a2   :  { %2050 = vst [vmem:[%s3269_s6 + $0x28] sm:$0xff] %v1994_v43   ;;  %v1599_v9 = vmax.f32 %v1305_v33, 0.0 }
 0x2a3   :  { %2052 = vst [vmem:[%s3269_s6 + $0x38] sm:$0xff] %v2004_v23   ;;  %v1974_v14 = vpack.c.bf16 %v1598_v8, %v1590_v0 }
 0x2a4   :  { %v1984_v53 = vpack.c.bf16 %v1599_v9, %v1591_v47 }
 0x2a5   :  { %2046 = vst [vmem:[%s3269_s6 + $0x8] sm:$0xff] %v1974_v14  }
 0x2a6   :  { %2048 = vst [vmem:[%s3269_s6 + $0x18] sm:$0xff] %v1984_v53  }
 0x2a7   :  { %v1551_v3 = vpop.f32.mrb[40].mxu1 }
 0x2a8   :  { %v1553_v28 = vpop.f32.mrb[41].mxu1  ;;  %v1552_v29 = vadd.f32 %v1551_v3, %v3175_v36 }
 0x2a9   :  { %v1554_v27 = vadd.f32 %v1553_v28, %v3175_v36 }
 0x2aa   :  { %v1462_v1 = vpop.f32.mrb[40].mxu0  ;;  %v1580_v50 = vmax.f32 %v1552_v29, 0.0 }
 0x2ab   :  { %v1464_v35 = vpop.f32.mrb[41].mxu0  ;;  %v1557_v11 = vpop.f32.mrb[42].mxu1  ;;  %v1463_v20 = vadd.f32 %v1462_v1, %v3175_v36  ;;  %v1581_v52 = vmax.f32 %v1554_v27, 0.0 }
 0x2ac   :  { %v1558_v15 = vadd.f32 %v1557_v11, %v3177_v39  ;;  %v1559_v16 = vpop.f32.mrb[43].mxu1  ;;  %v1465_v51 = vadd.f32 %v1464_v35, %v3175_v36 }
 0x2ad   :  { %v1560_v17 = vadd.f32 %v1559_v16, %v3177_v39  ;;  %v1578_v5 = vmax.f32 %v1463_v20, 0.0 }
 0x2ae   :  { %v1588_v37 = vmax.f32 %v1558_v15, 0.0  ;;  %v1468_v41 = vpop.f32.mrb[42].mxu0  ;;  %v1579_v32 = vmax.f32 %v1465_v51, 0.0 }
 0x2af   :  { %v1589_v62 = vmax.f32 %v1560_v17, 0.0  ;;  %v1469_v7 = vadd.f32 %v1468_v41, %v3177_v39  ;;  %v1470_v12 = vpop.f32.mrb[43].mxu0  ;;  %v1563_v56 = vpop.f32.mrb[44].mxu1 }
 0x2b0   :  { %v2029_v25 = vpack.c.bf16 %v1588_v37, %v1580_v50  ;;  %v1471_v22 = vadd.f32 %v1470_v12, %v3177_v39  ;;  %v1565_v6 = vpop.f32.mrb[45].mxu1  ;;  %v1564_v60 = vadd.f32 %v1563_v56, %v3187_v58 }
 0x2b1   :  { %v2039_v31 = vpack.c.bf16 %v1589_v62, %v1581_v52  ;;  %v1586_v24 = vmax.f32 %v1469_v7, 0.0  ;;  %v1566_v39 = vadd.f32 %v1565_v6, %v3187_v58 }
 0x2b2   :  { %2057 = vst [vmem:[%s3269_s6 + $0x60] sm:$0xff] %v2029_v25   ;;  %v1587_v36 = vmax.f32 %v1471_v22, 0.0  ;;  %v1474_v54 = vpop.f32.mrb[44].mxu0  ;;  %v1596_v46 = vmax.f32 %v1564_v60, 0.0 }
 0x2b3   :  { %2059 = vst [vmem:[%s3269_s6 + $0x70] sm:$0xff] %v2039_v31   ;;  %v2009_v63 = vpack.c.bf16 %v1586_v24, %v1578_v5  ;;  %v1476_v19 = vpop.f32.mrb[45].mxu0  ;;  %v1569_v45 = vpop.f32.mrb[46].mxu1  ;;  %v1475_v48 = vadd.f32 %v1474_v54, %v3187_v58  ;;  %v1597_v2 = vmax.f32 %v1566_v39, 0.0 }
 0x2b4   :  { %v2019_v57 = vpack.c.bf16 %v1587_v36, %v1579_v32  ;;  %v1570_v10 = vadd.f32 %v1569_v45, %v3189_v13  ;;  %v1571_v49 = vpop.f32.mrb[47].mxu1  ;;  %v1477_v38 = vadd.f32 %v1476_v19, %v3187_v58 }
 0x2b5   :  { %2053 = vst [vmem:[%s3269_s6 + $0x40] sm:$0xff] %v2009_v63   ;;  %v1572_v44 = vadd.f32 %v1571_v49, %v3189_v13  ;;  %v1594_v18 = vmax.f32 %v1475_v48, 0.0 }
 0x2b6   :  { %2055 = vst [vmem:[%s3269_s6 + $0x50] sm:$0xff] %v2019_v57   ;;  %v1604_v4 = vmax.f32 %v1570_v10, 0.0  ;;  %v1480_v26 = vpop.f32.mrb[46].mxu0  ;;  %v1595_v30 = vmax.f32 %v1477_v38, 0.0 }
 0x2b7   :  { %v1605_v42 = vmax.f32 %v1572_v44, 0.0  ;;  %v1481_v59 = vadd.f32 %v1480_v26, %v3189_v13  ;;  %v1482_v34 = vpop.f32.mrb[47].mxu0 }
 0x2b8   :  { %v2034_v40 = vpack.c.bf16 %v1604_v4, %v1596_v46  ;;  %v1483_v21 = vadd.f32 %v1482_v34, %v3189_v13 }
 0x2b9   :  { %v2044_v55 = vpack.c.bf16 %v1605_v42, %v1597_v2  ;;  %v1602_v61 = vmax.f32 %v1481_v59, 0.0 }
 0x2ba   :  { %2058 = vst [vmem:[%s3269_s6 + $0x68] sm:$0xff] %v2034_v40   ;;  %v1603_v43 = vmax.f32 %v1483_v21, 0.0 }
 0x2bb   :  { %2060 = vst [vmem:[%s3269_s6 + $0x78] sm:$0xff] %v2044_v55   ;;  %v2014_v58 = vpack.c.bf16 %v1602_v61, %v1594_v18 }
 0x2bc   :  { %v2024_v33 = vpack.c.bf16 %v1603_v43, %v1595_v30 }
 0x2bd   :  { %2054 = vst [vmem:[%s3269_s6 + $0x48] sm:$0xff] %v2014_v58  }
 0x2be   :  { %2056 = vst [vmem:[%s3269_s6 + $0x58] sm:$0xff] %v2024_v33  }
 0x2bf   :  { %1777 = vsyncpa [#allocation3], 1 }

// kernel: control_actor_forward.3
= control target key start
LH: loop header
LB: loop body
LE: loop exit
PB: predicated region body
PF: predicated region fallthrough
CT: control target
= control target key end

     0   :  { %vm3976_vm0 = vcmask 1043456   ;;  %vm3972_vm1 = vcmask 31744   ;;  %vm6395_vm2 = vmmov 0   ;;  %vm4226_vm3 = vcmask 64512   ;;  %s8506_s4 = inlined_call_operand.vmem [shape: bf16[4096,256], index: 4, kind: input, shape index: {}]   ;;  %s8507_s0 = inlined_call_operand.vmem [shape: bf16[8,4096], index: 0, kind: input, shape index: {}]   ;;  %s8508_s7 = inlined_call_operand.vmem [shape: f32[4,128], index: 7, kind: input, shape index: {}]   ;;  %s8509_s1 = inlined_call_operand.vmem [shape: f32[8,4], index: 1, kind: input, shape index: {}]   ;;  %s8510_s6 = inlined_call_operand.vmem [shape: f32[256,128], index: 6, kind: input, shape index: {}]   ;;  %s8511_s5 = inlined_call_operand.vmem [shape: f32[1,256], index: 5, kind: input, shape index: {}]   ;;  %s8512_s9 = inlined_call_operand.vmem [shape: f32[128,8], index: 9, kind: input, shape index: {}]   ;;  %s8513_s8 = inlined_call_operand.vmem [shape: f32[1,128], index: 8, kind: input, shape index: {}]   ;;  %s8514_s12 = inlined_call_operand.vmem [shape: f32[8,64], index: 12, kind: input, shape index: {}]   ;;  %s8515_s2 = inlined_call_operand.vmem [shape: f32[8,8], index: 2, kind: input, shape index: {}]   ;;  %s8516_s11 = inlined_call_operand.vmem [shape: f32[8,64], index: 11, kind: input, shape index: {}]   ;;  %s8517_s10 = inlined_call_operand.vmem [shape: f32[1,8], index: 10, kind: input, shape index: {}]   ;;  %s8518_s15 = inlined_call_operand.vmem [shape: f32[4,128], index: 15, kind: input, shape index: {}]   ;;  %s8519_s14 = inlined_call_operand.vmem [shape: f32[64,128], index: 14, kind: input, shape index: {}]   ;;  %s8520_s13 = inlined_call_operand.vmem [shape: f32[1,64], index: 13, kind: input, shape index: {}]   ;;  %s8521_s17 = inlined_call_operand.vmem [shape: f32[128,2], index: 17, kind: input, shape index: {}]   ;;  %s8522_s3 = inlined_call_operand.vmem [shape: f32[8,2], index: 3, kind: input, shape index: {}]   ;;  %s8523_s19 = inlined_call_operand.vmem [shape: f32[1,2], index: 19, kind: input, shape index: {}]   ;;  %s8524_s16 = inlined_call_operand.vmem [shape: f32[1,128], index: 16, kind: input, shape index: {}]   ;;  %s8525_s21 = inlined_call_operand.vmem [shape: f32[8,1], index: 21, kind: output, shape index: {1}]   ;;  %s8526_s18 = inlined_call_operand.vmem [shape: f32[1,2], index: 18, kind: input, shape index: {}]   ;;  %s8527_s22 = inlined_call_operand.vmem [shape: f32[8,2], index: 22, kind: output, shape index: {2}]   ;;  %s8528_s20 = inlined_call_operand.vmem [shape: f32[8,2], index: 20, kind: output, shape index: {0}]  }
   0x1   :  { %8533 = sst [smem:[#allocation2_spill]] %s8506_s4  ;;  %vm4464_vm4 = vcmask 523264   ;;  %vm4663_vm5 = vcmask 15360   ;;  %vm4669_vm6 = vcmask 7168  }
   0x2   :  { %8534 = sst [smem:[#allocation3_spill]] %s8507_s0  ;;  %s8540_s29 = sld [smem:[#allocation2_spill]] }
   0x3   :  { %8535 = sst [smem:[#allocation4_spill]] %s8508_s7  ;;  %s8541_s25 = sld [smem:[#allocation3_spill]] }
   0x4   :  { %8536 = sst [smem:[#allocation5_spill]] %s8509_s1 }
   0x5   :  { %8537 = sst [smem:[#allocation6_spill]] %s8510_s6  ;;  %s8543_s0 = sld [smem:[#allocation5_spill]] }
   0x6   :  { %8538 = sst [smem:[#allocation7_spill]] %s8511_s5 }
   0x7   :  { %8539 = sst [smem:[#allocation8_spill]] %s8512_s9  ;;  %s8544_s9 = sld [smem:[#allocation6_spill]] }
   0x8   :  { %v5590_v0 = vld [vmem:[%s8540_s29 + $0x4] ss:$8 sps:$4 sm:$0xff]   ;;  %v5594_v2 = vld [vmem:[%s8540_s29] ss:$8 sps:$4 sm:$0xff]   ;;  %v5596_v4 = vld [vmem:[%s8540_s29 + $0x14] ss:$8 sps:$4 sm:$0xff]  }
   0x9   :  { %v5592_v1 = vld [vmem:[%s8540_s29 + $0x704] ss:$8 sps:$4 sm:$0xff]   ;;  %3281 = vmatprep.subr.bf16.mxu1 %v5590_v0  ;;  %v5595_v3 = vld [vmem:[%s8540_s29 + $0x700] ss:$8 sps:$4 sm:$0xff]   ;;  %v5598_v5 = vld [vmem:[%s8540_s29 + $0x714] ss:$8 sps:$4 sm:$0xff]  }
   0xa   :  { %3568 = vmatprep.subr.bf16.mxu0 %v5592_v1  ;;  %3282 = vmatpush1.bf16.msra.mxu1 %v5594_v2  ;;  %v5600_v6 = vld [vmem:[%s8540_s29 + $0x10] ss:$8 sps:$4 sm:$0xff]   ;;  %v5602_v8 = vld [vmem:[%s8540_s29 + $0x24] ss:$8 sps:$4 sm:$0xff]   ;;  %v5606_v10 = vld [vmem:[%s8540_s29 + $0x20] ss:$8 sps:$4 sm:$0xff]  }
   0xb   :  { %3569 = vmatpush1.bf16.msra.mxu0 %v5595_v3  ;;  %3283 = vmatprep.subr.bf16.mxu1 %v5596_v4  ;;  %v5601_v7 = vld [vmem:[%s8540_s29 + $0x710] ss:$8 sps:$4 sm:$0xff]   ;;  %v5604_v9 = vld [vmem:[%s8540_s29 + $0x724] ss:$8 sps:$4 sm:$0xff]   ;;  %v5607_v11 = vld [vmem:[%s8540_s29 + $0x720] ss:$8 sps:$4 sm:$0xff]  }
   0xc   :  { %3570 = vmatprep.subr.bf16.mxu0 %v5598_v5  ;;  %v5608_v12 = vld [vmem:[%s8540_s29 + $0x34] ss:$8 sps:$4 sm:$0xff]   ;;  %v5612_v14 = vld [vmem:[%s8540_s29 + $0x30] ss:$8 sps:$4 sm:$0xff]   ;;  %v5614_v16 = vld [vmem:[%s8540_s29 + $0x44] ss:$8 sps:$4 sm:$0xff]  }
   0xd   :  { %v5610_v13 = vld [vmem:[%s8540_s29 + $0x734] ss:$8 sps:$4 sm:$0xff]   ;;  %v5613_v15 = vld [vmem:[%s8540_s29 + $0x730] ss:$8 sps:$4 sm:$0xff]   ;;  %v5616_v17 = vld [vmem:[%s8540_s29 + $0x744] ss:$8 sps:$4 sm:$0xff]  }
   0xe   :  { %3284 = vmatpush1.bf16.msra.mxu1 %v5600_v6  ;;  %v5618_v18 = vld [vmem:[%s8540_s29 + $0x40] ss:$8 sps:$4 sm:$0xff]   ;;  %v5620_v20 = vld [vmem:[%s8540_s29 + $0x54] ss:$8 sps:$4 sm:$0xff]   ;;  %v5624_v22 = vld [vmem:[%s8540_s29 + $0x50] ss:$8 sps:$4 sm:$0xff]  }
   0xf   :  { %3571 = vmatpush1.bf16.msra.mxu0 %v5601_v7  ;;  %3285 = vmatprep.subr.bf16.mxu1 %v5602_v8  ;;  %v5619_v19 = vld [vmem:[%s8540_s29 + $0x740] ss:$8 sps:$4 sm:$0xff]   ;;  %v5622_v21 = vld [vmem:[%s8540_s29 + $0x754] ss:$8 sps:$4 sm:$0xff]   ;;  %v5625_v23 = vld [vmem:[%s8540_s29 + $0x750] ss:$8 sps:$4 sm:$0xff]  }
  0x10   :  { %3572 = vmatprep.subr.bf16.mxu0 %v5604_v9  ;;  %v5626_v24 = vld [vmem:[%s8540_s29 + $0x64] ss:$8 sps:$4 sm:$0xff]   ;;  %v5630_v26 = vld [vmem:[%s8540_s29 + $0x60] ss:$8 sps:$4 sm:$0xff]   ;;  %v5632_v28 = vld [vmem:[%s8540_s29 + $0x74] ss:$8 sps:$4 sm:$0xff]  }
  0x11   :  { %v5628_v25 = vld [vmem:[%s8540_s29 + $0x764] ss:$8 sps:$4 sm:$0xff]   ;;  %v5631_v27 = vld [vmem:[%s8540_s29 + $0x760] ss:$8 sps:$4 sm:$0xff]   ;;  %v5634_v29 = vld [vmem:[%s8540_s29 + $0x774] ss:$8 sps:$4 sm:$0xff]  }
  0x12   :  { %3286 = vmatpush1.bf16.msra.mxu1 %v5606_v10  ;;  %v5636_v30 = vld [vmem:[%s8540_s29 + $0x70] ss:$8 sps:$4 sm:$0xff]   ;;  %v5638_v32 = vld [vmem:[%s8540_s29 + $0x84] ss:$8 sps:$4 sm:$0xff]   ;;  %v5642_v34 = vld [vmem:[%s8540_s29 + $0x80] ss:$8 sps:$4 sm:$0xff]  }
  0x13   :  { %3573 = vmatpush1.bf16.msra.mxu0 %v5607_v11  ;;  %3287 = vmatprep.subr.bf16.mxu1 %v5608_v12  ;;  %v5637_v31 = vld [vmem:[%s8540_s29 + $0x770] ss:$8 sps:$4 sm:$0xff]   ;;  %v5640_v33 = vld [vmem:[%s8540_s29 + $0x784] ss:$8 sps:$4 sm:$0xff]   ;;  %v5643_v35 = vld [vmem:[%s8540_s29 + $0x780] ss:$8 sps:$4 sm:$0xff]  }
  0x14   :  { %3574 = vmatprep.subr.bf16.mxu0 %v5610_v13  ;;  %v5644_v36 = vld [vmem:[%s8540_s29 + $0x94] ss:$8 sps:$4 sm:$0xff]   ;;  %v5648_v38 = vld [vmem:[%s8540_s29 + $0x90] ss:$8 sps:$4 sm:$0xff]   ;;  %v5650_v40 = vld [vmem:[%s8540_s29 + $0xa4] ss:$8 sps:$4 sm:$0xff]  }
  0x15   :  { %v5646_v37 = vld [vmem:[%s8540_s29 + $0x794] ss:$8 sps:$4 sm:$0xff]   ;;  %v5649_v39 = vld [vmem:[%s8540_s29 + $0x790] ss:$8 sps:$4 sm:$0xff]   ;;  %v5652_v41 = vld [vmem:[%s8540_s29 + $0x7a4] ss:$8 sps:$4 sm:$0xff]  }
  0x16   :  { %3288 = vmatpush1.bf16.msra.mxu1 %v5612_v14  ;;  %v5654_v42 = vld [vmem:[%s8540_s29 + $0xa0] ss:$8 sps:$4 sm:$0xff]   ;;  %v5656_v44 = vld [vmem:[%s8540_s29 + $0xb4] ss:$8 sps:$4 sm:$0xff]   ;;  %v5660_v47 = vld [vmem:[%s8540_s29 + $0xb0] ss:$8 sps:$4 sm:$0xff]  }
  0x17   :  { %3575 = vmatpush1.bf16.msra.mxu0 %v5613_v15  ;;  %3289 = vmatprep.subr.bf16.mxu1 %v5614_v16  ;;  %v5655_v43 = vld [vmem:[%s8540_s29 + $0x7a0] ss:$8 sps:$4 sm:$0xff]   ;;  %v5658_v45 = vld [vmem:[%s8540_s29 + $0x7b4] ss:$8 sps:$4 sm:$0xff]   ;;  %v5661_v49 = vld [vmem:[%s8540_s29 + $0x7b0] ss:$8 sps:$4 sm:$0xff]  }
  0x18   :  { %3576 = vmatprep.subr.bf16.mxu0 %v5616_v17  ;;  %v69_v46 = vld [vmem:[%s8541_s25] sm:$0xff]  ;;  %v76_v50 = vld [vmem:[%s8541_s25 + $0x38] sm:$0xff]  ;;  %s8545_s28 = sld [smem:[#allocation7_spill]]  ;;  %s8546_s6 = sld [smem:[#allocation8_spill]] }
  0x19   :  { %v4684_v48 = vcombine.high %v69_v46, %v69_v46  ;;  %v5662_v51 = vld [vmem:[%s8540_s29 + $0xc4] ss:$8 sps:$4 sm:$0xff]   ;;  %v4698_v53 = vcombine.high %v76_v50, %v76_v50  ;;  %v5666_v54 = vld [vmem:[%s8540_s29 + $0xc0] ss:$8 sps:$4 sm:$0xff]   ;;  %v5668_v56 = vld [vmem:[%s8540_s29 + $0xd4] ss:$8 sps:$4 sm:$0xff]   ;;  %v4683_v6 = vcombine.low %v69_v46, %v69_v46  ;;  %v4697_v7 = vcombine.low %v76_v50, %v76_v50 }
  0x1a   :  { %3290 = vmatpush1.bf16.msra.mxu1 %v5618_v18  ;;  %v5664_v52 = vld [vmem:[%s8540_s29 + $0x7c4] ss:$8 sps:$4 sm:$0xff]   ;;  %v5667_v55 = vld [vmem:[%s8540_s29 + $0x7c0] ss:$8 sps:$4 sm:$0xff]   ;;  %v5670_v57 = vld [vmem:[%s8540_s29 + $0x7d4] ss:$8 sps:$4 sm:$0xff]  }
  0x1b   :  { %3577 = vmatpush1.bf16.msra.mxu0 %v5619_v19  ;;  %3291 = vmatprep.subr.bf16.mxu1 %v5620_v20  ;;  %v5672_v58 = vld [vmem:[%s8540_s29 + $0xd0] ss:$8 sps:$4 sm:$0xff]   ;;  %v5674_v60 = vld [vmem:[%s8540_s29 + $0xe4] ss:$8 sps:$4 sm:$0xff]   ;;  %v5678_v62 = vld [vmem:[%s8540_s29 + $0xe0] ss:$8 sps:$4 sm:$0xff]  }
  0x1c   :  { %3578 = vmatprep.subr.bf16.mxu0 %v5622_v21  ;;  %3313 = vmatprep.mubr.bf16.mxu1 %v4684_v48  ;;  %v5673_v59 = vld [vmem:[%s8540_s29 + $0x7d0] ss:$8 sps:$4 sm:$0xff]   ;;  %v5676_v61 = vld [vmem:[%s8540_s29 + $0x7e4] ss:$8 sps:$4 sm:$0xff]   ;;  %v5679_v63 = vld [vmem:[%s8540_s29 + $0x7e0] ss:$8 sps:$4 sm:$0xff]  }
  0x1d   :  { %3600 = vmatprep.mubr.bf16.mxu0 %v4698_v53  ;;  %v5680_v0 = vld [vmem:[%s8540_s29 + $0xf4] ss:$8 sps:$4 sm:$0xff]   ;;  %v5684_v2 = vld [vmem:[%s8540_s29 + $0xf0] ss:$8 sps:$4 sm:$0xff]   ;;  %v5690_v4 = vld [vmem:[%s8540_s29 + $0x104] ss:$8 sps:$4 sm:$0xff]  }
  0x1e   :  { %3292 = vmatpush1.bf16.msra.mxu1 %v5624_v22  ;;  %v5682_v1 = vld [vmem:[%s8540_s29 + $0x7f4] ss:$8 sps:$4 sm:$0xff]   ;;  %v5685_v3 = vld [vmem:[%s8540_s29 + $0x7f0] ss:$8 sps:$4 sm:$0xff]   ;;  %v5695_v5 = vld [vmem:[%s8540_s29 + $0x804] ss:$8 sps:$4 sm:$0xff]  }
  0x1f   :  { %3579 = vmatpush1.bf16.msra.mxu0 %v5625_v23  ;;  %3293 = vmatprep.subr.bf16.mxu1 %v5626_v24  ;;  %v5688_v8 = vld [vmem:[%s8540_s29 + $0x100] ss:$8 sps:$4 sm:$0xff]   ;;  %v5698_v10 = vld [vmem:[%s8540_s29 + $0x114] ss:$8 sps:$4 sm:$0xff]   ;;  %v5696_v12 = vld [vmem:[%s8540_s29 + $0x110] ss:$8 sps:$4 sm:$0xff]  }
  0x20   :  { %3580 = vmatprep.subr.bf16.mxu0 %v5628_v25  ;;  %v5693_v9 = vld [vmem:[%s8540_s29 + $0x800] ss:$8 sps:$4 sm:$0xff]   ;;  %v5701_v11 = vld [vmem:[%s8540_s29 + $0x814] ss:$8 sps:$4 sm:$0xff]   ;;  %v5699_v13 = vld [vmem:[%s8540_s29 + $0x810] ss:$8 sps:$4 sm:$0xff]  }
  0x21   :  { %v5704_v14 = vld [vmem:[%s8540_s29 + $0x124] ss:$8 sps:$4 sm:$0xff]   ;;  %v5702_v16 = vld [vmem:[%s8540_s29 + $0x120] ss:$8 sps:$4 sm:$0xff]   ;;  %v5710_v18 = vld [vmem:[%s8540_s29 + $0x134] ss:$8 sps:$4 sm:$0xff]  }
  0x22   :  { %3294 = vmatpush1.bf16.msra.mxu1 %v5630_v26  ;;  %v5707_v15 = vld [vmem:[%s8540_s29 + $0x824] ss:$8 sps:$4 sm:$0xff]   ;;  %v5705_v17 = vld [vmem:[%s8540_s29 + $0x820] ss:$8 sps:$4 sm:$0xff]   ;;  %v5713_v19 = vld [vmem:[%s8540_s29 + $0x834] ss:$8 sps:$4 sm:$0xff]  }
  0x23   :  { %3581 = vmatpush1.bf16.msra.mxu0 %v5631_v27  ;;  %3295 = vmatprep.subr.bf16.mxu1 %v5632_v28  ;;  %v5708_v20 = vld [vmem:[%s8540_s29 + $0x130] ss:$8 sps:$4 sm:$0xff]   ;;  %v5716_v22 = vld [vmem:[%s8540_s29 + $0x144] ss:$8 sps:$4 sm:$0xff]   ;;  %v5714_v24 = vld [vmem:[%s8540_s29 + $0x140] ss:$8 sps:$4 sm:$0xff]  }
  0x24   :  { %3582 = vmatprep.subr.bf16.mxu0 %v5634_v29  ;;  %v5711_v21 = vld [vmem:[%s8540_s29 + $0x830] ss:$8 sps:$4 sm:$0xff]   ;;  %v5719_v23 = vld [vmem:[%s8540_s29 + $0x844] ss:$8 sps:$4 sm:$0xff]   ;;  %v5717_v25 = vld [vmem:[%s8540_s29 + $0x840] ss:$8 sps:$4 sm:$0xff]  }
  0x25   :  { %v5722_v26 = vld [vmem:[%s8540_s29 + $0x154] ss:$8 sps:$4 sm:$0xff]   ;;  %v5720_v28 = vld [vmem:[%s8540_s29 + $0x150] ss:$8 sps:$4 sm:$0xff]   ;;  %v5752_v50 = vld [vmem:[%s8540_s29 + $0x1a4] ss:$8 sps:$4 sm:$0xff]  }
  0x26   :  { %3296 = vmatpush1.bf16.msra.mxu1 %v5636_v30  ;;  %v5725_v27 = vld [vmem:[%s8540_s29 + $0x854] ss:$8 sps:$4 sm:$0xff]   ;;  %v5723_v29 = vld [vmem:[%s8540_s29 + $0x850] ss:$8 sps:$4 sm:$0xff]   ;;  %v5728_v30 = vld [vmem:[%s8540_s29 + $0x164] ss:$8 sps:$4 sm:$0xff]  }
  0x27   :  { %3583 = vmatpush1.bf16.msra.mxu0 %v5637_v31  ;;  %3297 = vmatprep.subr.bf16.mxu1 %v5638_v32  ;;  %v5731_v31 = vld [vmem:[%s8540_s29 + $0x864] ss:$8 sps:$4 sm:$0xff]   ;;  %v5746_v46 = vld [vmem:[%s8540_s29 + $0x194] ss:$8 sps:$4 sm:$0xff]   ;;  %v5744_v48 = vld [vmem:[%s8540_s29 + $0x190] ss:$8 sps:$4 sm:$0xff]  }
  0x28   :  { %3584 = vmatprep.subr.bf16.mxu0 %v5640_v33  ;;  %v6791_v32 = vld [vmem:[%s8541_s25 + $0x8] sm:$0xff] }
  0x29   :  { %v5726_v33 = vld [vmem:[%s8540_s29 + $0x160] ss:$8 sps:$4 sm:$0xff]  }
  0x2a   :  { %3298 = vmatpush1.bf16.msra.mxu1 %v5642_v34  ;;  %v5729_v34 = vld [vmem:[%s8540_s29 + $0x860] ss:$8 sps:$4 sm:$0xff]  }
  0x2b   :  { %3585 = vmatpush1.bf16.msra.mxu0 %v5643_v35  ;;  %3299 = vmatprep.subr.bf16.mxu1 %v5644_v36  ;;  %v4686_v35 = vcombine.high %v6791_v32, %v6791_v32  ;;  %v6804_v36 = vld [vmem:[%s8541_s25 + $0x40] sm:$0xff] }
  0x2c   :  { %3586 = vmatprep.subr.bf16.mxu0 %v5646_v37  ;;  %v5734_v37 = vld [vmem:[%s8540_s29 + $0x174] ss:$8 sps:$4 sm:$0xff]   ;;  %v5753_v53 = vld [vmem:[%s8540_s29 + $0x8a0] ss:$8 sps:$4 sm:$0xff]  }
  0x2e   :  { %3300 = vmatpush1.bf16.msra.mxu1 %v5648_v38  ;;  %v4700_v38 = vcombine.high %v6804_v36, %v6804_v36 }
  0x2f   :  { %3587 = vmatpush1.bf16.msra.mxu0 %v5649_v39  ;;  %3301 = vmatprep.subr.bf16.mxu1 %v5650_v40  ;;  %v5737_v39 = vld [vmem:[%s8540_s29 + $0x874] ss:$8 sps:$4 sm:$0xff]   ;;  %v5732_v40 = vld [vmem:[%s8540_s29 + $0x170] ss:$8 sps:$4 sm:$0xff]  }
  0x30   :  { %3588 = vmatprep.subr.bf16.mxu0 %v5652_v41  ;;  %v5735_v41 = vld [vmem:[%s8540_s29 + $0x870] ss:$8 sps:$4 sm:$0xff]  }
  0x32   :  { %3302 = vmatpush1.bf16.msra.mxu1 %v5654_v42  ;;  %v5740_v42 = vld [vmem:[%s8540_s29 + $0x184] ss:$8 sps:$4 sm:$0xff]  }
  0x33   :  { %3589 = vmatpush1.bf16.msra.mxu0 %v5655_v43  ;;  %3303 = vmatprep.subr.bf16.mxu1 %v5656_v44  ;;  %v5743_v43 = vld [vmem:[%s8540_s29 + $0x884] ss:$8 sps:$4 sm:$0xff]   ;;  %v5738_v44 = vld [vmem:[%s8540_s29 + $0x180] ss:$8 sps:$4 sm:$0xff]  }
  0x34   :  { %3590 = vmatprep.subr.bf16.mxu0 %v5658_v45  ;;  %v5741_v45 = vld [vmem:[%s8540_s29 + $0x880] ss:$8 sps:$4 sm:$0xff]  }
  0x36   :  { %3304 = vmatpush1.bf16.msra.mxu1 %v5660_v47  ;;  %v5749_v47 = vld [vmem:[%s8540_s29 + $0x894] ss:$8 sps:$4 sm:$0xff]  }
  0x37   :  { %3591 = vmatpush1.bf16.msra.mxu0 %v5661_v49  ;;  %3305 = vmatprep.subr.bf16.mxu1 %v5662_v51  ;;  %v5747_v49 = vld [vmem:[%s8540_s29 + $0x890] ss:$8 sps:$4 sm:$0xff]   ;;  %v5755_v51 = vld [vmem:[%s8540_s29 + $0x8a4] ss:$8 sps:$4 sm:$0xff]  }
  0x38   :  { %3592 = vmatprep.subr.bf16.mxu0 %v5664_v52  ;;  %v5750_v52 = vld [vmem:[%s8540_s29 + $0x1a0] ss:$8 sps:$4 sm:$0xff]  }
  0x3a   :  { %3306 = vmatpush1.bf16.msra.mxu1 %v5666_v54  ;;  %v5758_v54 = vld [vmem:[%s8540_s29 + $0x1b4] ss:$8 sps:$4 sm:$0xff]  }
  0x3b   :  { %3593 = vmatpush1.bf16.msra.mxu0 %v5667_v55  ;;  %3307 = vmatprep.subr.bf16.mxu1 %v5668_v56  ;;  %v5761_v55 = vld [vmem:[%s8540_s29 + $0x8b4] ss:$8 sps:$4 sm:$0xff]   ;;  %v5756_v56 = vld [vmem:[%s8540_s29 + $0x1b0] ss:$8 sps:$4 sm:$0xff]  }
  0x3c   :  { %3594 = vmatprep.subr.bf16.mxu0 %v5670_v57  ;;  %v5759_v57 = vld [vmem:[%s8540_s29 + $0x8b0] ss:$8 sps:$4 sm:$0xff]  }
  0x3e   :  { %3308 = vmatpush1.bf16.msra.mxu1 %v5672_v58  ;;  %v5764_v58 = vld [vmem:[%s8540_s29 + $0x1c4] ss:$8 sps:$4 sm:$0xff]  }
  0x3f   :  { %3595 = vmatpush1.bf16.msra.mxu0 %v5673_v59  ;;  %3309 = vmatprep.subr.bf16.mxu1 %v5674_v60  ;;  %v5767_v59 = vld [vmem:[%s8540_s29 + $0x8c4] ss:$8 sps:$4 sm:$0xff]   ;;  %v5762_v60 = vld [vmem:[%s8540_s29 + $0x1c0] ss:$8 sps:$4 sm:$0xff]  }
  0x40   :  { %3596 = vmatprep.subr.bf16.mxu0 %v5676_v61  ;;  %v5765_v61 = vld [vmem:[%s8540_s29 + $0x8c0] ss:$8 sps:$4 sm:$0xff]  }
  0x42   :  { %3310 = vmatpush1.bf16.msra.mxu1 %v5678_v62  ;;  %v5770_v62 = vld [vmem:[%s8540_s29 + $0x1d4] ss:$8 sps:$4 sm:$0xff]  }
  0x43   :  { %3597 = vmatpush1.bf16.msra.mxu0 %v5679_v63  ;;  %3311 = vmatprep.subr.bf16.mxu1 %v5680_v0  ;;  %v5773_v63 = vld [vmem:[%s8540_s29 + $0x8d4] ss:$8 sps:$4 sm:$0xff]   ;;  %v5768_v0 = vld [vmem:[%s8540_s29 + $0x1d0] ss:$8 sps:$4 sm:$0xff]  }
  0x44   :  { %3598 = vmatprep.subr.bf16.mxu0 %v5682_v1  ;;  %v5771_v1 = vld [vmem:[%s8540_s29 + $0x8d0] ss:$8 sps:$4 sm:$0xff]  }
  0x46   :  { %3312 = vmatpush1.bf16.msra.mxu1 %v5684_v2  ;;  %v5776_v2 = vld [vmem:[%s8540_s29 + $0x1e4] ss:$8 sps:$4 sm:$0xff]  }
  0x47   :  { %3599 = vmatpush1.bf16.msra.mxu0 %v5685_v3  ;;  %3322 = vmatprep.subr.bf16.mxu1 %v5690_v4  ;;  %v5779_v3 = vld [vmem:[%s8540_s29 + $0x8e4] ss:$8 sps:$4 sm:$0xff]   ;;  %v5774_v4 = vld [vmem:[%s8540_s29 + $0x1e0] ss:$8 sps:$4 sm:$0xff]  }
  0x48   :  { %3609 = vmatprep.subr.bf16.mxu0 %v5695_v5  ;;  %v5777_v5 = vld [vmem:[%s8540_s29 + $0x8e0] ss:$8 sps:$4 sm:$0xff]  }
  0x49   :  { %3314 = vmatmul.mubr.bf16.vlgmr.msra.gmra.mrb[0].mxu1 %v4683_v6  ;;  %v5782_v6 = vld [vmem:[%s8540_s29 + $0x1f4] ss:$8 sps:$4 sm:$0xff]  }
  0x4a   :  { %3601 = vmatmul.mubr.bf16.vlgmr.msra.gmra.mrb[0].mxu0 %v4697_v7  ;;  %3323 = vmatpush1.bf16.msra.mxu1 %v5688_v8  ;;  %v5785_v7 = vld [vmem:[%s8540_s29 + $0x8f4] ss:$8 sps:$4 sm:$0xff]   ;;  %v5780_v8 = vld [vmem:[%s8540_s29 + $0x1f0] ss:$8 sps:$4 sm:$0xff]  }
  0x4b   :  { %3610 = vmatpush1.bf16.msra.mxu0 %v5693_v9  ;;  %3324 = vmatprep.subr.bf16.mxu1 %v5698_v10  ;;  %v5783_v9 = vld [vmem:[%s8540_s29 + $0x8f0] ss:$8 sps:$4 sm:$0xff]   ;;  %v5790_v10 = vld [vmem:[%s8540_s29 + $0x204] ss:$8 sps:$4 sm:$0xff]  }
  0x4c   :  { %3611 = vmatprep.subr.bf16.mxu0 %v5701_v11  ;;  %3354 = vmatprep.mubr.bf16.mxu1 %v4686_v35  ;;  %v5795_v11 = vld [vmem:[%s8540_s29 + $0x904] ss:$8 sps:$4 sm:$0xff]   ;;  %v5817_v35 = vld [vmem:[%s8540_s29 + $0x940] ss:$8 sps:$4 sm:$0xff]  }
  0x4d   :  { %3641 = vmatprep.mubr.bf16.mxu0 %v4700_v38  ;;  %v5820_v38 = vld [vmem:[%s8540_s29 + $0x250] ss:$8 sps:$4 sm:$0xff]  }
  0x4e   :  { %3325 = vmatpush1.bf16.msra.mxu1 %v5696_v12  ;;  %v4685_v12 = vcombine.low %v6791_v32, %v6791_v32  ;;  %v5816_v32 = vld [vmem:[%s8540_s29 + $0x244] ss:$8 sps:$4 sm:$0xff]  }
  0x4f   :  { %3612 = vmatpush1.bf16.msra.mxu0 %v5699_v13  ;;  %3326 = vmatprep.subr.bf16.mxu1 %v5704_v14  ;;  %v5788_v13 = vld [vmem:[%s8540_s29 + $0x200] ss:$8 sps:$4 sm:$0xff]   ;;  %v4699_v14 = vcombine.low %v6804_v36, %v6804_v36  ;;  %v5822_v36 = vld [vmem:[%s8540_s29 + $0x254] ss:$8 sps:$4 sm:$0xff]  }
  0x50   :  { %3613 = vmatprep.subr.bf16.mxu0 %v5707_v15  ;;  %v5793_v15 = vld [vmem:[%s8540_s29 + $0x900] ss:$8 sps:$4 sm:$0xff]  }
  0x52   :  { %3327 = vmatpush1.bf16.msra.mxu1 %v5702_v16  ;;  %v5798_v16 = vld [vmem:[%s8540_s29 + $0x214] ss:$8 sps:$4 sm:$0xff]  }
  0x53   :  { %3614 = vmatpush1.bf16.msra.mxu0 %v5705_v17  ;;  %3328 = vmatprep.subr.bf16.mxu1 %v5710_v18  ;;  %v5801_v17 = vld [vmem:[%s8540_s29 + $0x914] ss:$8 sps:$4 sm:$0xff]  }
  0x54   :  { %3615 = vmatprep.subr.bf16.mxu0 %v5713_v19  ;;  %v6941_v18 = vld [vmem:[%s8541_s25 + $0x10] sm:$0xff] }
  0x55   :  { %v4688_v19 = vcombine.high %v6941_v18, %v6941_v18 }
  0x56   :  { %3329 = vmatpush1.bf16.msra.mxu1 %v5708_v20  ;;  %v6948_v20 = vld [vmem:[%s8541_s25 + $0x48] sm:$0xff] }
  0x57   :  { %3616 = vmatpush1.bf16.msra.mxu0 %v5711_v21  ;;  %3330 = vmatprep.subr.bf16.mxu1 %v5716_v22  ;;  %v5796_v21 = vld [vmem:[%s8540_s29 + $0x210] ss:$8 sps:$4 sm:$0xff]  }
  0x58   :  { %3617 = vmatprep.subr.bf16.mxu0 %v5719_v23  ;;  %v5799_v22 = vld [vmem:[%s8540_s29 + $0x910] ss:$8 sps:$4 sm:$0xff]   ;;  %v4702_v23 = vcombine.high %v6948_v20, %v6948_v20 }
  0x5a   :  { %3331 = vmatpush1.bf16.msra.mxu1 %v5714_v24  ;;  %v5804_v24 = vld [vmem:[%s8540_s29 + $0x224] ss:$8 sps:$4 sm:$0xff]  }
  0x5b   :  { %3618 = vmatpush1.bf16.msra.mxu0 %v5717_v25  ;;  %3332 = vmatprep.subr.bf16.mxu1 %v5722_v26  ;;  %v5807_v25 = vld [vmem:[%s8540_s29 + $0x924] ss:$8 sps:$4 sm:$0xff]   ;;  %v5802_v26 = vld [vmem:[%s8540_s29 + $0x220] ss:$8 sps:$4 sm:$0xff]  }
  0x5c   :  { %3619 = vmatprep.subr.bf16.mxu0 %v5725_v27  ;;  %v5805_v27 = vld [vmem:[%s8540_s29 + $0x920] ss:$8 sps:$4 sm:$0xff]  }
  0x5e   :  { %3333 = vmatpush1.bf16.msra.mxu1 %v5720_v28  ;;  %v5810_v28 = vld [vmem:[%s8540_s29 + $0x234] ss:$8 sps:$4 sm:$0xff]  }
  0x5f   :  { %3620 = vmatpush1.bf16.msra.mxu0 %v5723_v29  ;;  %3334 = vmatprep.subr.bf16.mxu1 %v5728_v30  ;;  %v5813_v29 = vld [vmem:[%s8540_s29 + $0x934] ss:$8 sps:$4 sm:$0xff]   ;;  %v5808_v30 = vld [vmem:[%s8540_s29 + $0x230] ss:$8 sps:$4 sm:$0xff]  }
  0x60   :  { %3621 = vmatprep.subr.bf16.mxu0 %v5731_v31  ;;  %v5811_v31 = vld [vmem:[%s8540_s29 + $0x930] ss:$8 sps:$4 sm:$0xff]  }
  0x62   :  { %3335 = vmatpush1.bf16.msra.mxu1 %v5726_v33  ;;  %v5819_v33 = vld [vmem:[%s8540_s29 + $0x944] ss:$8 sps:$4 sm:$0xff]  }
  0x63   :  { %3622 = vmatpush1.bf16.msra.mxu0 %v5729_v34  ;;  %3336 = vmatprep.subr.bf16.mxu1 %v5734_v37  ;;  %v5814_v34 = vld [vmem:[%s8540_s29 + $0x240] ss:$8 sps:$4 sm:$0xff]   ;;  %v5825_v37 = vld [vmem:[%s8540_s29 + $0x954] ss:$8 sps:$4 sm:$0xff]  }
  0x64   :  { %3623 = vmatprep.subr.bf16.mxu0 %v5737_v39  ;;  %v5823_v39 = vld [vmem:[%s8540_s29 + $0x950] ss:$8 sps:$4 sm:$0xff]  }
  0x66   :  { %3337 = vmatpush1.bf16.msra.mxu1 %v5732_v40  ;;  %v5828_v40 = vld [vmem:[%s8540_s29 + $0x264] ss:$8 sps:$4 sm:$0xff]  }
  0x67   :  { %3624 = vmatpush1.bf16.msra.mxu0 %v5735_v41  ;;  %3338 = vmatprep.subr.bf16.mxu1 %v5740_v42  ;;  %v5831_v41 = vld [vmem:[%s8540_s29 + $0x964] ss:$8 sps:$4 sm:$0xff]   ;;  %v5826_v42 = vld [vmem:[%s8540_s29 + $0x260] ss:$8 sps:$4 sm:$0xff]  }
  0x68   :  { %3625 = vmatprep.subr.bf16.mxu0 %v5743_v43  ;;  %v5829_v43 = vld [vmem:[%s8540_s29 + $0x960] ss:$8 sps:$4 sm:$0xff]  }
  0x6a   :  { %3339 = vmatpush1.bf16.msra.mxu1 %v5738_v44  ;;  %v5834_v44 = vld [vmem:[%s8540_s29 + $0x274] ss:$8 sps:$4 sm:$0xff]  }
  0x6b   :  { %3626 = vmatpush1.bf16.msra.mxu0 %v5741_v45  ;;  %3340 = vmatprep.subr.bf16.mxu1 %v5746_v46  ;;  %v5837_v45 = vld [vmem:[%s8540_s29 + $0x974] ss:$8 sps:$4 sm:$0xff]   ;;  %v5832_v46 = vld [vmem:[%s8540_s29 + $0x270] ss:$8 sps:$4 sm:$0xff]  }
  0x6c   :  { %3627 = vmatprep.subr.bf16.mxu0 %v5749_v47  ;;  %v5835_v47 = vld [vmem:[%s8540_s29 + $0x970] ss:$8 sps:$4 sm:$0xff]  }
  0x6e   :  { %3341 = vmatpush1.bf16.msra.mxu1 %v5744_v48  ;;  %v5840_v48 = vld [vmem:[%s8540_s29 + $0x284] ss:$8 sps:$4 sm:$0xff]  }
  0x6f   :  { %3628 = vmatpush1.bf16.msra.mxu0 %v5747_v49  ;;  %3342 = vmatprep.subr.bf16.mxu1 %v5752_v50  ;;  %v5843_v49 = vld [vmem:[%s8540_s29 + $0x984] ss:$8 sps:$4 sm:$0xff]   ;;  %v5838_v50 = vld [vmem:[%s8540_s29 + $0x280] ss:$8 sps:$4 sm:$0xff]  }
  0x70   :  { %3629 = vmatprep.subr.bf16.mxu0 %v5755_v51  ;;  %v5841_v51 = vld [vmem:[%s8540_s29 + $0x980] ss:$8 sps:$4 sm:$0xff]  }
  0x72   :  { %3343 = vmatpush1.bf16.msra.mxu1 %v5750_v52  ;;  %v5846_v52 = vld [vmem:[%s8540_s29 + $0x294] ss:$8 sps:$4 sm:$0xff]  }
  0x73   :  { %3630 = vmatpush1.bf16.msra.mxu0 %v5753_v53  ;;  %3344 = vmatprep.subr.bf16.mxu1 %v5758_v54  ;;  %v5849_v53 = vld [vmem:[%s8540_s29 + $0x994] ss:$8 sps:$4 sm:$0xff]   ;;  %v5844_v54 = vld [vmem:[%s8540_s29 + $0x290] ss:$8 sps:$4 sm:$0xff]  }
  0x74   :  { %3631 = vmatprep.subr.bf16.mxu0 %v5761_v55  ;;  %v5847_v55 = vld [vmem:[%s8540_s29 + $0x990] ss:$8 sps:$4 sm:$0xff]  }
  0x76   :  { %3345 = vmatpush1.bf16.msra.mxu1 %v5756_v56  ;;  %v5852_v56 = vld [vmem:[%s8540_s29 + $0x2a4] ss:$8 sps:$4 sm:$0xff]  }
  0x77   :  { %3632 = vmatpush1.bf16.msra.mxu0 %v5759_v57  ;;  %3346 = vmatprep.subr.bf16.mxu1 %v5764_v58  ;;  %v5855_v57 = vld [vmem:[%s8540_s29 + $0x9a4] ss:$8 sps:$4 sm:$0xff]   ;;  %v5850_v58 = vld [vmem:[%s8540_s29 + $0x2a0] ss:$8 sps:$4 sm:$0xff]  }
  0x78   :  { %3633 = vmatprep.subr.bf16.mxu0 %v5767_v59  ;;  %v5853_v59 = vld [vmem:[%s8540_s29 + $0x9a0] ss:$8 sps:$4 sm:$0xff]  }
  0x7a   :  { %3347 = vmatpush1.bf16.msra.mxu1 %v5762_v60  ;;  %v5858_v60 = vld [vmem:[%s8540_s29 + $0x2b4] ss:$8 sps:$4 sm:$0xff]  }
  0x7b   :  { %3634 = vmatpush1.bf16.msra.mxu0 %v5765_v61  ;;  %3348 = vmatprep.subr.bf16.mxu1 %v5770_v62  ;;  %v5861_v61 = vld [vmem:[%s8540_s29 + $0x9b4] ss:$8 sps:$4 sm:$0xff]   ;;  %v5856_v62 = vld [vmem:[%s8540_s29 + $0x2b0] ss:$8 sps:$4 sm:$0xff]  }
  0x7c   :  { %3635 = vmatprep.subr.bf16.mxu0 %v5773_v63  ;;  %v5859_v63 = vld [vmem:[%s8540_s29 + $0x9b0] ss:$8 sps:$4 sm:$0xff]  }
  0x7e   :  { %3349 = vmatpush1.bf16.msra.mxu1 %v5768_v0  ;;  %v5864_v0 = vld [vmem:[%s8540_s29 + $0x2c4] ss:$8 sps:$4 sm:$0xff]  }
  0x7f   :  { %3636 = vmatpush1.bf16.msra.mxu0 %v5771_v1  ;;  %3350 = vmatprep.subr.bf16.mxu1 %v5776_v2  ;;  %v5867_v1 = vld [vmem:[%s8540_s29 + $0x9c4] ss:$8 sps:$4 sm:$0xff]   ;;  %v5862_v2 = vld [vmem:[%s8540_s29 + $0x2c0] ss:$8 sps:$4 sm:$0xff]  }
  0x80   :  { %3637 = vmatprep.subr.bf16.mxu0 %v5779_v3  ;;  %v5865_v3 = vld [vmem:[%s8540_s29 + $0x9c0] ss:$8 sps:$4 sm:$0xff]  }
  0x82   :  { %3351 = vmatpush1.bf16.msra.mxu1 %v5774_v4  ;;  %v5870_v4 = vld [vmem:[%s8540_s29 + $0x2d4] ss:$8 sps:$4 sm:$0xff]  }
  0x83   :  { %3638 = vmatpush1.bf16.msra.mxu0 %v5777_v5  ;;  %3352 = vmatprep.subr.bf16.mxu1 %v5782_v6  ;;  %v5873_v5 = vld [vmem:[%s8540_s29 + $0x9d4] ss:$8 sps:$4 sm:$0xff]   ;;  %v5868_v6 = vld [vmem:[%s8540_s29 + $0x2d0] ss:$8 sps:$4 sm:$0xff]  }
  0x84   :  { %3639 = vmatprep.subr.bf16.mxu0 %v5785_v7  ;;  %v5871_v7 = vld [vmem:[%s8540_s29 + $0x9d0] ss:$8 sps:$4 sm:$0xff]  }
  0x86   :  { %3353 = vmatpush1.bf16.msra.mxu1 %v5780_v8  ;;  %v5876_v8 = vld [vmem:[%s8540_s29 + $0x2e4] ss:$8 sps:$4 sm:$0xff]  }
  0x87   :  { %3640 = vmatpush1.bf16.msra.mxu0 %v5783_v9  ;;  %3363 = vmatprep.subr.bf16.mxu1 %v5790_v10  ;;  %v5879_v9 = vld [vmem:[%s8540_s29 + $0x9e4] ss:$8 sps:$4 sm:$0xff]   ;;  %v5874_v10 = vld [vmem:[%s8540_s29 + $0x2e0] ss:$8 sps:$4 sm:$0xff]  }
  0x88   :  { %3650 = vmatprep.subr.bf16.mxu0 %v5795_v11  ;;  %v5877_v11 = vld [vmem:[%s8540_s29 + $0x9e0] ss:$8 sps:$4 sm:$0xff]  }
  0x89   :  { %3355 = vmatmul.mubr.bf16.vlgmr.msra.gmra.mrb[0].mxu1 %v4685_v12  ;;  %v5882_v12 = vld [vmem:[%s8540_s29 + $0x2f4] ss:$8 sps:$4 sm:$0xff]  }
  0x8a   :  { %3642 = vmatmul.mubr.bf16.vlgmr.msra.gmra.mrb[0].mxu0 %v4699_v14  ;;  %3364 = vmatpush1.bf16.msra.mxu1 %v5788_v13  ;;  %v5885_v13 = vld [vmem:[%s8540_s29 + $0x9f4] ss:$8 sps:$4 sm:$0xff]   ;;  %v5880_v14 = vld [vmem:[%s8540_s29 + $0x2f0] ss:$8 sps:$4 sm:$0xff]  }
  0x8b   :  { %3651 = vmatpush1.bf16.msra.mxu0 %v5793_v15  ;;  %3365 = vmatprep.subr.bf16.mxu1 %v5798_v16  ;;  %v5883_v15 = vld [vmem:[%s8540_s29 + $0x9f0] ss:$8 sps:$4 sm:$0xff]   ;;  %v5890_v16 = vld [vmem:[%s8540_s29 + $0x304] ss:$8 sps:$4 sm:$0xff]  }
  0x8c   :  { %3652 = vmatprep.subr.bf16.mxu0 %v5801_v17  ;;  %3395 = vmatprep.mubr.bf16.mxu1 %v4688_v19  ;;  %v5895_v17 = vld [vmem:[%s8540_s29 + $0xa04] ss:$8 sps:$4 sm:$0xff]   ;;  %v5888_v19 = vld [vmem:[%s8540_s29 + $0x300] ss:$8 sps:$4 sm:$0xff]  }
  0x8d   :  { %3682 = vmatprep.mubr.bf16.mxu0 %v4702_v23  ;;  %v4701_v23 = vcombine.low %v6948_v20, %v6948_v20 }
  0x8e   :  { %3366 = vmatpush1.bf16.msra.mxu1 %v5796_v21  ;;  %v5893_v21 = vld [vmem:[%s8540_s29 + $0xa00] ss:$8 sps:$4 sm:$0xff]  }
  0x8f   :  { %3653 = vmatpush1.bf16.msra.mxu0 %v5799_v22  ;;  %3367 = vmatprep.subr.bf16.mxu1 %v5804_v24  ;;  %v4687_v22 = vcombine.low %v6941_v18, %v6941_v18  ;;  %v7145_v24 = vld [vmem:[%s8541_s25 + $0x18] sm:$0xff] }
  0x90   :  { %3654 = vmatprep.subr.bf16.mxu0 %v5807_v25  ;;  %v7150_v25 = vld [vmem:[%s8541_s25 + $0x50] sm:$0xff]  ;;  %v4690_v20 = vcombine.high %v7145_v24, %v7145_v24 }
  0x91   :  { %v5901_v18 = vld [vmem:[%s8540_s29 + $0xa14] ss:$8 sps:$4 sm:$0xff]  }
  0x92   :  { %3368 = vmatpush1.bf16.msra.mxu1 %v5802_v26  ;;  %v5898_v26 = vld [vmem:[%s8540_s29 + $0x314] ss:$8 sps:$4 sm:$0xff]  }
  0x93   :  { %3655 = vmatpush1.bf16.msra.mxu0 %v5805_v27  ;;  %3369 = vmatprep.subr.bf16.mxu1 %v5810_v28  ;;  %v4704_v27 = vcombine.high %v7150_v25, %v7150_v25  ;;  %v5896_v28 = vld [vmem:[%s8540_s29 + $0x310] ss:$8 sps:$4 sm:$0xff]  }
  0x94   :  { %3656 = vmatprep.subr.bf16.mxu0 %v5813_v29  ;;  %v5899_v29 = vld [vmem:[%s8540_s29 + $0xa10] ss:$8 sps:$4 sm:$0xff]  }
  0x96   :  { %3370 = vmatpush1.bf16.msra.mxu1 %v5808_v30  ;;  %v5904_v30 = vld [vmem:[%s8540_s29 + $0x324] ss:$8 sps:$4 sm:$0xff]  }
  0x97   :  { %3657 = vmatpush1.bf16.msra.mxu0 %v5811_v31  ;;  %3371 = vmatprep.subr.bf16.mxu1 %v5816_v32  ;;  %v5907_v31 = vld [vmem:[%s8540_s29 + $0xa24] ss:$8 sps:$4 sm:$0xff]   ;;  %v5902_v32 = vld [vmem:[%s8540_s29 + $0x320] ss:$8 sps:$4 sm:$0xff]  }
  0x98   :  { %3658 = vmatprep.subr.bf16.mxu0 %v5819_v33  ;;  %v5905_v33 = vld [vmem:[%s8540_s29 + $0xa20] ss:$8 sps:$4 sm:$0xff]  }
  0x9a   :  { %3372 = vmatpush1.bf16.msra.mxu1 %v5814_v34  ;;  %v5910_v34 = vld [vmem:[%s8540_s29 + $0x334] ss:$8 sps:$4 sm:$0xff]  }
  0x9b   :  { %3659 = vmatpush1.bf16.msra.mxu0 %v5817_v35  ;;  %3373 = vmatprep.subr.bf16.mxu1 %v5822_v36  ;;  %v5913_v35 = vld [vmem:[%s8540_s29 + $0xa34] ss:$8 sps:$4 sm:$0xff]   ;;  %v5908_v36 = vld [vmem:[%s8540_s29 + $0x330] ss:$8 sps:$4 sm:$0xff]  }
  0x9c   :  { %3660 = vmatprep.subr.bf16.mxu0 %v5825_v37  ;;  %v5911_v37 = vld [vmem:[%s8540_s29 + $0xa30] ss:$8 sps:$4 sm:$0xff]  }
  0x9e   :  { %3374 = vmatpush1.bf16.msra.mxu1 %v5820_v38  ;;  %v5916_v38 = vld [vmem:[%s8540_s29 + $0x344] ss:$8 sps:$4 sm:$0xff]  }
  0x9f   :  { %3661 = vmatpush1.bf16.msra.mxu0 %v5823_v39  ;;  %3375 = vmatprep.subr.bf16.mxu1 %v5828_v40  ;;  %v5919_v39 = vld [vmem:[%s8540_s29 + $0xa44] ss:$8 sps:$4 sm:$0xff]   ;;  %v5914_v40 = vld [vmem:[%s8540_s29 + $0x340] ss:$8 sps:$4 sm:$0xff]  }
  0xa0   :  { %3662 = vmatprep.subr.bf16.mxu0 %v5831_v41  ;;  %v5917_v41 = vld [vmem:[%s8540_s29 + $0xa40] ss:$8 sps:$4 sm:$0xff]  }
  0xa2   :  { %3376 = vmatpush1.bf16.msra.mxu1 %v5826_v42  ;;  %v5922_v42 = vld [vmem:[%s8540_s29 + $0x354] ss:$8 sps:$4 sm:$0xff]  }
  0xa3   :  { %3663 = vmatpush1.bf16.msra.mxu0 %v5829_v43  ;;  %3377 = vmatprep.subr.bf16.mxu1 %v5834_v44  ;;  %v5925_v43 = vld [vmem:[%s8540_s29 + $0xa54] ss:$8 sps:$4 sm:$0xff]   ;;  %v5920_v44 = vld [vmem:[%s8540_s29 + $0x350] ss:$8 sps:$4 sm:$0xff]  }
  0xa4   :  { %3664 = vmatprep.subr.bf16.mxu0 %v5837_v45  ;;  %v5923_v45 = vld [vmem:[%s8540_s29 + $0xa50] ss:$8 sps:$4 sm:$0xff]  }
  0xa6   :  { %3378 = vmatpush1.bf16.msra.mxu1 %v5832_v46  ;;  %v5928_v46 = vld [vmem:[%s8540_s29 + $0x364] ss:$8 sps:$4 sm:$0xff]  }
  0xa7   :  { %3665 = vmatpush1.bf16.msra.mxu0 %v5835_v47  ;;  %3379 = vmatprep.subr.bf16.mxu1 %v5840_v48  ;;  %v5931_v47 = vld [vmem:[%s8540_s29 + $0xa64] ss:$8 sps:$4 sm:$0xff]   ;;  %v5926_v48 = vld [vmem:[%s8540_s29 + $0x360] ss:$8 sps:$4 sm:$0xff]  }
  0xa8   :  { %3666 = vmatprep.subr.bf16.mxu0 %v5843_v49  ;;  %v5929_v49 = vld [vmem:[%s8540_s29 + $0xa60] ss:$8 sps:$4 sm:$0xff]  }
  0xaa   :  { %3380 = vmatpush1.bf16.msra.mxu1 %v5838_v50  ;;  %v5934_v50 = vld [vmem:[%s8540_s29 + $0x374] ss:$8 sps:$4 sm:$0xff]  }
  0xab   :  { %3667 = vmatpush1.bf16.msra.mxu0 %v5841_v51  ;;  %3381 = vmatprep.subr.bf16.mxu1 %v5846_v52  ;;  %v5937_v51 = vld [vmem:[%s8540_s29 + $0xa74] ss:$8 sps:$4 sm:$0xff]   ;;  %v5932_v52 = vld [vmem:[%s8540_s29 + $0x370] ss:$8 sps:$4 sm:$0xff]  }
  0xac   :  { %3668 = vmatprep.subr.bf16.mxu0 %v5849_v53  ;;  %v5935_v53 = vld [vmem:[%s8540_s29 + $0xa70] ss:$8 sps:$4 sm:$0xff]  }
  0xae   :  { %3382 = vmatpush1.bf16.msra.mxu1 %v5844_v54  ;;  %v5940_v54 = vld [vmem:[%s8540_s29 + $0x384] ss:$8 sps:$4 sm:$0xff]  }
  0xaf   :  { %3669 = vmatpush1.bf16.msra.mxu0 %v5847_v55  ;;  %3383 = vmatprep.subr.bf16.mxu1 %v5852_v56  ;;  %v5943_v55 = vld [vmem:[%s8540_s29 + $0xa84] ss:$8 sps:$4 sm:$0xff]   ;;  %v5938_v56 = vld [vmem:[%s8540_s29 + $0x380] ss:$8 sps:$4 sm:$0xff]  }
  0xb0   :  { %3670 = vmatprep.subr.bf16.mxu0 %v5855_v57  ;;  %v5941_v57 = vld [vmem:[%s8540_s29 + $0xa80] ss:$8 sps:$4 sm:$0xff]  }
  0xb2   :  { %3384 = vmatpush1.bf16.msra.mxu1 %v5850_v58  ;;  %v5946_v58 = vld [vmem:[%s8540_s29 + $0x394] ss:$8 sps:$4 sm:$0xff]  }
  0xb3   :  { %3671 = vmatpush1.bf16.msra.mxu0 %v5853_v59  ;;  %3385 = vmatprep.subr.bf16.mxu1 %v5858_v60  ;;  %v5949_v59 = vld [vmem:[%s8540_s29 + $0xa94] ss:$8 sps:$4 sm:$0xff]   ;;  %v5944_v60 = vld [vmem:[%s8540_s29 + $0x390] ss:$8 sps:$4 sm:$0xff]  }
  0xb4   :  { %3672 = vmatprep.subr.bf16.mxu0 %v5861_v61  ;;  %v5947_v61 = vld [vmem:[%s8540_s29 + $0xa90] ss:$8 sps:$4 sm:$0xff]  }
  0xb6   :  { %3386 = vmatpush1.bf16.msra.mxu1 %v5856_v62  ;;  %v5952_v62 = vld [vmem:[%s8540_s29 + $0x3a4] ss:$8 sps:$4 sm:$0xff]  }
  0xb7   :  { %3673 = vmatpush1.bf16.msra.mxu0 %v5859_v63  ;;  %3387 = vmatprep.subr.bf16.mxu1 %v5864_v0  ;;  %v5955_v63 = vld [vmem:[%s8540_s29 + $0xaa4] ss:$8 sps:$4 sm:$0xff]   ;;  %v5950_v0 = vld [vmem:[%s8540_s29 + $0x3a0] ss:$8 sps:$4 sm:$0xff]  }
  0xb8   :  { %3674 = vmatprep.subr.bf16.mxu0 %v5867_v1  ;;  %v5953_v1 = vld [vmem:[%s8540_s29 + $0xaa0] ss:$8 sps:$4 sm:$0xff]  }
  0xba   :  { %3388 = vmatpush1.bf16.msra.mxu1 %v5862_v2  ;;  %v5958_v2 = vld [vmem:[%s8540_s29 + $0x3b4] ss:$8 sps:$4 sm:$0xff]  }
  0xbb   :  { %3675 = vmatpush1.bf16.msra.mxu0 %v5865_v3  ;;  %3389 = vmatprep.subr.bf16.mxu1 %v5870_v4  ;;  %v5961_v3 = vld [vmem:[%s8540_s29 + $0xab4] ss:$8 sps:$4 sm:$0xff]   ;;  %v5956_v4 = vld [vmem:[%s8540_s29 + $0x3b0] ss:$8 sps:$4 sm:$0xff]  }
  0xbc   :  { %3676 = vmatprep.subr.bf16.mxu0 %v5873_v5  ;;  %v5959_v5 = vld [vmem:[%s8540_s29 + $0xab0] ss:$8 sps:$4 sm:$0xff]  }
  0xbe   :  { %3390 = vmatpush1.bf16.msra.mxu1 %v5868_v6  ;;  %v5964_v6 = vld [vmem:[%s8540_s29 + $0x3c4] ss:$8 sps:$4 sm:$0xff]  }
  0xbf   :  { %3677 = vmatpush1.bf16.msra.mxu0 %v5871_v7  ;;  %3391 = vmatprep.subr.bf16.mxu1 %v5876_v8  ;;  %v5967_v7 = vld [vmem:[%s8540_s29 + $0xac4] ss:$8 sps:$4 sm:$0xff]   ;;  %v5962_v8 = vld [vmem:[%s8540_s29 + $0x3c0] ss:$8 sps:$4 sm:$0xff]  }
  0xc0   :  { %3678 = vmatprep.subr.bf16.mxu0 %v5879_v9  ;;  %v5965_v9 = vld [vmem:[%s8540_s29 + $0xac0] ss:$8 sps:$4 sm:$0xff]  }
  0xc2   :  { %3392 = vmatpush1.bf16.msra.mxu1 %v5874_v10  ;;  %v5970_v10 = vld [vmem:[%s8540_s29 + $0x3d4] ss:$8 sps:$4 sm:$0xff]  }
  0xc3   :  { %3679 = vmatpush1.bf16.msra.mxu0 %v5877_v11  ;;  %3393 = vmatprep.subr.bf16.mxu1 %v5882_v12  ;;  %v5973_v11 = vld [vmem:[%s8540_s29 + $0xad4] ss:$8 sps:$4 sm:$0xff]   ;;  %v5968_v12 = vld [vmem:[%s8540_s29 + $0x3d0] ss:$8 sps:$4 sm:$0xff]  }
  0xc4   :  { %3680 = vmatprep.subr.bf16.mxu0 %v5885_v13  ;;  %v5971_v13 = vld [vmem:[%s8540_s29 + $0xad0] ss:$8 sps:$4 sm:$0xff]  }
  0xc6   :  { %3394 = vmatpush1.bf16.msra.mxu1 %v5880_v14  ;;  %v5976_v14 = vld [vmem:[%s8540_s29 + $0x3e4] ss:$8 sps:$4 sm:$0xff]  }
  0xc7   :  { %3681 = vmatpush1.bf16.msra.mxu0 %v5883_v15  ;;  %3404 = vmatprep.subr.bf16.mxu1 %v5890_v16  ;;  %v5979_v15 = vld [vmem:[%s8540_s29 + $0xae4] ss:$8 sps:$4 sm:$0xff]   ;;  %v5974_v16 = vld [vmem:[%s8540_s29 + $0x3e0] ss:$8 sps:$4 sm:$0xff]  }
  0xc8   :  { %3691 = vmatprep.subr.bf16.mxu0 %v5895_v17  ;;  %v5977_v17 = vld [vmem:[%s8540_s29 + $0xae0] ss:$8 sps:$4 sm:$0xff]  }
  0xc9   :  { %3396 = vmatmul.mubr.bf16.vlgmr.msra.gmra.mrb[0].mxu1 %v4687_v22  ;;  %v5980_v22 = vld [vmem:[%s8540_s29 + $0x3f0] ss:$8 sps:$4 sm:$0xff]  }
  0xca   :  { %3683 = vmatmul.mubr.bf16.vlgmr.msra.gmra.mrb[0].mxu0 %v4701_v23  ;;  %3405 = vmatpush1.bf16.msra.mxu1 %v5888_v19  ;;  %v5982_v19 = vld [vmem:[%s8540_s29 + $0x3f4] ss:$8 sps:$4 sm:$0xff]   ;;  %v5983_v23 = vld [vmem:[%s8540_s29 + $0xaf0] ss:$8 sps:$4 sm:$0xff]  }
  0xcb   :  { %3692 = vmatpush1.bf16.msra.mxu0 %v5893_v21  ;;  %3406 = vmatprep.subr.bf16.mxu1 %v5898_v26  ;;  %v5985_v21 = vld [vmem:[%s8540_s29 + $0xaf4] ss:$8 sps:$4 sm:$0xff]   ;;  %v5990_v26 = vld [vmem:[%s8540_s29 + $0x404] ss:$8 sps:$4 sm:$0xff]  }
  0xcc   :  { %3693 = vmatprep.subr.bf16.mxu0 %v5901_v18  ;;  %3436 = vmatprep.mubr.bf16.mxu1 %v4690_v20  ;;  %v5995_v18 = vld [vmem:[%s8540_s29 + $0xb04] ss:$8 sps:$4 sm:$0xff]  }
  0xcd   :  { %3723 = vmatprep.mubr.bf16.mxu0 %v4704_v27  ;;  %v7345_v20 = vld [vmem:[%s8541_s25 + $0x20] sm:$0xff]  ;;  %v4689_v27 = vcombine.low %v7145_v24, %v7145_v24  ;;  %v5998_v24 = vld [vmem:[%s8540_s29 + $0x414] ss:$8 sps:$4 sm:$0xff]  }
  0xce   :  { %3407 = vmatpush1.bf16.msra.mxu1 %v5896_v28  ;;  %v4703_v28 = vcombine.low %v7150_v25, %v7150_v25  ;;  %v6001_v25 = vld [vmem:[%s8540_s29 + $0xb14] ss:$8 sps:$4 sm:$0xff]  }
  0xcf   :  { %3694 = vmatpush1.bf16.msra.mxu0 %v5899_v29  ;;  %3408 = vmatprep.subr.bf16.mxu1 %v5904_v30  ;;  %v7354_v29 = vld [vmem:[%s8541_s25 + $0x58] sm:$0xff]  ;;  %v5988_v30 = vld [vmem:[%s8540_s29 + $0x400] ss:$8 sps:$4 sm:$0xff]  }
  0xd0   :  { %3695 = vmatprep.subr.bf16.mxu0 %v5907_v31  ;;  %v5993_v31 = vld [vmem:[%s8540_s29 + $0xb00] ss:$8 sps:$4 sm:$0xff]  }
  0xd2   :  { %3409 = vmatpush1.bf16.msra.mxu1 %v5902_v32  ;;  %v4692_v32 = vcombine.high %v7345_v20, %v7345_v20 }
  0xd3   :  { %3696 = vmatpush1.bf16.msra.mxu0 %v5905_v33  ;;  %3410 = vmatprep.subr.bf16.mxu1 %v5910_v34  ;;  %v4706_v33 = vcombine.high %v7354_v29, %v7354_v29  ;;  %v5996_v34 = vld [vmem:[%s8540_s29 + $0x410] ss:$8 sps:$4 sm:$0xff]  }
  0xd4   :  { %3697 = vmatprep.subr.bf16.mxu0 %v5913_v35  ;;  %v5999_v35 = vld [vmem:[%s8540_s29 + $0xb10] ss:$8 sps:$4 sm:$0xff]  }
  0xd6   :  { %3411 = vmatpush1.bf16.msra.mxu1 %v5908_v36  ;;  %v6004_v36 = vld [vmem:[%s8540_s29 + $0x424] ss:$8 sps:$4 sm:$0xff]  }
  0xd7   :  { %3698 = vmatpush1.bf16.msra.mxu0 %v5911_v37  ;;  %3412 = vmatprep.subr.bf16.mxu1 %v5916_v38  ;;  %v6007_v37 = vld [vmem:[%s8540_s29 + $0xb24] ss:$8 sps:$4 sm:$0xff]   ;;  %v6002_v38 = vld [vmem:[%s8540_s29 + $0x420] ss:$8 sps:$4 sm:$0xff]  }
  0xd8   :  { %3699 = vmatprep.subr.bf16.mxu0 %v5919_v39  ;;  %v6005_v39 = vld [vmem:[%s8540_s29 + $0xb20] ss:$8 sps:$4 sm:$0xff]  }
  0xda   :  { %3413 = vmatpush1.bf16.msra.mxu1 %v5914_v40  ;;  %v6010_v40 = vld [vmem:[%s8540_s29 + $0x434] ss:$8 sps:$4 sm:$0xff]  }
  0xdb   :  { %3700 = vmatpush1.bf16.msra.mxu0 %v5917_v41  ;;  %3414 = vmatprep.subr.bf16.mxu1 %v5922_v42  ;;  %v6013_v41 = vld [vmem:[%s8540_s29 + $0xb34] ss:$8 sps:$4 sm:$0xff]   ;;  %v6008_v42 = vld [vmem:[%s8540_s29 + $0x430] ss:$8 sps:$4 sm:$0xff]  }
  0xdc   :  { %3701 = vmatprep.subr.bf16.mxu0 %v5925_v43  ;;  %v6011_v43 = vld [vmem:[%s8540_s29 + $0xb30] ss:$8 sps:$4 sm:$0xff]  }
  0xde   :  { %3415 = vmatpush1.bf16.msra.mxu1 %v5920_v44  ;;  %v6016_v44 = vld [vmem:[%s8540_s29 + $0x444] ss:$8 sps:$4 sm:$0xff]  }
  0xdf   :  { %3702 = vmatpush1.bf16.msra.mxu0 %v5923_v45  ;;  %3416 = vmatprep.subr.bf16.mxu1 %v5928_v46  ;;  %v6019_v45 = vld [vmem:[%s8540_s29 + $0xb44] ss:$8 sps:$4 sm:$0xff]   ;;  %v6014_v46 = vld [vmem:[%s8540_s29 + $0x440] ss:$8 sps:$4 sm:$0xff]  }
  0xe0   :  { %3703 = vmatprep.subr.bf16.mxu0 %v5931_v47  ;;  %v6017_v47 = vld [vmem:[%s8540_s29 + $0xb40] ss:$8 sps:$4 sm:$0xff]  }
  0xe2   :  { %3417 = vmatpush1.bf16.msra.mxu1 %v5926_v48  ;;  %v6022_v48 = vld [vmem:[%s8540_s29 + $0x454] ss:$8 sps:$4 sm:$0xff]  }
  0xe3   :  { %3704 = vmatpush1.bf16.msra.mxu0 %v5929_v49  ;;  %3418 = vmatprep.subr.bf16.mxu1 %v5934_v50  ;;  %v6025_v49 = vld [vmem:[%s8540_s29 + $0xb54] ss:$8 sps:$4 sm:$0xff]   ;;  %v6020_v50 = vld [vmem:[%s8540_s29 + $0x450] ss:$8 sps:$4 sm:$0xff]  }
  0xe4   :  { %3705 = vmatprep.subr.bf16.mxu0 %v5937_v51  ;;  %v6023_v51 = vld [vmem:[%s8540_s29 + $0xb50] ss:$8 sps:$4 sm:$0xff]  }
  0xe6   :  { %3419 = vmatpush1.bf16.msra.mxu1 %v5932_v52  ;;  %v6028_v52 = vld [vmem:[%s8540_s29 + $0x464] ss:$8 sps:$4 sm:$0xff]  }
  0xe7   :  { %3706 = vmatpush1.bf16.msra.mxu0 %v5935_v53  ;;  %3420 = vmatprep.subr.bf16.mxu1 %v5940_v54  ;;  %v6031_v53 = vld [vmem:[%s8540_s29 + $0xb64] ss:$8 sps:$4 sm:$0xff]   ;;  %v6026_v54 = vld [vmem:[%s8540_s29 + $0x460] ss:$8 sps:$4 sm:$0xff]  }
  0xe8   :  { %3707 = vmatprep.subr.bf16.mxu0 %v5943_v55  ;;  %v6029_v55 = vld [vmem:[%s8540_s29 + $0xb60] ss:$8 sps:$4 sm:$0xff]  }
  0xea   :  { %3421 = vmatpush1.bf16.msra.mxu1 %v5938_v56  ;;  %v6034_v56 = vld [vmem:[%s8540_s29 + $0x474] ss:$8 sps:$4 sm:$0xff]  }
  0xeb   :  { %3708 = vmatpush1.bf16.msra.mxu0 %v5941_v57  ;;  %3422 = vmatprep.subr.bf16.mxu1 %v5946_v58  ;;  %v6037_v57 = vld [vmem:[%s8540_s29 + $0xb74] ss:$8 sps:$4 sm:$0xff]   ;;  %v6032_v58 = vld [vmem:[%s8540_s29 + $0x470] ss:$8 sps:$4 sm:$0xff]  }
  0xec   :  { %3709 = vmatprep.subr.bf16.mxu0 %v5949_v59  ;;  %v6035_v59 = vld [vmem:[%s8540_s29 + $0xb70] ss:$8 sps:$4 sm:$0xff]  }
  0xee   :  { %3423 = vmatpush1.bf16.msra.mxu1 %v5944_v60  ;;  %v6040_v60 = vld [vmem:[%s8540_s29 + $0x484] ss:$8 sps:$4 sm:$0xff]  }
  0xef   :  { %3710 = vmatpush1.bf16.msra.mxu0 %v5947_v61  ;;  %3424 = vmatprep.subr.bf16.mxu1 %v5952_v62  ;;  %v6043_v61 = vld [vmem:[%s8540_s29 + $0xb84] ss:$8 sps:$4 sm:$0xff]   ;;  %v6038_v62 = vld [vmem:[%s8540_s29 + $0x480] ss:$8 sps:$4 sm:$0xff]  }
  0xf0   :  { %3711 = vmatprep.subr.bf16.mxu0 %v5955_v63  ;;  %v6041_v63 = vld [vmem:[%s8540_s29 + $0xb80] ss:$8 sps:$4 sm:$0xff]  }
  0xf2   :  { %3425 = vmatpush1.bf16.msra.mxu1 %v5950_v0  ;;  %v6046_v0 = vld [vmem:[%s8540_s29 + $0x494] ss:$8 sps:$4 sm:$0xff]  }
  0xf3   :  { %3712 = vmatpush1.bf16.msra.mxu0 %v5953_v1  ;;  %3426 = vmatprep.subr.bf16.mxu1 %v5958_v2  ;;  %v6049_v1 = vld [vmem:[%s8540_s29 + $0xb94] ss:$8 sps:$4 sm:$0xff]   ;;  %v6044_v2 = vld [vmem:[%s8540_s29 + $0x490] ss:$8 sps:$4 sm:$0xff]  }
  0xf4   :  { %3713 = vmatprep.subr.bf16.mxu0 %v5961_v3  ;;  %v6047_v3 = vld [vmem:[%s8540_s29 + $0xb90] ss:$8 sps:$4 sm:$0xff]  }
  0xf6   :  { %3427 = vmatpush1.bf16.msra.mxu1 %v5956_v4  ;;  %v6052_v4 = vld [vmem:[%s8540_s29 + $0x4a4] ss:$8 sps:$4 sm:$0xff]  }
  0xf7   :  { %3714 = vmatpush1.bf16.msra.mxu0 %v5959_v5  ;;  %3428 = vmatprep.subr.bf16.mxu1 %v5964_v6  ;;  %v6055_v5 = vld [vmem:[%s8540_s29 + $0xba4] ss:$8 sps:$4 sm:$0xff]   ;;  %v6050_v6 = vld [vmem:[%s8540_s29 + $0x4a0] ss:$8 sps:$4 sm:$0xff]  }
  0xf8   :  { %3715 = vmatprep.subr.bf16.mxu0 %v5967_v7  ;;  %v6053_v7 = vld [vmem:[%s8540_s29 + $0xba0] ss:$8 sps:$4 sm:$0xff]  }
  0xfa   :  { %3429 = vmatpush1.bf16.msra.mxu1 %v5962_v8  ;;  %v6058_v8 = vld [vmem:[%s8540_s29 + $0x4b4] ss:$8 sps:$4 sm:$0xff]  }
  0xfb   :  { %3716 = vmatpush1.bf16.msra.mxu0 %v5965_v9  ;;  %3430 = vmatprep.subr.bf16.mxu1 %v5970_v10  ;;  %v6061_v9 = vld [vmem:[%s8540_s29 + $0xbb4] ss:$8 sps:$4 sm:$0xff]   ;;  %v6056_v10 = vld [vmem:[%s8540_s29 + $0x4b0] ss:$8 sps:$4 sm:$0xff]  }
  0xfc   :  { %3717 = vmatprep.subr.bf16.mxu0 %v5973_v11  ;;  %v6059_v11 = vld [vmem:[%s8540_s29 + $0xbb0] ss:$8 sps:$4 sm:$0xff]  }
  0xfe   :  { %3431 = vmatpush1.bf16.msra.mxu1 %v5968_v12  ;;  %v6064_v12 = vld [vmem:[%s8540_s29 + $0x4c4] ss:$8 sps:$4 sm:$0xff]  }
  0xff   :  { %3718 = vmatpush1.bf16.msra.mxu0 %v5971_v13  ;;  %3432 = vmatprep.subr.bf16.mxu1 %v5976_v14  ;;  %v6067_v13 = vld [vmem:[%s8540_s29 + $0xbc4] ss:$8 sps:$4 sm:$0xff]   ;;  %v6062_v14 = vld [vmem:[%s8540_s29 + $0x4c0] ss:$8 sps:$4 sm:$0xff]  }
 0x100   :  { %3719 = vmatprep.subr.bf16.mxu0 %v5979_v15  ;;  %v6065_v15 = vld [vmem:[%s8540_s29 + $0xbc0] ss:$8 sps:$4 sm:$0xff]  }
 0x102   :  { %3433 = vmatpush1.bf16.msra.mxu1 %v5974_v16  ;;  %v6070_v16 = vld [vmem:[%s8540_s29 + $0x4d4] ss:$8 sps:$4 sm:$0xff]  }
 0x103   :  { %3720 = vmatpush1.bf16.msra.mxu0 %v5977_v17  ;;  %3434 = vmatprep.subr.bf16.mxu1 %v5982_v19  ;;  %v6073_v17 = vld [vmem:[%s8540_s29 + $0xbd4] ss:$8 sps:$4 sm:$0xff]   ;;  %v6068_v19 = vld [vmem:[%s8540_s29 + $0x4d0] ss:$8 sps:$4 sm:$0xff]  }
 0x104   :  { %3721 = vmatprep.subr.bf16.mxu0 %v5985_v21  ;;  %v6071_v21 = vld [vmem:[%s8540_s29 + $0xbd0] ss:$8 sps:$4 sm:$0xff]  }
 0x106   :  { %3435 = vmatpush1.bf16.msra.mxu1 %v5980_v22  ;;  %v6076_v22 = vld [vmem:[%s8540_s29 + $0x4e4] ss:$8 sps:$4 sm:$0xff]  }
 0x107   :  { %3722 = vmatpush1.bf16.msra.mxu0 %v5983_v23  ;;  %3445 = vmatprep.subr.bf16.mxu1 %v5990_v26  ;;  %v6079_v23 = vld [vmem:[%s8540_s29 + $0xbe4] ss:$8 sps:$4 sm:$0xff]   ;;  %v6074_v26 = vld [vmem:[%s8540_s29 + $0x4e0] ss:$8 sps:$4 sm:$0xff]  }
 0x108   :  { %3732 = vmatprep.subr.bf16.mxu0 %v5995_v18  ;;  %v6077_v18 = vld [vmem:[%s8540_s29 + $0xbe0] ss:$8 sps:$4 sm:$0xff]  }
 0x109   :  { %3437 = vmatmul.mubr.bf16.vlgmr.msra.gmra.mrb[0].mxu1 %v4689_v27  ;;  %v6082_v27 = vld [vmem:[%s8540_s29 + $0x4f4] ss:$8 sps:$4 sm:$0xff]  }
 0x10a   :  { %3724 = vmatmul.mubr.bf16.vlgmr.msra.gmra.mrb[0].mxu0 %v4703_v28  ;;  %3446 = vmatpush1.bf16.msra.mxu1 %v5988_v30  ;;  %v6085_v28 = vld [vmem:[%s8540_s29 + $0xbf4] ss:$8 sps:$4 sm:$0xff]   ;;  %v6080_v30 = vld [vmem:[%s8540_s29 + $0x4f0] ss:$8 sps:$4 sm:$0xff]  }
 0x10b   :  { %3733 = vmatpush1.bf16.msra.mxu0 %v5993_v31  ;;  %3447 = vmatprep.subr.bf16.mxu1 %v5998_v24  ;;  %v6083_v31 = vld [vmem:[%s8540_s29 + $0xbf0] ss:$8 sps:$4 sm:$0xff]   ;;  %v6090_v24 = vld [vmem:[%s8540_s29 + $0x504] ss:$8 sps:$4 sm:$0xff]  }
 0x10c   :  { %3734 = vmatprep.subr.bf16.mxu0 %v6001_v25  ;;  %3477 = vmatprep.mubr.bf16.mxu1 %v4692_v32  ;;  %v6095_v25 = vld [vmem:[%s8540_s29 + $0xc04] ss:$8 sps:$4 sm:$0xff]  }
 0x10d   :  { %3764 = vmatprep.mubr.bf16.mxu0 %v4706_v33  ;;  %v7555_v32 = vld [vmem:[%s8541_s25 + $0x28] sm:$0xff] }
 0x10e   :  { %3448 = vmatpush1.bf16.msra.mxu1 %v5996_v34  ;;  %v6088_v33 = vld [vmem:[%s8540_s29 + $0x500] ss:$8 sps:$4 sm:$0xff]  }
 0x10f   :  { %3735 = vmatpush1.bf16.msra.mxu0 %v5999_v35  ;;  %3449 = vmatprep.subr.bf16.mxu1 %v6004_v36  ;;  %v6093_v34 = vld [vmem:[%s8540_s29 + $0xc00] ss:$8 sps:$4 sm:$0xff]   ;;  %v4691_v35 = vcombine.low %v7345_v20, %v7345_v20  ;;  %v4705_v36 = vcombine.low %v7354_v29, %v7354_v29  ;;  %v6101_v20 = vld [vmem:[%s8540_s29 + $0xc14] ss:$8 sps:$4 sm:$0xff]   ;;  %v6096_v29 = vld [vmem:[%s8540_s29 + $0x510] ss:$8 sps:$4 sm:$0xff]  }
 0x110   :  { %3736 = vmatprep.subr.bf16.mxu0 %v6007_v37  ;;  %v7570_v37 = vld [vmem:[%s8541_s25 + $0x60] sm:$0xff] }
 0x112   :  { %3450 = vmatpush1.bf16.msra.mxu1 %v6002_v38  ;;  %v6098_v38 = vld [vmem:[%s8540_s29 + $0x514] ss:$8 sps:$4 sm:$0xff]  }
 0x113   :  { %3737 = vmatpush1.bf16.msra.mxu0 %v6005_v39  ;;  %3451 = vmatprep.subr.bf16.mxu1 %v6010_v40  ;;  %v6099_v39 = vld [vmem:[%s8540_s29 + $0xc10] ss:$8 sps:$4 sm:$0xff]   ;;  %v4694_v40 = vcombine.high %v7555_v32, %v7555_v32 }
 0x114   :  { %3738 = vmatprep.subr.bf16.mxu0 %v6013_v41  ;;  %v4708_v41 = vcombine.high %v7570_v37, %v7570_v37 }
 0x116   :  { %3452 = vmatpush1.bf16.msra.mxu1 %v6008_v42  ;;  %v6104_v42 = vld [vmem:[%s8540_s29 + $0x524] ss:$8 sps:$4 sm:$0xff]  }
 0x117   :  { %3739 = vmatpush1.bf16.msra.mxu0 %v6011_v43  ;;  %3453 = vmatprep.subr.bf16.mxu1 %v6016_v44  ;;  %v6107_v43 = vld [vmem:[%s8540_s29 + $0xc24] ss:$8 sps:$4 sm:$0xff]   ;;  %v6102_v44 = vld [vmem:[%s8540_s29 + $0x520] ss:$8 sps:$4 sm:$0xff]  }
 0x118   :  { %3740 = vmatprep.subr.bf16.mxu0 %v6019_v45  ;;  %v6105_v45 = vld [vmem:[%s8540_s29 + $0xc20] ss:$8 sps:$4 sm:$0xff]  }
 0x11a   :  { %3454 = vmatpush1.bf16.msra.mxu1 %v6014_v46  ;;  %v6110_v46 = vld [vmem:[%s8540_s29 + $0x534] ss:$8 sps:$4 sm:$0xff]  }
 0x11b   :  { %3741 = vmatpush1.bf16.msra.mxu0 %v6017_v47  ;;  %3455 = vmatprep.subr.bf16.mxu1 %v6022_v48  ;;  %v6113_v47 = vld [vmem:[%s8540_s29 + $0xc34] ss:$8 sps:$4 sm:$0xff]   ;;  %v6108_v48 = vld [vmem:[%s8540_s29 + $0x530] ss:$8 sps:$4 sm:$0xff]  }
 0x11c   :  { %3742 = vmatprep.subr.bf16.mxu0 %v6025_v49  ;;  %v6111_v49 = vld [vmem:[%s8540_s29 + $0xc30] ss:$8 sps:$4 sm:$0xff]  }
 0x11e   :  { %3456 = vmatpush1.bf16.msra.mxu1 %v6020_v50  ;;  %v6116_v50 = vld [vmem:[%s8540_s29 + $0x544] ss:$8 sps:$4 sm:$0xff]  }
 0x11f   :  { %3743 = vmatpush1.bf16.msra.mxu0 %v6023_v51  ;;  %3457 = vmatprep.subr.bf16.mxu1 %v6028_v52  ;;  %v6119_v51 = vld [vmem:[%s8540_s29 + $0xc44] ss:$8 sps:$4 sm:$0xff]   ;;  %v6114_v52 = vld [vmem:[%s8540_s29 + $0x540] ss:$8 sps:$4 sm:$0xff]  }
 0x120   :  { %3744 = vmatprep.subr.bf16.mxu0 %v6031_v53  ;;  %v6117_v53 = vld [vmem:[%s8540_s29 + $0xc40] ss:$8 sps:$4 sm:$0xff]  }
 0x122   :  { %3458 = vmatpush1.bf16.msra.mxu1 %v6026_v54  ;;  %v6122_v54 = vld [vmem:[%s8540_s29 + $0x554] ss:$8 sps:$4 sm:$0xff]  }
 0x123   :  { %3745 = vmatpush1.bf16.msra.mxu0 %v6029_v55  ;;  %3459 = vmatprep.subr.bf16.mxu1 %v6034_v56  ;;  %v6125_v55 = vld [vmem:[%s8540_s29 + $0xc54] ss:$8 sps:$4 sm:$0xff]   ;;  %v6120_v56 = vld [vmem:[%s8540_s29 + $0x550] ss:$8 sps:$4 sm:$0xff]  }
 0x124   :  { %3746 = vmatprep.subr.bf16.mxu0 %v6037_v57  ;;  %v6123_v57 = vld [vmem:[%s8540_s29 + $0xc50] ss:$8 sps:$4 sm:$0xff]  }
 0x126   :  { %3460 = vmatpush1.bf16.msra.mxu1 %v6032_v58  ;;  %v6128_v58 = vld [vmem:[%s8540_s29 + $0x564] ss:$8 sps:$4 sm:$0xff]  }
 0x127   :  { %3747 = vmatpush1.bf16.msra.mxu0 %v6035_v59  ;;  %3461 = vmatprep.subr.bf16.mxu1 %v6040_v60  ;;  %v6131_v59 = vld [vmem:[%s8540_s29 + $0xc64] ss:$8 sps:$4 sm:$0xff]   ;;  %v6126_v60 = vld [vmem:[%s8540_s29 + $0x560] ss:$8 sps:$4 sm:$0xff]  }
 0x128   :  { %3748 = vmatprep.subr.bf16.mxu0 %v6043_v61  ;;  %v6129_v61 = vld [vmem:[%s8540_s29 + $0xc60] ss:$8 sps:$4 sm:$0xff]  }
 0x12a   :  { %3462 = vmatpush1.bf16.msra.mxu1 %v6038_v62  ;;  %v6134_v62 = vld [vmem:[%s8540_s29 + $0x574] ss:$8 sps:$4 sm:$0xff]  }
 0x12b   :  { %3749 = vmatpush1.bf16.msra.mxu0 %v6041_v63  ;;  %3463 = vmatprep.subr.bf16.mxu1 %v6046_v0  ;;  %v6137_v63 = vld [vmem:[%s8540_s29 + $0xc74] ss:$8 sps:$4 sm:$0xff]   ;;  %v6132_v0 = vld [vmem:[%s8540_s29 + $0x570] ss:$8 sps:$4 sm:$0xff]  }
 0x12c   :  { %3750 = vmatprep.subr.bf16.mxu0 %v6049_v1  ;;  %v6135_v1 = vld [vmem:[%s8540_s29 + $0xc70] ss:$8 sps:$4 sm:$0xff]  }
 0x12e   :  { %3464 = vmatpush1.bf16.msra.mxu1 %v6044_v2  ;;  %v6140_v2 = vld [vmem:[%s8540_s29 + $0x584] ss:$8 sps:$4 sm:$0xff]  }
 0x12f   :  { %3751 = vmatpush1.bf16.msra.mxu0 %v6047_v3  ;;  %3465 = vmatprep.subr.bf16.mxu1 %v6052_v4  ;;  %v6143_v3 = vld [vmem:[%s8540_s29 + $0xc84] ss:$8 sps:$4 sm:$0xff]   ;;  %v6138_v4 = vld [vmem:[%s8540_s29 + $0x580] ss:$8 sps:$4 sm:$0xff]  }
 0x130   :  { %3752 = vmatprep.subr.bf16.mxu0 %v6055_v5  ;;  %v6141_v5 = vld [vmem:[%s8540_s29 + $0xc80] ss:$8 sps:$4 sm:$0xff]  }
 0x132   :  { %3466 = vmatpush1.bf16.msra.mxu1 %v6050_v6  ;;  %v6146_v6 = vld [vmem:[%s8540_s29 + $0x594] ss:$8 sps:$4 sm:$0xff]  }
 0x133   :  { %3753 = vmatpush1.bf16.msra.mxu0 %v6053_v7  ;;  %3467 = vmatprep.subr.bf16.mxu1 %v6058_v8  ;;  %v6149_v7 = vld [vmem:[%s8540_s29 + $0xc94] ss:$8 sps:$4 sm:$0xff]   ;;  %v6144_v8 = vld [vmem:[%s8540_s29 + $0x590] ss:$8 sps:$4 sm:$0xff]  }
 0x134   :  { %3754 = vmatprep.subr.bf16.mxu0 %v6061_v9  ;;  %v6147_v9 = vld [vmem:[%s8540_s29 + $0xc90] ss:$8 sps:$4 sm:$0xff]  }
 0x136   :  { %3468 = vmatpush1.bf16.msra.mxu1 %v6056_v10  ;;  %v6152_v10 = vld [vmem:[%s8540_s29 + $0x5a4] ss:$8 sps:$4 sm:$0xff]  }
 0x137   :  { %3755 = vmatpush1.bf16.msra.mxu0 %v6059_v11  ;;  %3469 = vmatprep.subr.bf16.mxu1 %v6064_v12  ;;  %v6155_v11 = vld [vmem:[%s8540_s29 + $0xca4] ss:$8 sps:$4 sm:$0xff]   ;;  %v6150_v12 = vld [vmem:[%s8540_s29 + $0x5a0] ss:$8 sps:$4 sm:$0xff]  }
 0x138   :  { %3756 = vmatprep.subr.bf16.mxu0 %v6067_v13  ;;  %v6153_v13 = vld [vmem:[%s8540_s29 + $0xca0] ss:$8 sps:$4 sm:$0xff]  }
 0x13a   :  { %3470 = vmatpush1.bf16.msra.mxu1 %v6062_v14  ;;  %v6158_v14 = vld [vmem:[%s8540_s29 + $0x5b4] ss:$8 sps:$4 sm:$0xff]  }
 0x13b   :  { %3757 = vmatpush1.bf16.msra.mxu0 %v6065_v15  ;;  %3471 = vmatprep.subr.bf16.mxu1 %v6070_v16  ;;  %v6161_v15 = vld [vmem:[%s8540_s29 + $0xcb4] ss:$8 sps:$4 sm:$0xff]   ;;  %v6156_v16 = vld [vmem:[%s8540_s29 + $0x5b0] ss:$8 sps:$4 sm:$0xff]  }
 0x13c   :  { %3758 = vmatprep.subr.bf16.mxu0 %v6073_v17  ;;  %v6159_v17 = vld [vmem:[%s8540_s29 + $0xcb0] ss:$8 sps:$4 sm:$0xff]  }
 0x13e   :  { %3472 = vmatpush1.bf16.msra.mxu1 %v6068_v19  ;;  %v6164_v19 = vld [vmem:[%s8540_s29 + $0x5c4] ss:$8 sps:$4 sm:$0xff]  }
 0x13f   :  { %3759 = vmatpush1.bf16.msra.mxu0 %v6071_v21  ;;  %3473 = vmatprep.subr.bf16.mxu1 %v6076_v22  ;;  %v6167_v21 = vld [vmem:[%s8540_s29 + $0xcc4] ss:$8 sps:$4 sm:$0xff]   ;;  %v6162_v22 = vld [vmem:[%s8540_s29 + $0x5c0] ss:$8 sps:$4 sm:$0xff]  }
 0x140   :  { %3760 = vmatprep.subr.bf16.mxu0 %v6079_v23  ;;  %v6165_v23 = vld [vmem:[%s8540_s29 + $0xcc0] ss:$8 sps:$4 sm:$0xff]  }
 0x142   :  { %3474 = vmatpush1.bf16.msra.mxu1 %v6074_v26  ;;  %v6170_v26 = vld [vmem:[%s8540_s29 + $0x5d4] ss:$8 sps:$4 sm:$0xff]  }
 0x143   :  { %3761 = vmatpush1.bf16.msra.mxu0 %v6077_v18  ;;  %3475 = vmatprep.subr.bf16.mxu1 %v6082_v27  ;;  %v6173_v18 = vld [vmem:[%s8540_s29 + $0xcd4] ss:$8 sps:$4 sm:$0xff]   ;;  %v6168_v27 = vld [vmem:[%s8540_s29 + $0x5d0] ss:$8 sps:$4 sm:$0xff]  }
 0x144   :  { %3762 = vmatprep.subr.bf16.mxu0 %v6085_v28  ;;  %v6171_v28 = vld [vmem:[%s8540_s29 + $0xcd0] ss:$8 sps:$4 sm:$0xff]  }
 0x146   :  { %3476 = vmatpush1.bf16.msra.mxu1 %v6080_v30  ;;  %v6176_v30 = vld [vmem:[%s8540_s29 + $0x5e4] ss:$8 sps:$4 sm:$0xff]  }
 0x147   :  { %3763 = vmatpush1.bf16.msra.mxu0 %v6083_v31  ;;  %3486 = vmatprep.subr.bf16.mxu1 %v6090_v24  ;;  %v6179_v31 = vld [vmem:[%s8540_s29 + $0xce4] ss:$8 sps:$4 sm:$0xff]   ;;  %v6174_v24 = vld [vmem:[%s8540_s29 + $0x5e0] ss:$8 sps:$4 sm:$0xff]  }
 0x148   :  { %3773 = vmatprep.subr.bf16.mxu0 %v6095_v25  ;;  %v6177_v25 = vld [vmem:[%s8540_s29 + $0xce0] ss:$8 sps:$4 sm:$0xff]  }
 0x149   :  { %3478 = vmatmul.mubr.bf16.vlgmr.msra.gmra.mrb[0].mxu1 %v4691_v35  ;;  %v6180_v35 = vld [vmem:[%s8540_s29 + $0x5f0] ss:$8 sps:$4 sm:$0xff]  }
 0x14a   :  { %3765 = vmatmul.mubr.bf16.vlgmr.msra.gmra.mrb[0].mxu0 %v4705_v36  ;;  %3487 = vmatpush1.bf16.msra.mxu1 %v6088_v33  ;;  %v6182_v33 = vld [vmem:[%s8540_s29 + $0x5f4] ss:$8 sps:$4 sm:$0xff]   ;;  %v6183_v36 = vld [vmem:[%s8540_s29 + $0xcf0] ss:$8 sps:$4 sm:$0xff]  }
 0x14b   :  { %3774 = vmatpush1.bf16.msra.mxu0 %v6093_v34  ;;  %3488 = vmatprep.subr.bf16.mxu1 %v6098_v38  ;;  %v6185_v34 = vld [vmem:[%s8540_s29 + $0xcf4] ss:$8 sps:$4 sm:$0xff]   ;;  %v6190_v38 = vld [vmem:[%s8540_s29 + $0x604] ss:$8 sps:$4 sm:$0xff]  }
 0x14c   :  { %3775 = vmatprep.subr.bf16.mxu0 %v6101_v20  ;;  %3518 = vmatprep.mubr.bf16.mxu1 %v4694_v40  ;;  %v6195_v20 = vld [vmem:[%s8540_s29 + $0xd04] ss:$8 sps:$4 sm:$0xff]   ;;  %v7769_v40 = vld [vmem:[%s8541_s25 + $0x30] sm:$0xff] }
 0x14d   :  { %3805 = vmatprep.mubr.bf16.mxu0 %v4708_v41  ;;  %v7774_v41 = vld [vmem:[%s8541_s25 + $0x68] sm:$0xff] }
 0x14e   :  { %3489 = vmatpush1.bf16.msra.mxu1 %v6096_v29  ;;  %v4693_v29 = vcombine.low %v7555_v32, %v7555_v32  ;;  %v6193_v32 = vld [vmem:[%s8540_s29 + $0xd00] ss:$8 sps:$4 sm:$0xff]  }
 0x14f   :  { %3776 = vmatpush1.bf16.msra.mxu0 %v6099_v39  ;;  %3490 = vmatprep.subr.bf16.mxu1 %v6104_v42  ;;  %v4707_v39 = vcombine.low %v7570_v37, %v7570_v37  ;;  %v6188_v42 = vld [vmem:[%s8540_s29 + $0x600] ss:$8 sps:$4 sm:$0xff]   ;;  %v6198_v37 = vld [vmem:[%s8540_s29 + $0x614] ss:$8 sps:$4 sm:$0xff]  }
 0x150   :  { %3777 = vmatprep.subr.bf16.mxu0 %v6107_v43  ;;  %v6201_v43 = vld [vmem:[%s8540_s29 + $0xd14] ss:$8 sps:$4 sm:$0xff]  }
 0x152   :  { %3491 = vmatpush1.bf16.msra.mxu1 %v6102_v44  ;;  %v4696_v44 = vcombine.high %v7769_v40, %v7769_v40 }
 0x153   :  { %3778 = vmatpush1.bf16.msra.mxu0 %v6105_v45  ;;  %3492 = vmatprep.subr.bf16.mxu1 %v6110_v46  ;;  %v4710_v45 = vcombine.high %v7774_v41, %v7774_v41  ;;  %v6196_v46 = vld [vmem:[%s8540_s29 + $0x610] ss:$8 sps:$4 sm:$0xff]  }
 0x154   :  { %3779 = vmatprep.subr.bf16.mxu0 %v6113_v47  ;;  %v6199_v47 = vld [vmem:[%s8540_s29 + $0xd10] ss:$8 sps:$4 sm:$0xff]  }
 0x156   :  { %3493 = vmatpush1.bf16.msra.mxu1 %v6108_v48  ;;  %v6204_v48 = vld [vmem:[%s8540_s29 + $0x624] ss:$8 sps:$4 sm:$0xff]  }
 0x157   :  { %3780 = vmatpush1.bf16.msra.mxu0 %v6111_v49  ;;  %3494 = vmatprep.subr.bf16.mxu1 %v6116_v50  ;;  %v6207_v49 = vld [vmem:[%s8540_s29 + $0xd24] ss:$8 sps:$4 sm:$0xff]   ;;  %v6202_v50 = vld [vmem:[%s8540_s29 + $0x620] ss:$8 sps:$4 sm:$0xff]  }
 0x158   :  { %3781 = vmatprep.subr.bf16.mxu0 %v6119_v51  ;;  %v6205_v51 = vld [vmem:[%s8540_s29 + $0xd20] ss:$8 sps:$4 sm:$0xff]  }
 0x15a   :  { %3495 = vmatpush1.bf16.msra.mxu1 %v6114_v52  ;;  %v6210_v52 = vld [vmem:[%s8540_s29 + $0x634] ss:$8 sps:$4 sm:$0xff]  }
 0x15b   :  { %3782 = vmatpush1.bf16.msra.mxu0 %v6117_v53  ;;  %3496 = vmatprep.subr.bf16.mxu1 %v6122_v54  ;;  %v6213_v53 = vld [vmem:[%s8540_s29 + $0xd34] ss:$8 sps:$4 sm:$0xff]   ;;  %v6208_v54 = vld [vmem:[%s8540_s29 + $0x630] ss:$8 sps:$4 sm:$0xff]  }
 0x15c   :  { %3783 = vmatprep.subr.bf16.mxu0 %v6125_v55  ;;  %v6211_v55 = vld [vmem:[%s8540_s29 + $0xd30] ss:$8 sps:$4 sm:$0xff]  }
 0x15e   :  { %3497 = vmatpush1.bf16.msra.mxu1 %v6120_v56  ;;  %v6216_v56 = vld [vmem:[%s8540_s29 + $0x644] ss:$8 sps:$4 sm:$0xff]  }
 0x15f   :  { %3784 = vmatpush1.bf16.msra.mxu0 %v6123_v57  ;;  %3498 = vmatprep.subr.bf16.mxu1 %v6128_v58  ;;  %v6219_v57 = vld [vmem:[%s8540_s29 + $0xd44] ss:$8 sps:$4 sm:$0xff]   ;;  %v6214_v58 = vld [vmem:[%s8540_s29 + $0x640] ss:$8 sps:$4 sm:$0xff]  }
 0x160   :  { %3785 = vmatprep.subr.bf16.mxu0 %v6131_v59  ;;  %v6217_v59 = vld [vmem:[%s8540_s29 + $0xd40] ss:$8 sps:$4 sm:$0xff]  }
 0x162   :  { %3499 = vmatpush1.bf16.msra.mxu1 %v6126_v60  ;;  %v6222_v60 = vld [vmem:[%s8540_s29 + $0x654] ss:$8 sps:$4 sm:$0xff]  }
 0x163   :  { %3786 = vmatpush1.bf16.msra.mxu0 %v6129_v61  ;;  %3500 = vmatprep.subr.bf16.mxu1 %v6134_v62  ;;  %v6225_v61 = vld [vmem:[%s8540_s29 + $0xd54] ss:$8 sps:$4 sm:$0xff]   ;;  %v6220_v62 = vld [vmem:[%s8540_s29 + $0x650] ss:$8 sps:$4 sm:$0xff]  }
 0x164   :  { %3787 = vmatprep.subr.bf16.mxu0 %v6137_v63  ;;  %v6223_v63 = vld [vmem:[%s8540_s29 + $0xd50] ss:$8 sps:$4 sm:$0xff]  }
 0x166   :  { %3501 = vmatpush1.bf16.msra.mxu1 %v6132_v0  ;;  %v6228_v0 = vld [vmem:[%s8540_s29 + $0x664] ss:$8 sps:$4 sm:$0xff]  }
 0x167   :  { %3788 = vmatpush1.bf16.msra.mxu0 %v6135_v1  ;;  %3502 = vmatprep.subr.bf16.mxu1 %v6140_v2  ;;  %v6231_v1 = vld [vmem:[%s8540_s29 + $0xd64] ss:$8 sps:$4 sm:$0xff]   ;;  %v6226_v2 = vld [vmem:[%s8540_s29 + $0x660] ss:$8 sps:$4 sm:$0xff]  }
 0x168   :  { %3789 = vmatprep.subr.bf16.mxu0 %v6143_v3  ;;  %v6229_v3 = vld [vmem:[%s8540_s29 + $0xd60] ss:$8 sps:$4 sm:$0xff]  }
 0x16a   :  { %3503 = vmatpush1.bf16.msra.mxu1 %v6138_v4  ;;  %v6234_v4 = vld [vmem:[%s8540_s29 + $0x674] ss:$8 sps:$4 sm:$0xff]  }
 0x16b   :  { %3790 = vmatpush1.bf16.msra.mxu0 %v6141_v5  ;;  %3504 = vmatprep.subr.bf16.mxu1 %v6146_v6  ;;  %v6237_v5 = vld [vmem:[%s8540_s29 + $0xd74] ss:$8 sps:$4 sm:$0xff]   ;;  %v6232_v6 = vld [vmem:[%s8540_s29 + $0x670] ss:$8 sps:$4 sm:$0xff]  }
 0x16c   :  { %3791 = vmatprep.subr.bf16.mxu0 %v6149_v7  ;;  %v6235_v7 = vld [vmem:[%s8540_s29 + $0xd70] ss:$8 sps:$4 sm:$0xff]  }
 0x16e   :  { %3505 = vmatpush1.bf16.msra.mxu1 %v6144_v8  ;;  %v6240_v8 = vld [vmem:[%s8540_s29 + $0x684] ss:$8 sps:$4 sm:$0xff]  }
 0x16f   :  { %3792 = vmatpush1.bf16.msra.mxu0 %v6147_v9  ;;  %3506 = vmatprep.subr.bf16.mxu1 %v6152_v10  ;;  %v6243_v9 = vld [vmem:[%s8540_s29 + $0xd84] ss:$8 sps:$4 sm:$0xff]   ;;  %v6238_v10 = vld [vmem:[%s8540_s29 + $0x680] ss:$8 sps:$4 sm:$0xff]  }
 0x170   :  { %3793 = vmatprep.subr.bf16.mxu0 %v6155_v11  ;;  %v6241_v11 = vld [vmem:[%s8540_s29 + $0xd80] ss:$8 sps:$4 sm:$0xff]  }
 0x172   :  { %3507 = vmatpush1.bf16.msra.mxu1 %v6150_v12  ;;  %v6246_v12 = vld [vmem:[%s8540_s29 + $0x694] ss:$8 sps:$4 sm:$0xff]  }
 0x173   :  { %3794 = vmatpush1.bf16.msra.mxu0 %v6153_v13  ;;  %3508 = vmatprep.subr.bf16.mxu1 %v6158_v14  ;;  %v6249_v13 = vld [vmem:[%s8540_s29 + $0xd94] ss:$8 sps:$4 sm:$0xff]   ;;  %v6244_v14 = vld [vmem:[%s8540_s29 + $0x690] ss:$8 sps:$4 sm:$0xff]  }
 0x174   :  { %3795 = vmatprep.subr.bf16.mxu0 %v6161_v15  ;;  %v6247_v15 = vld [vmem:[%s8540_s29 + $0xd90] ss:$8 sps:$4 sm:$0xff]  }
 0x176   :  { %3509 = vmatpush1.bf16.msra.mxu1 %v6156_v16  ;;  %v6252_v16 = vld [vmem:[%s8540_s29 + $0x6a4] ss:$8 sps:$4 sm:$0xff]  }
 0x177   :  { %3796 = vmatpush1.bf16.msra.mxu0 %v6159_v17  ;;  %3510 = vmatprep.subr.bf16.mxu1 %v6164_v19  ;;  %v6255_v17 = vld [vmem:[%s8540_s29 + $0xda4] ss:$8 sps:$4 sm:$0xff]   ;;  %v6250_v19 = vld [vmem:[%s8540_s29 + $0x6a0] ss:$8 sps:$4 sm:$0xff]  }
 0x178   :  { %3797 = vmatprep.subr.bf16.mxu0 %v6167_v21  ;;  %v6253_v21 = vld [vmem:[%s8540_s29 + $0xda0] ss:$8 sps:$4 sm:$0xff]  }
 0x17a   :  { %3511 = vmatpush1.bf16.msra.mxu1 %v6162_v22  ;;  %v6258_v22 = vld [vmem:[%s8540_s29 + $0x6b4] ss:$8 sps:$4 sm:$0xff]  }
 0x17b   :  { %3798 = vmatpush1.bf16.msra.mxu0 %v6165_v23  ;;  %3512 = vmatprep.subr.bf16.mxu1 %v6170_v26  ;;  %v6261_v23 = vld [vmem:[%s8540_s29 + $0xdb4] ss:$8 sps:$4 sm:$0xff]   ;;  %v6256_v26 = vld [vmem:[%s8540_s29 + $0x6b0] ss:$8 sps:$4 sm:$0xff]  }
 0x17c   :  { %3799 = vmatprep.subr.bf16.mxu0 %v6173_v18  ;;  %v6259_v18 = vld [vmem:[%s8540_s29 + $0xdb0] ss:$8 sps:$4 sm:$0xff]  }
 0x17e   :  { %3513 = vmatpush1.bf16.msra.mxu1 %v6168_v27  ;;  %v6264_v27 = vld [vmem:[%s8540_s29 + $0x6c4] ss:$8 sps:$4 sm:$0xff]  }
 0x17f   :  { %3800 = vmatpush1.bf16.msra.mxu0 %v6171_v28  ;;  %3514 = vmatprep.subr.bf16.mxu1 %v6176_v30  ;;  %v6267_v28 = vld [vmem:[%s8540_s29 + $0xdc4] ss:$8 sps:$4 sm:$0xff]   ;;  %v6262_v30 = vld [vmem:[%s8540_s29 + $0x6c0] ss:$8 sps:$4 sm:$0xff]  }
 0x180   :  { %3801 = vmatprep.subr.bf16.mxu0 %v6179_v31  ;;  %v6265_v31 = vld [vmem:[%s8540_s29 + $0xdc0] ss:$8 sps:$4 sm:$0xff]  }
 0x182   :  { %3515 = vmatpush1.bf16.msra.mxu1 %v6174_v24  ;;  %v6270_v24 = vld [vmem:[%s8540_s29 + $0x6d4] ss:$8 sps:$4 sm:$0xff]  }
 0x183   :  { %3802 = vmatpush1.bf16.msra.mxu0 %v6177_v25  ;;  %3516 = vmatprep.subr.bf16.mxu1 %v6182_v33  ;;  %v6273_v25 = vld [vmem:[%s8540_s29 + $0xdd4] ss:$8 sps:$4 sm:$0xff]   ;;  %v6268_v33 = vld [vmem:[%s8540_s29 + $0x6d0] ss:$8 sps:$4 sm:$0xff]  }
 0x184   :  { %3803 = vmatprep.subr.bf16.mxu0 %v6185_v34  ;;  %v6271_v34 = vld [vmem:[%s8540_s29 + $0xdd0] ss:$8 sps:$4 sm:$0xff]  }
 0x186   :  { %3517 = vmatpush1.bf16.msra.mxu1 %v6180_v35  ;;  %v6276_v35 = vld [vmem:[%s8540_s29 + $0x6e4] ss:$8 sps:$4 sm:$0xff]  }
 0x187   :  { %3804 = vmatpush1.bf16.msra.mxu0 %v6183_v36  ;;  %3527 = vmatprep.subr.bf16.mxu1 %v6190_v38  ;;  %v6279_v36 = vld [vmem:[%s8540_s29 + $0xde4] ss:$8 sps:$4 sm:$0xff]   ;;  %v6274_v38 = vld [vmem:[%s8540_s29 + $0x6e0] ss:$8 sps:$4 sm:$0xff]  }
 0x188   :  { %3814 = vmatprep.subr.bf16.mxu0 %v6195_v20  ;;  %v6277_v20 = vld [vmem:[%s8540_s29 + $0xde0] ss:$8 sps:$4 sm:$0xff]  }
 0x189   :  { %3519 = vmatmul.mubr.bf16.vlgmr.msra.gmra.mrb[0].mxu1 %v4693_v29  ;;  %v6282_v29 = vld [vmem:[%s8540_s29 + $0x6f4] ss:$8 sps:$4 sm:$0xff]  }
 0x18a   :  { %3806 = vmatmul.mubr.bf16.vlgmr.msra.gmra.mrb[0].mxu0 %v4707_v39  ;;  %3528 = vmatpush1.bf16.msra.mxu1 %v6188_v42  ;;  %v6285_v39 = vld [vmem:[%s8540_s29 + $0xdf4] ss:$8 sps:$4 sm:$0xff]   ;;  %v6280_v42 = vld [vmem:[%s8540_s29 + $0x6f0] ss:$8 sps:$4 sm:$0xff]  }
 0x18b   :  { %3815 = vmatpush1.bf16.msra.mxu0 %v6193_v32  ;;  %3529 = vmatprep.subr.bf16.mxu1 %v6198_v37  ;;  %v6283_v32 = vld [vmem:[%s8540_s29 + $0xdf0] ss:$8 sps:$4 sm:$0xff]   ;;  %v6292_v37 = vld [vmem:[%s8540_s29 + $0xe04] ss:$8 sps:$4 sm:$0xff]  }
 0x18c   :  { %3816 = vmatprep.subr.bf16.mxu0 %v6201_v43  ;;  %3559 = vmatprep.mubr.bf16.mxu1 %v4696_v44  ;;  %v7972_v43 = vld [vmem:[%s8541_s25 + $0x70] sm:$0xff]  ;;  %v4695_v44 = vcombine.low %v7769_v40, %v7769_v40 }
 0x18d   :  { %3846 = vmatprep.mubr.bf16.mxu0 %v4710_v45  ;;  %v4709_v45 = vcombine.low %v7774_v41, %v7774_v41  ;;  %v6293_v40 = vld [vmem:[%s8540_s29 + $0xe10] ss:$8 sps:$4 sm:$0xff]   ;;  %v6298_v41 = vld [vmem:[%s8540_s29 + $0xe24] ss:$8 sps:$4 sm:$0xff]  }
 0x18e   :  { %3530 = vmatpush1.bf16.msra.mxu1 %v6196_v46  ;;  %v6290_v46 = vld [vmem:[%s8540_s29 + $0xe00] ss:$8 sps:$4 sm:$0xff]  }
 0x18f   :  { %3817 = vmatpush1.bf16.msra.mxu0 %v6199_v47  ;;  %3531 = vmatprep.subr.bf16.mxu1 %v6204_v48  ;;  %v4712_v47 = vcombine.high %v7972_v43, %v7972_v43  ;;  %v6295_v48 = vld [vmem:[%s8540_s29 + $0xe14] ss:$8 sps:$4 sm:$0xff]  }
 0x190   :  { %3818 = vmatprep.subr.bf16.mxu0 %v6207_v49  ;;  %v6296_v49 = vld [vmem:[%s8540_s29 + $0xe20] ss:$8 sps:$4 sm:$0xff]  }
 0x192   :  { %3532 = vmatpush1.bf16.msra.mxu1 %v6202_v50  ;;  %v6301_v50 = vld [vmem:[%s8540_s29 + $0xe34] ss:$8 sps:$4 sm:$0xff]  }
 0x193   :  { %3819 = vmatpush1.bf16.msra.mxu0 %v6205_v51  ;;  %3533 = vmatprep.subr.bf16.mxu1 %v6210_v52  ;;  %v6299_v51 = vld [vmem:[%s8540_s29 + $0xe30] ss:$8 sps:$4 sm:$0xff]   ;;  %v6304_v52 = vld [vmem:[%s8540_s29 + $0xe44] ss:$8 sps:$4 sm:$0xff]  }
 0x194   :  { %3820 = vmatprep.subr.bf16.mxu0 %v6213_v53  ;;  %v6302_v53 = vld [vmem:[%s8540_s29 + $0xe40] ss:$8 sps:$4 sm:$0xff]  }
 0x196   :  { %3534 = vmatpush1.bf16.msra.mxu1 %v6208_v54  ;;  %v6307_v54 = vld [vmem:[%s8540_s29 + $0xe54] ss:$8 sps:$4 sm:$0xff]  }
 0x197   :  { %3821 = vmatpush1.bf16.msra.mxu0 %v6211_v55  ;;  %3535 = vmatprep.subr.bf16.mxu1 %v6216_v56  ;;  %v6305_v55 = vld [vmem:[%s8540_s29 + $0xe50] ss:$8 sps:$4 sm:$0xff]   ;;  %v6310_v56 = vld [vmem:[%s8540_s29 + $0xe64] ss:$8 sps:$4 sm:$0xff]  }
 0x198   :  { %3822 = vmatprep.subr.bf16.mxu0 %v6219_v57  ;;  %v6308_v57 = vld [vmem:[%s8540_s29 + $0xe60] ss:$8 sps:$4 sm:$0xff]  }
 0x19a   :  { %3536 = vmatpush1.bf16.msra.mxu1 %v6214_v58  ;;  %v6313_v58 = vld [vmem:[%s8540_s29 + $0xe74] ss:$8 sps:$4 sm:$0xff]  }
 0x19b   :  { %3823 = vmatpush1.bf16.msra.mxu0 %v6217_v59  ;;  %3537 = vmatprep.subr.bf16.mxu1 %v6222_v60  ;;  %v6311_v59 = vld [vmem:[%s8540_s29 + $0xe70] ss:$8 sps:$4 sm:$0xff]   ;;  %v6316_v60 = vld [vmem:[%s8540_s29 + $0xe84] ss:$8 sps:$4 sm:$0xff]  }
 0x19c   :  { %3824 = vmatprep.subr.bf16.mxu0 %v6225_v61  ;;  %v6314_v61 = vld [vmem:[%s8540_s29 + $0xe80] ss:$8 sps:$4 sm:$0xff]  }
 0x19e   :  { %3538 = vmatpush1.bf16.msra.mxu1 %v6220_v62  ;;  %v6319_v62 = vld [vmem:[%s8540_s29 + $0xe94] ss:$8 sps:$4 sm:$0xff]  }
 0x19f   :  { %3825 = vmatpush1.bf16.msra.mxu0 %v6223_v63  ;;  %3539 = vmatprep.subr.bf16.mxu1 %v6228_v0  ;;  %v6317_v63 = vld [vmem:[%s8540_s29 + $0xe90] ss:$8 sps:$4 sm:$0xff]   ;;  %v6322_v0 = vld [vmem:[%s8540_s29 + $0xea4] ss:$8 sps:$4 sm:$0xff]  }
 0x1a0   :  { %3826 = vmatprep.subr.bf16.mxu0 %v6231_v1  ;;  %v6320_v1 = vld [vmem:[%s8540_s29 + $0xea0] ss:$8 sps:$4 sm:$0xff]  }
 0x1a2   :  { %3540 = vmatpush1.bf16.msra.mxu1 %v6226_v2  ;;  %v6325_v2 = vld [vmem:[%s8540_s29 + $0xeb4] ss:$8 sps:$4 sm:$0xff]  }
 0x1a3   :  { %3827 = vmatpush1.bf16.msra.mxu0 %v6229_v3  ;;  %3541 = vmatprep.subr.bf16.mxu1 %v6234_v4  ;;  %v6323_v3 = vld [vmem:[%s8540_s29 + $0xeb0] ss:$8 sps:$4 sm:$0xff]   ;;  %v6328_v4 = vld [vmem:[%s8540_s29 + $0xec4] ss:$8 sps:$4 sm:$0xff]  }
 0x1a4   :  { %3828 = vmatprep.subr.bf16.mxu0 %v6237_v5  ;;  %v6326_v5 = vld [vmem:[%s8540_s29 + $0xec0] ss:$8 sps:$4 sm:$0xff]  }
 0x1a6   :  { %3542 = vmatpush1.bf16.msra.mxu1 %v6232_v6  ;;  %v6331_v6 = vld [vmem:[%s8540_s29 + $0xed4] ss:$8 sps:$4 sm:$0xff]  }
 0x1a7   :  { %3829 = vmatpush1.bf16.msra.mxu0 %v6235_v7  ;;  %3543 = vmatprep.subr.bf16.mxu1 %v6240_v8  ;;  %v6329_v7 = vld [vmem:[%s8540_s29 + $0xed0] ss:$8 sps:$4 sm:$0xff]   ;;  %v6334_v8 = vld [vmem:[%s8540_s29 + $0xee4] ss:$8 sps:$4 sm:$0xff]  }
 0x1a8   :  { %3830 = vmatprep.subr.bf16.mxu0 %v6243_v9  ;;  %v6332_v9 = vld [vmem:[%s8540_s29 + $0xee0] ss:$8 sps:$4 sm:$0xff]  }
 0x1aa   :  { %3544 = vmatpush1.bf16.msra.mxu1 %v6238_v10  ;;  %v6337_v10 = vld [vmem:[%s8540_s29 + $0xef4] ss:$8 sps:$4 sm:$0xff]  }
 0x1ab   :  { %3831 = vmatpush1.bf16.msra.mxu0 %v6241_v11  ;;  %3545 = vmatprep.subr.bf16.mxu1 %v6246_v12  ;;  %v6335_v11 = vld [vmem:[%s8540_s29 + $0xef0] ss:$8 sps:$4 sm:$0xff]   ;;  %v6342_v12 = vld [vmem:[%s8540_s29 + $0xf04] ss:$8 sps:$4 sm:$0xff]  }
 0x1ac   :  { %3832 = vmatprep.subr.bf16.mxu0 %v6249_v13  ;;  %v8079_v13 = vld [vmem:[%s8541_s25 + $0x78] sm:$0xff]  ;;  %s8542_s25 = sld [smem:[#allocation4_spill]] }
 0x1ae   :  { %3546 = vmatpush1.bf16.msra.mxu1 %v6244_v14  ;;  %v4711_v14 = vcombine.low %v7972_v43, %v7972_v43  ;;  %v3957_v43 = vld [vmem:[%s8544_s9 + $0x90] sm:$0xff] }
 0x1af   :  { %3833 = vmatpush1.bf16.msra.mxu0 %v6247_v15  ;;  %3547 = vmatprep.subr.bf16.mxu1 %v6252_v16  ;;  %v6340_v15 = vld [vmem:[%s8540_s29 + $0xf00] ss:$8 sps:$4 sm:$0xff]   ;;  %v4714_v16 = vcombine.high %v8079_v13, %v8079_v13 }
 0x1b0   :  { %3834 = vmatprep.subr.bf16.mxu0 %v6255_v17  ;;  %v6345_v17 = vld [vmem:[%s8540_s29 + $0xf14] ss:$8 sps:$4 sm:$0xff]  }
 0x1b2   :  { %3548 = vmatpush1.bf16.msra.mxu1 %v6250_v19  ;;  %v6343_v19 = vld [vmem:[%s8540_s29 + $0xf10] ss:$8 sps:$4 sm:$0xff]  }
 0x1b3   :  { %3835 = vmatpush1.bf16.msra.mxu0 %v6253_v21  ;;  %3549 = vmatprep.subr.bf16.mxu1 %v6258_v22  ;;  %v6348_v21 = vld [vmem:[%s8540_s29 + $0xf24] ss:$8 sps:$4 sm:$0xff]   ;;  %v6346_v22 = vld [vmem:[%s8540_s29 + $0xf20] ss:$8 sps:$4 sm:$0xff]  }
 0x1b4   :  { %3836 = vmatprep.subr.bf16.mxu0 %v6261_v23  ;;  %v6351_v23 = vld [vmem:[%s8540_s29 + $0xf34] ss:$8 sps:$4 sm:$0xff]  }
 0x1b6   :  { %3550 = vmatpush1.bf16.msra.mxu1 %v6256_v26  ;;  %v6349_v26 = vld [vmem:[%s8540_s29 + $0xf30] ss:$8 sps:$4 sm:$0xff]  }
 0x1b7   :  { %3837 = vmatpush1.bf16.msra.mxu0 %v6259_v18  ;;  %3551 = vmatprep.subr.bf16.mxu1 %v6264_v27  ;;  %v6354_v18 = vld [vmem:[%s8540_s29 + $0xf44] ss:$8 sps:$4 sm:$0xff]   ;;  %v6352_v27 = vld [vmem:[%s8540_s29 + $0xf40] ss:$8 sps:$4 sm:$0xff]  }
 0x1b8   :  { %3838 = vmatprep.subr.bf16.mxu0 %v6267_v28  ;;  %v6357_v28 = vld [vmem:[%s8540_s29 + $0xf54] ss:$8 sps:$4 sm:$0xff]  }
 0x1ba   :  { %3552 = vmatpush1.bf16.msra.mxu1 %v6262_v30  ;;  %v6355_v30 = vld [vmem:[%s8540_s29 + $0xf50] ss:$8 sps:$4 sm:$0xff]  }
 0x1bb   :  { %3839 = vmatpush1.bf16.msra.mxu0 %v6265_v31  ;;  %3553 = vmatprep.subr.bf16.mxu1 %v6270_v24  ;;  %v6360_v31 = vld [vmem:[%s8540_s29 + $0xf64] ss:$8 sps:$4 sm:$0xff]   ;;  %v6358_v24 = vld [vmem:[%s8540_s29 + $0xf60] ss:$8 sps:$4 sm:$0xff]  }
 0x1bc   :  { %3840 = vmatprep.subr.bf16.mxu0 %v6273_v25  ;;  %v6363_v25 = vld [vmem:[%s8540_s29 + $0xf74] ss:$8 sps:$4 sm:$0xff]  }
 0x1be   :  { %3554 = vmatpush1.bf16.msra.mxu1 %v6268_v33  ;;  %v6361_v33 = vld [vmem:[%s8540_s29 + $0xf70] ss:$8 sps:$4 sm:$0xff]  }
 0x1bf   :  { %3841 = vmatpush1.bf16.msra.mxu0 %v6271_v34  ;;  %3555 = vmatprep.subr.bf16.mxu1 %v6276_v35  ;;  %v6394_v34 = vmov 0.0   ;;  %v3971_v35 = vld [vmem:[%s8542_s25] sm:$0xf] }
 0x1c0   :  { %3842 = vmatprep.subr.bf16.mxu0 %v6279_v36  ;;  %v8139_v36 = vld [vmem:[%s8543_s0] sm:$0xff] }
 0x1c2   :  { %3556 = vmatpush1.bf16.msra.mxu1 %v6274_v38  ;;  %v3955_v38 = vld [vmem:[%s8544_s9 + $0x80] sm:$0xff] }
 0x1c3   :  { %3843 = vmatpush1.bf16.msra.mxu0 %v6277_v20  ;;  %3557 = vmatprep.subr.bf16.mxu1 %v6282_v29  ;;  %v6366_v20 = vld [vmem:[%s8540_s29 + $0xf84] ss:$8 sps:$4 sm:$0xff]  }
 0x1c4   :  { %3844 = vmatprep.subr.bf16.mxu0 %v6285_v39  ;;  %v3956_v29 = vld [vmem:[%s8544_s9 + $0x88] sm:$0xff]  ;;  %v3939_v39 = vld [vmem:[%s8544_s9] sm:$0xff] }
 0x1c6   :  { %3558 = vmatpush1.bf16.msra.mxu1 %v6280_v42  ;;  %v3940_v42 = vld [vmem:[%s8544_s9 + $0x8] sm:$0xff] }
 0x1c7   :  { %3845 = vmatpush1.bf16.msra.mxu0 %v6283_v32  ;;  %5326 = vmatprep.subr.mxu1 %v6394_v34  ;;  %v5435_v32 = vpack.c.bf16 %v3956_v29, %v3955_v38  ;;  %v3953_v29 = vld [vmem:[%s8544_s9 + $0x70] sm:$0xff] }
 0x1c8   :  { %3855 = vmatprep.subr.bf16.mxu0 %v6292_v37  ;;  %v5437_v37 = vpack.c.bf16 %v3940_v42, %v3939_v39  ;;  %v3954_v39 = vld [vmem:[%s8544_s9 + $0x78] sm:$0xff] }
 0x1c9   :  { %3560 = vmatmul.mubr.bf16.vlgmr.msra.gmra.mrb[0].mxu1 %v4695_v44  ;;  %v3958_v44 = vld [vmem:[%s8544_s9 + $0x98] sm:$0xff] }
 0x1ca   :  { %3847 = vmatmul.mubr.bf16.vlgmr.msra.gmra.mrb[0].mxu0 %v4709_v45  ;;  %5328 = vmatprep.mubr.msk.f32.mxu1 %vm6395_vm2, %v6394_v34  ;;  %v3941_v45 = vld [vmem:[%s8544_s9 + $0x10] sm:$0xff] }
 0x1cb   :  { %3856 = vmatpush1.bf16.msra.mxu0 %v6290_v46  ;;  %3887 = vmatprep.mubr.bf16.mxu0 %v4712_v47  ;;  %v5439_v46 = vpack.c.bf16 %v3958_v44, %v3957_v43  ;;  %v3942_v47 = vld [vmem:[%s8544_s9 + $0x18] sm:$0xff]  ;;  %v6396_v43 = vmov 0.0|0.0  }
 0x1cc   :  { %3857 = vmatprep.subr.bf16.mxu0 %v6295_v48  ;;  %5327 = vmatpush3.msk.msra.mxu1 %vm3976_vm0, %v3971_v35  ;;  %v3959_v48 = vld [vmem:[%s8544_s9 + $0xa0] sm:$0xff]  ;;  %v3969_v35 = vld [vmem:[%s8544_s9 + $0xf0] sm:$0xff] }
 0x1cd   :  { %5436 = vmatprep.subr.bf16.mxu1 %v5435_v32  ;;  %v5465_v32 = vpack.c.bf16 %v3954_v39, %v3953_v29 }
 0x1cf   :  { %3858 = vmatpush1.bf16.msra.mxu0 %v6293_v40  ;;  %v3960_v40 = vld [vmem:[%s8544_s9 + $0xa8] sm:$0xff] }
 0x1d0   :  { %3859 = vmatprep.subr.bf16.mxu0 %v6298_v41  ;;  %v5441_v41 = vpack.c.bf16 %v3942_v47, %v3941_v45 }
 0x1d1   :  { %5329 = vmatmul.mubr.msk.f32.vlgmr.msra.gmra.mrb[4].mxu1 %vm3972_vm1, %v8139_v36 }
 0x1d2   :  { %5438 = vmatpush3.bf16.msra.mxu1 %v5437_v37 }
 0x1d3   :  { %3860 = vmatpush1.bf16.msra.mxu0 %v6296_v49  ;;  %v6364_v49 = vld [vmem:[%s8540_s29 + $0xf80] ss:$8 sps:$4 sm:$0xff]   ;;  %5440 = vmatprep.subr.bf16.mxu1 %v5439_v46  ;;  %v599_v46 = vlaneseq }
 0x1d4   :  { %3861 = vmatprep.subr.bf16.mxu0 %v6301_v50  ;;  %v5443_v50 = vpack.c.bf16 %v3960_v40, %v3959_v48  ;;  %v597_v40 = vld [vmem:[%s8545_s28] sm:$0x3] }
 0x1d5   :  { %v600_v47 = vshrl.u32 %v599_v46, 7  ;;  %v4385_v46 = vld [vmem:[%s8519_s14 + $0x18] sm:$0xff] }
 0x1d6   :  { %5442 = vmatpush3.bf16.msra.mxu1 %v5441_v41 }
 0x1d7   :  { %3862 = vmatpush1.bf16.msra.mxu0 %v6299_v51  ;;  %v3943_v51 = vld [vmem:[%s8544_s9 + $0x20] sm:$0xff]  ;;  %5444 = vmatprep.subr.bf16.mxu1 %v5443_v50  ;;  %v8293_v48 = vsub.s32 0, %v600_v47  ;;  %v605_v41 = vsub.s32 1, %v600_v47 }
 0x1d8   :  { %3863 = vmatprep.subr.bf16.mxu0 %v6304_v52  ;;  %v3944_v52 = vld [vmem:[%s8544_s9 + $0x28] sm:$0xff] }
 0x1d9   :  { %v606_v50 = vrot.slane %v597_v40, %v605_v41 }
 0x1db   :  { %3864 = vmatpush1.bf16.msra.mxu0 %v6302_v53  ;;  %v6369_v53 = vld [vmem:[%s8540_s29 + $0xf94] ss:$8 sps:$4 sm:$0xff]  }
 0x1dc   :  { %3865 = vmatprep.subr.bf16.mxu0 %v6307_v54  ;;  %v3961_v54 = vld [vmem:[%s8544_s9 + $0xb0] sm:$0xff] }
 0x1df   :  { %3866 = vmatpush1.bf16.msra.mxu0 %v6305_v55  ;;  %v3962_v55 = vld [vmem:[%s8544_s9 + $0xb8] sm:$0xff] }
 0x1e0   :  { %3867 = vmatprep.subr.bf16.mxu0 %v6310_v56  ;;  %v5445_v56 = vpack.c.bf16 %v3944_v52, %v3943_v51 }
 0x1e2   :  { %5446 = vmatpush3.bf16.msra.mxu1 %v5445_v56  ;;  %v4129_v56 = vld [vmem:[%s8546_s6] sm:$0xff] }
 0x1e3   :  { %3868 = vmatpush1.bf16.msra.mxu0 %v6308_v57  ;;  %v6367_v57 = vld [vmem:[%s8540_s29 + $0xf90] ss:$8 sps:$4 sm:$0xff]  }
 0x1e4   :  { %3869 = vmatprep.subr.bf16.mxu0 %v6313_v58  ;;  %v5447_v58 = vpack.c.bf16 %v3962_v55, %v3961_v54 }
 0x1e6   :  { %5448 = vmatprep.subr.bf16.mxu1 %v5447_v58 }
 0x1e7   :  { %3870 = vmatpush1.bf16.msra.mxu0 %v6311_v59  ;;  %v3945_v59 = vld [vmem:[%s8544_s9 + $0x30] sm:$0xff] }
 0x1e8   :  { %3871 = vmatprep.subr.bf16.mxu0 %v6316_v60  ;;  %v3946_v60 = vld [vmem:[%s8544_s9 + $0x38] sm:$0xff] }
 0x1eb   :  { %3872 = vmatpush1.bf16.msra.mxu0 %v6314_v61  ;;  %v6372_v61 = vld [vmem:[%s8540_s29 + $0xfa4] ss:$8 sps:$4 sm:$0xff]  }
 0x1ec   :  { %3873 = vmatprep.subr.bf16.mxu0 %v6319_v62  ;;  %v3963_v62 = vld [vmem:[%s8544_s9 + $0xc0] sm:$0xff] }
 0x1ef   :  { %3874 = vmatpush1.bf16.msra.mxu0 %v6317_v63  ;;  %v3964_v63 = vld [vmem:[%s8544_s9 + $0xc8] sm:$0xff] }
 0x1f0   :  { %3875 = vmatprep.subr.bf16.mxu0 %v6322_v0  ;;  %v5449_v0 = vpack.c.bf16 %v3946_v60, %v3945_v59 }
 0x1f2   :  { %5450 = vmatpush3.bf16.msra.mxu1 %v5449_v0  ;;  %v4131_v0 = vld [vmem:[%s8546_s6 + $0x10] sm:$0xff] }
 0x1f3   :  { %3876 = vmatpush1.bf16.msra.mxu0 %v6320_v1  ;;  %v6370_v1 = vld [vmem:[%s8540_s29 + $0xfa0] ss:$8 sps:$4 sm:$0xff]  }
 0x1f4   :  { %3877 = vmatprep.subr.bf16.mxu0 %v6325_v2  ;;  %v5451_v2 = vpack.c.bf16 %v3964_v63, %v3963_v62 }
 0x1f6   :  { %5452 = vmatprep.subr.bf16.mxu1 %v5451_v2 }
 0x1f7   :  { %3878 = vmatpush1.bf16.msra.mxu0 %v6323_v3  ;;  %v3947_v3 = vld [vmem:[%s8544_s9 + $0x40] sm:$0xff] }
 0x1f8   :  { %3879 = vmatprep.subr.bf16.mxu0 %v6328_v4  ;;  %v3948_v4 = vld [vmem:[%s8544_s9 + $0x48] sm:$0xff] }
 0x1fb   :  { %3880 = vmatpush1.bf16.msra.mxu0 %v6326_v5  ;;  %v6375_v5 = vld [vmem:[%s8540_s29 + $0xfb4] ss:$8 sps:$4 sm:$0xff]  }
 0x1fc   :  { %3881 = vmatprep.subr.bf16.mxu0 %v6331_v6  ;;  %v3965_v6 = vld [vmem:[%s8544_s9 + $0xd0] sm:$0xff] }
 0x1ff   :  { %3882 = vmatpush1.bf16.msra.mxu0 %v6329_v7  ;;  %v3966_v7 = vld [vmem:[%s8544_s9 + $0xd8] sm:$0xff] }
 0x200   :  { %3883 = vmatprep.subr.bf16.mxu0 %v6334_v8  ;;  %v5453_v8 = vpack.c.bf16 %v3948_v4, %v3947_v3  ;;  %v4133_v3 = vld [vmem:[%s8546_s6 + $0x20] sm:$0xff]  ;;  %v4134_v4 = vld [vmem:[%s8546_s6 + $0x28] sm:$0xff] }
 0x202   :  { %5454 = vmatpush3.bf16.msra.mxu1 %v5453_v8 }
 0x203   :  { %3884 = vmatpush1.bf16.msra.mxu0 %v6332_v9  ;;  %v6373_v9 = vld [vmem:[%s8540_s29 + $0xfb0] ss:$8 sps:$4 sm:$0xff]  }
 0x204   :  { %3885 = vmatprep.subr.bf16.mxu0 %v6337_v10  ;;  %v5455_v10 = vpack.c.bf16 %v3966_v7, %v3965_v6  ;;  %v4135_v6 = vld [vmem:[%s8546_s6 + $0x30] sm:$0xff]  ;;  %v4136_v7 = vld [vmem:[%s8546_s6 + $0x38] sm:$0xff] }
 0x205   :  { %v5477_v8 = vpack.c.bf16 %v4136_v7, %v4135_v6  ;;  %v4554_v7 = vld [vmem:[%s8521_s17 + $0x30] sm:$0xff] }
 0x206   :  { %5456 = vmatprep.subr.bf16.mxu1 %v5455_v10  ;;  %v4138_v10 = vld [vmem:[%s8546_s6 + $0x48] sm:$0xff] }
 0x207   :  { %3886 = vmatpush1.bf16.msra.mxu0 %v6335_v11  ;;  %v3949_v11 = vld [vmem:[%s8544_s9 + $0x50] sm:$0xff] }
 0x208   :  { %3896 = vmatprep.subr.bf16.mxu0 %v6342_v12  ;;  %v3950_v12 = vld [vmem:[%s8544_s9 + $0x58] sm:$0xff] }
 0x20a   :  { %3888 = vmatmul.mubr.bf16.vlgmr.msra.gmra.mrb[0].mxu0 %v4711_v14  ;;  %v6378_v14 = vld [vmem:[%s8540_s29 + $0xfc4] ss:$8 sps:$4 sm:$0xff]  }
 0x20b   :  { %3897 = vmatpush1.bf16.msra.mxu0 %v6340_v15  ;;  %3928 = vmatprep.mubr.bf16.mxu0 %v4714_v16  ;;  %v3967_v15 = vld [vmem:[%s8544_s9 + $0xe0] sm:$0xff]  ;;  %v3968_v16 = vld [vmem:[%s8544_s9 + $0xe8] sm:$0xff] }
 0x20c   :  { %3898 = vmatprep.subr.bf16.mxu0 %v6345_v17  ;;  %v5457_v17 = vpack.c.bf16 %v3950_v12, %v3949_v11  ;;  %v4139_v12 = vld [vmem:[%s8546_s6 + $0x50] sm:$0xff] }
 0x20e   :  { %5458 = vmatpush3.bf16.msra.mxu1 %v5457_v17  ;;  %v4142_v17 = vld [vmem:[%s8546_s6 + $0x68] sm:$0xff] }
 0x20f   :  { %3899 = vmatpush1.bf16.msra.mxu0 %v6343_v19  ;;  %v6376_v19 = vld [vmem:[%s8540_s29 + $0xfc0] ss:$8 sps:$4 sm:$0xff]  }
 0x210   :  { %3900 = vmatprep.subr.bf16.mxu0 %v6348_v21  ;;  %v5459_v21 = vpack.c.bf16 %v3968_v16, %v3967_v15  ;;  %v4141_v16 = vld [vmem:[%s8546_s6 + $0x60] sm:$0xff] }
 0x212   :  { %5460 = vmatprep.subr.bf16.mxu1 %v5459_v21  ;;  %v4143_v21 = vld [vmem:[%s8546_s6 + $0x70] sm:$0xff] }
 0x213   :  { %3901 = vmatpush1.bf16.msra.mxu0 %v6346_v22  ;;  %v6381_v22 = vld [vmem:[%s8540_s29 + $0xfd4] ss:$8 sps:$4 sm:$0xff]  }
 0x214   :  { %3902 = vmatprep.subr.bf16.mxu0 %v6351_v23  ;;  %v6379_v23 = vld [vmem:[%s8540_s29 + $0xfd0] ss:$8 sps:$4 sm:$0xff]  }
 0x217   :  { %3903 = vmatpush1.bf16.msra.mxu0 %v6349_v26  ;;  %v6384_v26 = vld [vmem:[%s8540_s29 + $0xfe4] ss:$8 sps:$4 sm:$0xff]  }
 0x218   :  { %3904 = vmatprep.subr.bf16.mxu0 %v6354_v18  ;;  %v6382_v18 = vld [vmem:[%s8540_s29 + $0xfe0] ss:$8 sps:$4 sm:$0xff]  }
 0x21b   :  { %3905 = vmatpush1.bf16.msra.mxu0 %v6352_v27  ;;  %v6387_v27 = vld [vmem:[%s8540_s29 + $0xff4] ss:$8 sps:$4 sm:$0xff]  }
 0x21c   :  { %3906 = vmatprep.subr.bf16.mxu0 %v6357_v28  ;;  %v6385_v28 = vld [vmem:[%s8540_s29 + $0xff0] ss:$8 sps:$4 sm:$0xff]  }
 0x21f   :  { %3907 = vmatpush1.bf16.msra.mxu0 %v6355_v30  ;;  %v4713_v30 = vcombine.low %v8079_v13, %v8079_v13  ;;  %v3970_v13 = vld [vmem:[%s8544_s9 + $0xf8] sm:$0xff] }
 0x220   :  { %3908 = vmatprep.subr.bf16.mxu0 %v6360_v31  ;;  %v3951_v31 = vld [vmem:[%s8544_s9 + $0x60] sm:$0xff] }
 0x223   :  { %3909 = vmatpush1.bf16.msra.mxu0 %v6358_v24  ;;  %v3952_v24 = vld [vmem:[%s8544_s9 + $0x68] sm:$0xff] }
 0x224   :  { %3910 = vmatprep.subr.bf16.mxu0 %v6363_v25  ;;  %v5461_v25 = vpack.c.bf16 %v3952_v24, %v3951_v31 }
 0x226   :  { %5462 = vmatpush3.bf16.msra.mxu1 %v5461_v25  ;;  %v4225_v25 = vld [vmem:[%s8514_s12] sm:$0xff] }
 0x227   :  { %3911 = vmatpush1.bf16.msra.mxu0 %v6361_v33 }
 0x228   :  { %3912 = vmatprep.subr.bf16.mxu0 %v6366_v20  ;;  %v5463_v20 = vpack.c.bf16 %v3970_v13, %v3969_v35  ;;  %v4223_v35 = vld [vmem:[%s8516_s11] sm:$0xff] }
 0x229   :  { %v5230_v13 = vld [vmem:[%s8517_s10] ss:$0 sm:$0xff] }
 0x22a   :  { %5464 = vmatprep.subr.bf16.mxu1 %v5463_v20 }
 0x22b   :  { %3913 = vmatpush1.bf16.msra.mxu0 %v6364_v49  ;;  %5466 = vmatpush3.bf16.msra.mxu1 %v5465_v32  ;;  %v602_v49 = vrot.slane %v597_v40, %v8293_v48  ;;  %v4382_v32 = vld [vmem:[%s8519_s14] sm:$0xff] }
 0x22c   :  { %3914 = vmatprep.subr.bf16.mxu0 %v6369_v53  ;;  %5467 = vmatprep.subr.bf16.mxu1 %v6396_v43 }
 0x22f   :  { %3915 = vmatpush1.bf16.msra.mxu0 %v6367_v57  ;;  %v4130_v57 = vld [vmem:[%s8546_s6 + $0x8] sm:$0xff] }
 0x230   :  { %3916 = vmatprep.subr.bf16.mxu0 %v6372_v61  ;;  %v5468_v62 = vpack.c.bf16 %v4130_v57, %v4129_v56 }
 0x233   :  { %3917 = vmatpush1.bf16.msra.mxu0 %v6370_v1  ;;  %v4132_v1 = vld [vmem:[%s8546_s6 + $0x18] sm:$0xff] }
 0x234   :  { %3918 = vmatprep.subr.bf16.mxu0 %v6375_v5  ;;  %v5471_v2 = vpack.c.bf16 %v4132_v1, %v4131_v0  ;;  %v5474_v5 = vpack.c.bf16 %v4134_v4, %v4133_v3  ;;  %v4550_v1 = vld [vmem:[%s8521_s17 + $0x10] sm:$0xff]  ;;  %v4552_v4 = vld [vmem:[%s8521_s17 + $0x20] sm:$0xff] }
 0x237   :  { %3919 = vmatpush1.bf16.msra.mxu0 %v6373_v9  ;;  %v4137_v9 = vld [vmem:[%s8546_s6 + $0x40] sm:$0xff] }
 0x238   :  { %3920 = vmatprep.subr.bf16.mxu0 %v6378_v14  ;;  %v5480_v11 = vpack.c.bf16 %v4138_v10, %v4137_v9  ;;  %v4140_v14 = vld [vmem:[%s8546_s6 + $0x58] sm:$0xff]  ;;  %v4556_v9 = vld [vmem:[%s8521_s17 + $0x40] sm:$0xff]  ;;  %v4557_v10 = vld [vmem:[%s8521_s17 + $0x48] sm:$0xff] }
 0x239   :  { %v5483_v15 = vpack.c.bf16 %v4140_v14, %v4139_v12  ;;  %v4558_v12 = vld [vmem:[%s8521_s17 + $0x50] sm:$0xff]  ;;  %v4559_v14 = vld [vmem:[%s8521_s17 + $0x58] sm:$0xff] }
 0x23b   :  { %3921 = vmatpush1.bf16.msra.mxu0 %v6376_v19  ;;  %v5486_v19 = vpack.c.bf16 %v4142_v17, %v4141_v16  ;;  %v4560_v16 = vld [vmem:[%s8521_s17 + $0x60] sm:$0xff]  ;;  %v4561_v17 = vld [vmem:[%s8521_s17 + $0x68] sm:$0xff] }
 0x23c   :  { %3922 = vmatprep.subr.bf16.mxu0 %v6381_v22  ;;  %v4144_v22 = vld [vmem:[%s8546_s6 + $0x78] sm:$0xff] }
 0x23f   :  { %3923 = vmatpush1.bf16.msra.mxu0 %v6379_v23  ;;  %v5489_v23 = vpack.c.bf16 %v4144_v22, %v4143_v21  ;;  %v4562_v21 = vld [vmem:[%s8521_s17 + $0x70] sm:$0xff]  ;;  %v4563_v22 = vld [vmem:[%s8521_s17 + $0x78] sm:$0xff] }
 0x240   :  { %3924 = vmatprep.subr.bf16.mxu0 %v6384_v26 }
 0x243   :  { %3925 = vmatpush1.bf16.msra.mxu0 %v6382_v18 }
 0x244   :  { %3926 = vmatprep.subr.bf16.mxu0 %v6387_v27 }
 0x247   :  { %3927 = vmatpush1.bf16.msra.mxu0 %v6385_v28  ;;  %v5229_v28 = vld [vmem:[%s8513_s8] ss:$0 sm:$0xff] }
 0x24a   :  { %3929 = vmatmul.mubr.bf16.vlgmr.msra.gmra.mrb[0].mxu0 %v4713_v30 }
 0x29c   :  { %v3561_v33 = vpop.f32.mrb[0].mxu1 }
 0x29d   :  { %v3563_v38 = vpop.f32.mrb[1].mxu1  ;;  %v5527_v51 = vadd.f32 %v3561_v33, %v602_v49  ;;  %v4224_v33 = vld [vmem:[%s8515_s2] sm:$0xff] }
 0x29e   :  { %v3565_v42 = vpop.f32.mrb[2].mxu1  ;;  %v5529_v52 = vadd.f32 %v3563_v38, %v606_v50  ;;  %v4386_v49 = vld [vmem:[%s8519_s14 + $0x20] sm:$0xff] }
 0x29f   :  { %v3566_v37 = vpop.f32.mrb[3].mxu1  ;;  %v4390_v42 = vld [vmem:[%s8518_s15] sm:$0xf] }
 0x2a0   :  { %v4383_v37 = vld [vmem:[%s8519_s14 + $0x8] sm:$0xff] }
 0x2a4   :  { %v8291_v44 = vpop.f32.mrb[4].mxu1 }
 0x2a5   :  { %v5330_v45 = vpop.f32.mrb[5].mxu1 }
 0x2a6   :  { %v4384_v45 = vld [vmem:[%s8519_s14 + $0x10] sm:$0xff] }
 0x2a7   :  { %v5495_v47 = vpack.c.bf16 %v4385_v46, %v4384_v45 }
 0x31d   :  { %v3930_v53 = vpop.f32.mrb[0].mxu0 }
 0x31e   :  { %v5528_v54 = vadd.f32 %v5527_v51, %v3930_v53  ;;  %v3932_v55 = vpop.f32.mrb[1].mxu0  ;;  %v4388_v51 = vld [vmem:[%s8519_s14 + $0x30] sm:$0xff] }
 0x31f   :  { %v5530_v58 = vadd.f32 %v5529_v52, %v3932_v55  ;;  %v3934_v59 = vpop.f32.mrb[2].mxu0  ;;  %v4389_v52 = vld [vmem:[%s8519_s14 + $0x38] sm:$0xff]  ;;  %v5233_v55 = vld [vmem:[%s8520_s13] ss:$0 sm:$0xff] }
 0x320   :  { %v3935_v60 = vpop.f32.mrb[3].mxu0  ;;  %v3937_v63 = vmax.f32 %v5528_v54, 0.0  ;;  %v5501_v53 = vpack.c.bf16 %v4389_v52, %v4388_v51  ;;  %v4549_v59 = vld [vmem:[%s8521_s17 + $0x8] sm:$0xff] }
 0x321   :  { %v3938_v61 = vmax.f32 %v5530_v58, 0.0  ;;  %v4548_v58 = vld [vmem:[%s8521_s17] sm:$0xff] }
 0x323   :  { %4114 = vmatprep.mubr.f32.mxu1 %v3938_v61 }
 0x324   :  { %4115 = vmatmul.mubr.f32.vlgmr.msra.gmra.mrb[6].mxu1 %v3937_v63 }
 0x325   :  { %5469 = vmatpush3.bf16.msra.mxu1 %v5468_v62  ;;  %5363 = vmatprep.mubr.msk.f32.mxu1 %vm6395_vm2, %v6394_v34  ;;  %v5504_v62 = vpack.c.bf16 %v4549_v59, %v4548_v58 }
 0x326   :  { %5470 = vmatprep.subr.bf16.mxu1 %v6396_v43 }
 0x329   :  { %5472 = vmatpush3.bf16.msra.mxu1 %v5471_v2  ;;  %v4551_v2 = vld [vmem:[%s8521_s17 + $0x18] sm:$0xff] }
 0x32a   :  { %5473 = vmatprep.subr.bf16.mxu1 %v6396_v43  ;;  %v5507_v3 = vpack.c.bf16 %v4551_v2, %v4550_v1 }
 0x32d   :  { %5475 = vmatpush3.bf16.msra.mxu1 %v5474_v5  ;;  %v4553_v5 = vld [vmem:[%s8521_s17 + $0x28] sm:$0xff] }
 0x32e   :  { %5476 = vmatprep.subr.bf16.mxu1 %v6396_v43  ;;  %v5510_v6 = vpack.c.bf16 %v4553_v5, %v4552_v4 }
 0x331   :  { %5478 = vmatpush3.bf16.msra.mxu1 %v5477_v8 }
 0x332   :  { %5479 = vmatprep.subr.bf16.mxu1 %v6396_v43 }
 0x335   :  { %5481 = vmatpush3.bf16.msra.mxu1 %v5480_v11  ;;  %v5516_v11 = vpack.c.bf16 %v4557_v10, %v4556_v9 }
 0x336   :  { %5482 = vmatprep.subr.bf16.mxu1 %v6396_v43 }
 0x339   :  { %5484 = vmatpush3.bf16.msra.mxu1 %v5483_v15  ;;  %v5519_v15 = vpack.c.bf16 %v4559_v14, %v4558_v12 }
 0x33a   :  { %5485 = vmatprep.subr.bf16.mxu1 %v6396_v43 }
 0x33d   :  { %5487 = vmatpush3.bf16.msra.mxu1 %v5486_v19  ;;  %v5522_v19 = vpack.c.bf16 %v4561_v17, %v4560_v16 }
 0x33e   :  { %5488 = vmatprep.subr.bf16.mxu1 %v6396_v43 }
 0x341   :  { %5490 = vmatpush3.bf16.msra.mxu1 %v5489_v23  ;;  %v5525_v23 = vpack.c.bf16 %v4563_v22, %v4562_v21 }
 0x342   :  { %5366 = vmatprep.subr.mxu1 %v6394_v34 }
 0x3f7   :  { %v5274_v26 = vpop.f32.mrb[6].mxu1 }
 0x3f8   :  { %v5275_v18 = vpop.f32.mrb[7].mxu1 }
 0x3f9   :  { %v5276_v27 = vadd.f32 %v5275_v18, %v5274_v26  ;;  %v4641_v26 = vld [vmem:[%s8523_s19] sm:$0x1] }
 0x3fa   :  { %v4642_v18 = vld [vmem:[%s8522_s3] sm:$0xff] }
 0x3fb   :  { %v4117_v30 = vadd.f32 %v5276_v27, %v8291_v44  ;;  %v5492_v44 = vpack.c.bf16 %v4383_v37, %v4382_v32  ;;  %v4653_v27 = vmul.f32 -0.5, %v4642_v18 }
 0x3fd   :  { %v4127_v31 = vadd.f32 %v5229_v28, %v4117_v30  ;;  %v4654_v28 = vmul.f32 %v4653_v27, %v4642_v18  ;;  %v4660_v30 = vrot.slane %v4641_v26, %v8293_v48 }
 0x3ff   :  { %v4128_v24 = vmax.f32 %v4127_v31, 0.0  ;;  %v5239_v31 = vadd.f32 -0.9189385, %v4654_v28 }
 0x401   :  { %5364 = vmatmul.mubr.f32.vlgmr.msra.gmra.mrb[8].mxu1 %v4128_v24  ;;  %v4662_v24 = vsub.f32 %v5239_v31, %v4660_v30 }
 0x402   :  { %5367 = vmatpush3.msra.mxu1 %v4225_v25  ;;  %5368 = vmatprep.mubr.msk.f32.mxu1 %vm6395_vm2, %v6394_v34 }
 0x403   :  { %5371 = vmatprep.subr.mxu1 %v6394_v34  ;;  %v4666_v25 = vsel %vm4663_vm5, %v4662_v24, 0.0 }
 0x404   :  { %4667 = vadd.xlane.f32.xlu0 %v4666_v25 }
 0x405   :  { %5369 = vmatmul.mubr.msk.f32.vlgmr.msra.gmra.mrb[10].mxu1 %vm4226_vm3, %v4224_v33  ;;  %v5237_v33 = vld [vmem:[%s8524_s16] ss:$0 sm:$0xff] }
 0x406   :  { %5373 = vmatprep.mubr.msk.f32.mxu1 %vm6395_vm2, %v6394_v34  ;;  %5372 = vmatpush3.msra.mxu1 %v4223_v35 }
 0x407   :  { %5376 = vmatprep.subr.mxu1 %v6394_v34 }
 0x4d4   :  { %v4218_v38 = vpop.f32.mrb[8].mxu1 }
 0x4d5   :  { %v4219_v20 = vadd.f32 %v5230_v13, %v4218_v38  ;;  %v5365_v29 = vpop.f32.mrb[9].mxu1 }
 0x4d7   :  { %v4222_v39 = vmax.f32 %v4219_v20, 0.0 }
 0x4d8   :  { %v4296_v40 = vpop.f32.mrb[10].mxu1 }
 0x4d9   :  { %5374 = vmatmul.mubr.msk.f32.vlgmr.msra.gmra.mrb[12].mxu1 %vm4226_vm3, %v4222_v39  ;;  %v5370_v41 = vpop.f32.mrb[11].mxu1  ;;  %v4668_v39 = vpop.xlane.xlu0 %4667 }
 0x4da   :  { %5377 = vmatpush3.msk.msra.mxu1 %vm3976_vm0, %v4390_v42  ;;  %5378 = vmatprep.mubr.msk.f32.mxu1 %vm6395_vm2, %v6394_v34  ;;  %4670 = vst.msk [vmem:[%s8525_s21] sm:$0xff] %vm4669_vm6, %v4668_v39  ;;  %v4643_v42 = vmul.f32 1.442695, %v4641_v26 }
 0x4db   :  { %5491 = vmatprep.subr.bf16.mxu1 %v6396_v43 }
 0x4dd   :  { %5379 = vmatmul.mubr.msk.f32.vlgmr.msra.gmra.mrb[14].mxu1 %vm3972_vm1, %v8139_v36  ;;  %v4387_v36 = vld [vmem:[%s8519_s14 + $0x28] sm:$0xff] }
 0x4de   :  { %5493 = vmatpush3.bf16.msra.mxu1 %v5492_v44  ;;  %5397 = vmatprep.mubr.msk.f32.mxu1 %vm6395_vm2, %v6394_v34  ;;  %v5498_v50 = vpack.c.bf16 %v4387_v36, %v4386_v49  ;;  %v5238_v44 = vld [vmem:[%s8526_s18] ss:$0 sm:$0xff] }
 0x4df   :  { %5494 = vmatprep.subr.bf16.mxu1 %v6396_v43 }
 0x4e2   :  { %5496 = vmatpush3.bf16.msra.mxu1 %v5495_v47 }
 0x4e3   :  { %5497 = vmatprep.subr.bf16.mxu1 %v6396_v43 }
 0x4e6   :  { %5499 = vmatpush3.bf16.msra.mxu1 %v5498_v50 }
 0x4e7   :  { %5500 = vmatprep.subr.bf16.mxu1 %v6396_v43 }
 0x4ea   :  { %5502 = vmatpush3.bf16.msra.mxu1 %v5501_v53 }
 0x4eb   :  { %5503 = vmatprep.subr.bf16.mxu1 %v6396_v43 }
 0x5ac   :  { %v4369_v54 = vpop.f32.mrb[12].mxu1 }
 0x5ad   :  { %v4370_v56 = vadd.f32 %v4369_v54, %v4296_v40  ;;  %v5375_v57 = vpop.f32.mrb[13].mxu1 }
 0x5af   :  { %v4380_v60 = vadd.f32 %v5233_v55, %v4370_v56 }
 0x5b0   :  { %v4460_v61 = vpop.f32.mrb[14].mxu1 }
 0x5b1   :  { %v4381_v63 = vmax.f32 %v4380_v60, 0.0  ;;  %v5380_v0 = vpop.f32.mrb[15].mxu1 }
 0x5b3   :  { %5398 = vmatmul.mubr.msk.f32.vlgmr.msra.gmra.mrb[16].mxu1 %vm4464_vm4, %v4381_v63 }
 0x5b4   :  { %5505 = vmatpush3.bf16.msra.mxu1 %v5504_v62  ;;  %5432 = vmatprep.mubr.msk.f32.mxu1 %vm6395_vm2, %v6394_v34  ;;  %v4555_v34 = vld [vmem:[%s8521_s17 + $0x38] sm:$0xff] }
 0x5b5   :  { %5506 = vmatprep.subr.bf16.mxu1 %v6396_v43  ;;  %v5513_v8 = vpack.c.bf16 %v4555_v34, %v4554_v7 }
 0x5b8   :  { %5508 = vmatpush3.bf16.msra.mxu1 %v5507_v3 }
 0x5b9   :  { %5509 = vmatprep.subr.bf16.mxu1 %v6396_v43 }
 0x5bc   :  { %5511 = vmatpush3.bf16.msra.mxu1 %v5510_v6 }
 0x5bd   :  { %5512 = vmatprep.subr.bf16.mxu1 %v6396_v43 }
 0x5c0   :  { %5514 = vmatpush3.bf16.msra.mxu1 %v5513_v8 }
 0x5c1   :  { %5515 = vmatprep.subr.bf16.mxu1 %v6396_v43 }
 0x5c4   :  { %5517 = vmatpush3.bf16.msra.mxu1 %v5516_v11 }
 0x5c5   :  { %5518 = vmatprep.subr.bf16.mxu1 %v6396_v43 }
 0x5c8   :  { %5520 = vmatpush3.bf16.msra.mxu1 %v5519_v15 }
 0x5c9   :  { %5521 = vmatprep.subr.bf16.mxu1 %v6396_v43 }
 0x5cc   :  { %5523 = vmatpush3.bf16.msra.mxu1 %v5522_v19 }
 0x5cd   :  { %5524 = vmatprep.subr.bf16.mxu1 %v6396_v43 }
 0x5d0   :  { %5526 = vmatpush3.bf16.msra.mxu1 %v5525_v23 }
 0x686   :  { %v4534_v43 = vpop.f32.mrb[16].mxu1 }
 0x687   :  { %v4535_v35 = vadd.f32 %v4534_v43, %v4460_v61  ;;  %v5399_v13 = vpop.f32.mrb[17].mxu1 }
 0x689   :  { %v4545_v38 = vadd.f32 %v5237_v33, %v4535_v35 }
 0x68b   :  { %v4546_v20 = vmax.f32 %v4545_v38, 0.0 }
 0x68d   :  { %6390 = vtanh.f32 %v4546_v20 }
 0x68e   :  { %6392 = vpow2.f32 %v4643_v42 }
 0x697   :  { %v6391_v29 = vpop.eup %6390 }
 0x698   :  { %5433 = vmatmul.mubr.f32.vlgmr.msra.gmra.mrb[18].mxu1 %v6391_v29  ;;  %v6393_v32 = vpop.eup %6392 }
 0x699   :  { %v4649_v37 = vrot.slane %v6393_v32, %v8293_v48 }
 0x69b   :  { %v4651_v45 = vmul.f32 %v4649_v37, %v4642_v18 }
 0x76b   :  { %v4637_v46 = vpop.f32.mrb[18].mxu1 }
 0x76c   :  { %v4638_v47 = vadd.f32 %v5238_v44, %v4637_v46  ;;  %v5434_v40 = vpop.f32.mrb[19].mxu1 }
 0x76e   :  { %v4652_v41 = vadd.f32 %v4651_v45, %v4638_v47  ;;  %4665 = vst.msk [vmem:[%s8527_s22] sm:$0xff] %vm4663_vm5, %v4638_v47 }
 0x770   :  { %4664 = vst.msk [vmem:[%s8528_s20] sm:$0xff] %vm4663_vm5, %v4652_v41 }

</bundles_post_ra>
